<compile_context>
chip_gen: v7x
topology: tpu7x:2x2x1
jax: 0.10.0
libtpu: 0.0.40
codegen_flags: <defaults>
</compile_context>

<pallas_src>
import jax
import jax.numpy as jnp
from jax.experimental import pallas as pl
from jax.experimental.pallas import tpu as pltpu


# --------------------------------------------------------------------------- kernels

def downsample_kernel(x_ref, w_ref, b_ref, o_ref, pad_ref):
    """Conv2d(k=4, s=2, p=1) for one batch element.

    x_ref  : (1, 4, h, w, C)  stride-2 parity planes, plane p=py*2+px = x[2a+py, 2b+px]
    w_ref  : (16*C, C)        bf16 im2col weight, tap-major (kh, kw)
    b_ref  : (1, C)           bias
    o_ref  : (1, h*w, C)      downsampled features (row-major spatial tokens)
    pad_ref: (4, h+2, w+2, C) VMEM scratch (zero halo handled in-kernel)
    """
    _, _, h, w, C = x_ref.shape
    pad_ref[...] = jnp.zeros_like(pad_ref)
    pad_ref[:, 1:h + 1, 1:w + 1, :] = x_ref[0]
    # kernel tap index kh -> (input-row parity, slice start inside the padded plane)
    PAR = ((1, 0), (0, 1), (1, 1), (0, 2))
    cols = []
    for kh in range(4):
        py, rs = PAR[kh]
        for kw in range(4):
            px, cs = PAR[kw]
            sl = pad_ref[py * 2 + px, rs:rs + h, cs:cs + w, :]      # (h, w, C)
            cols.append(sl.reshape(h * w, C))
    x16 = jnp.concatenate(cols, axis=1).astype(jnp.bfloat16)        # (h*w, 16C)
    acc = jnp.dot(x16, w_ref[...], preferred_element_type=jnp.float32)
    o_ref[0] = (acc + b_ref[...]).astype(o_ref.dtype)


def attention_kernel(x_ref, w_ref, b_ref, o_ref, s_ref):
    """Fused QKV + softmax(k q^T) @ v for one (batch, head).

    x_ref: (1, L, D) tokens   w_ref: (D, 3D)   b_ref: (1, 3D)
    o_ref: (1, D, L) attention output stored transposed (lane-dense)
    s_ref: (1, 1, L) column sums of softmax(attn)  (coarse scores)
    """
    D = x_ref.shape[2]
    x = x_ref[0]                                                    # (L, D)
    qkv = jnp.dot(x, w_ref[...], preferred_element_type=jnp.float32) + b_ref[...]
    q = qkv[:, :D]
    k = qkv[:, D:2 * D]
    v = qkv[:, 2 * D:]
    logits = jnp.dot(k, q.T, preferred_element_type=jnp.float32)    # (L, L): k_i . q_j
    m = jnp.max(logits, axis=-1, keepdims=True)
    e = jnp.exp(logits - m)
    attn = e / jnp.sum(e, axis=-1, keepdims=True)                   # softmax over j
    s_ref[0] = jnp.sum(attn, axis=0, keepdims=True)                 # (1, L)
    out = jnp.dot(attn, v, preferred_element_type=jnp.float32)      # (L, D)
    o_ref[0] = out.T.astype(o_ref.dtype)


def upsample_kernel(x_ref, w_ref, b_ref, o_ref, pad_ref):
    """ConvTranspose2d(k=4, s=2, p=1) for one batch element, all 4 parities at once.

    x_ref  : (1, C, h*w)      input in channel-major / flattened-spatial layout
    w_ref  : (9*C, 4*C)       bf16 im2col weight over the 3x3 halo, zero-filled taps
    b_ref  : (1, 4*C)
    o_ref  : (1, h*w, 4*C)    sub-pixel output: [i*w+j, (ph*2+pw)*C+co] = y[co, 2i+ph, 2j+pw]
    pad_ref: (h+2, w+2, C)    VMEM scratch (zero halo handled in-kernel)
    """
    C = x_ref.shape[1]
    h = pad_ref.shape[0] - 2
    w = pad_ref.shape[1] - 2
    x = x_ref[0]                                                    # (C, h*w)
    xhwc = x.T.reshape(h, w, C)                                     # (h, w, C)
    pad_ref[...] = jnp.zeros_like(pad_ref)
    pad_ref[1:h + 1, 1:w + 1, :] = xhwc
    cols = []
    for r in range(3):
        for c in range(3):
            cols.append(pad_ref[r:r + h, c:c + w, :].reshape(h * w, C))
    x9 = jnp.concatenate(cols, axis=1).astype(jnp.bfloat16)         # (h*w, 9C)
    y = jnp.dot(x9, w_ref[...], preferred_element_type=jnp.float32) + b_ref[...]
    o_ref[0] = y.astype(o_ref.dtype)


def dwconv_kernel(x_ref, dw_ref, s1_ref, t1_ref, pw_ref, s2_ref, t2_ref, o_ref, pad_ref):
    """Depthwise 3x3 + BN + ReLU6 + pointwise 1x1 + BN + ReLU6 (NHWC), one batch element.

    x_ref : (1, H, W, C)   dw_ref: (9, C)   s*/t*: (1, C)   pw_ref: (C, C) bf16
    o_ref : (1, H, W, C)   pad_ref: (H+2, W+2, C) VMEM scratch
    """
    Hf = x_ref.shape[1]
    Wf = x_ref.shape[2]
    C = x_ref.shape[3]
    pad_ref[...] = jnp.zeros_like(pad_ref)
    pad_ref[1:Hf + 1, 1:Wf + 1, :] = x_ref[0]
    acc = jnp.zeros((Hf, Wf, C), jnp.float32)
    for r in range(3):
        for c in range(3):
            acc = acc + pad_ref[r:r + Hf, c:c + Wf, :] * dw_ref[r * 3 + c, :]
    y1 = jnp.clip(acc * s1_ref[...] + t1_ref[...], 0.0, 6.0)
    y2 = jnp.dot(y1.reshape(Hf * Wf, C).astype(jnp.bfloat16), pw_ref[...],
                 preferred_element_type=jnp.float32)
    y2 = jnp.clip(y2 * s2_ref[...] + t2_ref[...], 0.0, 6.0)
    o_ref[0] = y2.reshape(Hf, Wf, C).astype(o_ref.dtype)


# --------------------------------------------------------------------------- wrappers

def _cparams():
    return pltpu.CompilerParams(dimension_semantics=("parallel",))


def downsample_pallas(x_nchw, w16, b2):
    B, C, H, W = x_nchw.shape
    h, w = H // 2, W // 2
    # stride-2 parity planes (one wrapper pass over the input, replaces transpose+pad)
    planes = (x_nchw.reshape(B, C, h, 2, w, 2)
              .transpose(0, 3, 5, 2, 4, 1)
              .reshape(B, 4, h, w, C))
    return pl.pallas_call(
        downsample_kernel,
        out_shape=jax.ShapeDtypeStruct((B, h * w, C), jnp.float32),
        grid_spec=pltpu.PrefetchScalarGridSpec(
            num_scalar_prefetch=0, grid=(B,),
            in_specs=[pl.BlockSpec((1, 4, h, w, C), lambda b: (b, 0, 0, 0, 0)),
                      pl.BlockSpec((16 * C, C), lambda b: (0, 0)),
                      pl.BlockSpec((1, C), lambda b: (0, 0))],
            out_specs=pl.BlockSpec((1, h * w, C), lambda b: (b, 0, 0)),
            scratch_shapes=[pltpu.VMEM((4, h + 2, w + 2, C), jnp.float32)]),
        compiler_params=_cparams(),
    )(planes, w16, b2)


def attention_pallas(tokens, wqkv, bqkv):
    G, L, D = tokens.shape
    return pl.pallas_call(
        attention_kernel,
        out_shape=(jax.ShapeDtypeStruct((G, D, L), jnp.float32),
                   jax.ShapeDtypeStruct((G, 1, L), jnp.float32)),
        grid_spec=pltpu.PrefetchScalarGridSpec(
            num_scalar_prefetch=0, grid=(G,),
            in_specs=[pl.BlockSpec((1, L, D), lambda g: (g, 0, 0)),
                      pl.BlockSpec((D, 3 * D), lambda g: (0, 0)),
                      pl.BlockSpec((1, 3 * D), lambda g: (0, 0))],
            out_specs=[pl.BlockSpec((1, D, L), lambda g: (g, 0, 0)),
                       pl.BlockSpec((1, 1, L), lambda g: (g, 0, 0))]),
        compiler_params=_cparams(),
    )(tokens, wqkv, bqkv)


def upsample_pallas(x_bcl, w9, b4, h, w):
    B, C, L = x_bcl.shape
    return pl.pallas_call(
        upsample_kernel,
        out_shape=jax.ShapeDtypeStruct((B, L, 4 * C), jnp.float32),
        grid_spec=pltpu.PrefetchScalarGridSpec(
            num_scalar_prefetch=0, grid=(B,),
            in_specs=[pl.BlockSpec((1, C, L), lambda b: (b, 0, 0)),
                      pl.BlockSpec((9 * C, 4 * C), lambda b: (0, 0)),
                      pl.BlockSpec((1, 4 * C), lambda b: (0, 0))],
            out_specs=pl.BlockSpec((1, L, 4 * C), lambda b: (b, 0, 0)),
            scratch_shapes=[pltpu.VMEM((h + 2, w + 2, C), jnp.float32)]),
        compiler_params=_cparams(),
    )(x_bcl, w9, b4)


def dwconv_pallas(x_nhwc, p):
    B, Hf, Wf, C = x_nhwc.shape
    vec = lambda: pl.BlockSpec((1, C), lambda b: (0, 0))
    return pl.pallas_call(
        dwconv_kernel,
        out_shape=jax.ShapeDtypeStruct((B, Hf, Wf, C), jnp.float32),
        grid_spec=pltpu.PrefetchScalarGridSpec(
            num_scalar_prefetch=0, grid=(B,),
            in_specs=[pl.BlockSpec((1, Hf, Wf, C), lambda b: (b, 0, 0, 0)),
                      pl.BlockSpec((9, C), lambda b: (0, 0)),
                      vec(), vec(),
                      pl.BlockSpec((C, C), lambda b: (0, 0)),
                      vec(), vec()],
            out_specs=pl.BlockSpec((1, Hf, Wf, C), lambda b: (b, 0, 0, 0)),
            scratch_shapes=[pltpu.VMEM((Hf + 2, Wf + 2, C), jnp.float32)]),
        compiler_params=_cparams(),
    )(x_nhwc, p['dw9'], p['bn1_s'], p['bn1_t'], p['pw'], p['bn2_s'], p['bn2_t'])


# ------------------------------------------------------------------- parameter prep

def prepare_params(rp, head_dim):
    C = rp['down_b'].shape[0]
    # Downsample im2col weight: rows ordered (kh, kw, ci) -> (16C, C)
    w16 = jnp.concatenate(
        [rp['down_w'][:, :, kh, kw].T for kh in range(4) for kw in range(4)], axis=0)
    # Upsample im2col weight over the 3x3 halo: (9C, 4C), zero-filled unused taps
    w9 = jnp.zeros((9 * C, 4 * C), jnp.float32)
    for ph in range(2):
        for pw in range(2):
            for dh in range(2):
                for dw in range(2):
                    r, c = ph + dh, pw + dw
                    kh, kw = 3 - ph - 2 * dh, 3 - pw - 2 * dw
                    w9 = w9.at[(r * 3 + c) * C:(r * 3 + c + 1) * C,
                               (ph * 2 + pw) * C:(ph * 2 + pw + 1) * C
                               ].set(rp['up_w'][:, :, kh, kw])
    eps = 1e-5
    s1 = rp['bn1_g'] / jnp.sqrt(rp['bn1_v'] + eps)
    t1 = rp['bn1_b'] - rp['bn1_m'] * s1
    s2 = rp['bn2_g'] / jnp.sqrt(rp['bn2_v'] + eps)
    t2 = rp['bn2_b'] - rp['bn2_m'] * s2
    return dict(
        down_w16=w16.astype(jnp.bfloat16), down_b2=rp['down_b'][None, :],
        c_wqkv=rp['c_w'].T, c_bqkv=rp['c_b'][None, :],
        up_w9=w9.astype(jnp.bfloat16), up_b4=jnp.tile(rp['up_b'], 4)[None, :],
        t_wqkv=rp['t_w'].T, t_bqkv=rp['t_b'][None, :],
        dw9=rp['dw_w'][:, 0, :, :].reshape(C, 9).T,                  # (9, C)
        pw=rp['pw_w'][:, :, 0, 0].T.astype(jnp.bfloat16),            # (Cin, Cout)
        bn1_s=s1[None, :], bn1_t=t1[None, :],
        bn2_s=s2[None, :], bn2_t=t2[None, :],
    )


# ----------------------------------------------------------------------- full forward

def region_selection_attention(x, p, head_dim):
    B, C, H, W = x.shape
    heads = C // head_dim
    h, w = H // 2, W // 2
    seq = h * w
    # ---- CoarseSelfAttention: downsample -> attention -> top-k -> upsample ----
    xd = downsample_pallas(x, p['down_w16'], p['down_b2'])            # (B, seq, C)
    tokens = (xd.reshape(B, seq, heads, head_dim)
              .transpose(0, 2, 1, 3).reshape(B * heads, seq, head_dim))
    out_t, colsum = attention_pallas(tokens, p['c_wqkv'], p['c_bqkv'])
    coarse_attn = colsum.reshape(B, heads, seq)
    kf = seq // 4
    _, top_k = jax.lax.top_k(coarse_attn, kf)                         # (B, heads, kf)
    up_in = out_t.reshape(B, C, seq)                                  # free reshape
    up = upsample_pallas(up_in, p['up_w9'], p['up_b4'], h, w)         # (B, seq, 4C)
    ysub = up.reshape(B, h, w, 2, 2, C)                               # [b,i,j,ph,pw,co]
    coarse_nchw = ysub.transpose(0, 5, 1, 3, 2, 4).reshape(B, C, H, W)
    # 2x2 patches of coarse_output == sub-pixel layout (no extra transpose needed)
    patches = ysub.transpose(0, 5, 1, 2, 3, 4).reshape(B, heads, head_dim, seq, 2, 2)
    # ---- TopkSelfAttention ----
    patches_m = patches.transpose(0, 1, 3, 2, 4, 5)                   # (B, heads, P, hd, 2, 2)
    gathered = jnp.take_along_axis(patches_m, top_k[:, :, :, None, None, None], axis=2)
    tokens2 = gathered.transpose(0, 1, 2, 4, 5, 3).reshape(B * heads, kf * 4, head_dim)
    out2_t, _ = attention_pallas(tokens2, p['t_wqkv'], p['t_bqkv'])   # (BH, hd, 4kf)
    out2 = out2_t.reshape(B, heads, head_dim, kf, 2, 2)
    out2_m = out2.transpose(0, 1, 3, 2, 4, 5)                         # (B, heads, kf, hd, 2, 2)
    bi = jnp.arange(B)[:, None, None]
    hi = jnp.arange(heads)[None, :, None]
    upd_m = patches_m.at[bi, hi, top_k].add(out2_m)
    region_nchw = upd_m.transpose(0, 1, 3, 2, 4, 5).reshape(B, C, H, W)
    # ---- residual add + DWConv ----
    xs = coarse_nchw + region_nchw
    y_nhwc = dwconv_pallas(xs.transpose(0, 2, 3, 1), p)
    y = y_nhwc.transpose(0, 3, 1, 2)
    return y, top_k, coarse_nchw


# ------------------------------------------------------------------- pure-JAX reference

def ref_conv_transpose(x, weight, bias):
    N, Cin, H, W = x.shape
    Cout = weight.shape[1]
    ofull = jnp.zeros((N, Cout, 2 * H + 2, 2 * W + 2), jnp.float32)
    for kh in range(4):
        for kw in range(4):
            contrib = jnp.einsum('nchw,co->nohw', x, weight[:, :, kh, kw])
            ofull = ofull.at[:, :, kh:kh + 2 * H:2, kw:kw + 2 * W:2].add(contrib)
    return ofull[:, :, 1:1 + 2 * H, 1:1 + 2 * W] + bias[None, :, None, None]


def _bn_eval(x, g, b, m, v, eps=1e-5):
    return ((x - m[None, :, None, None]) / jnp.sqrt(v + eps)[None, :, None, None]
            * g[None, :, None, None] + b[None, :, None, None])


def ref_forward(x, rp, head_dim, top_k):
    B, C, H, W = x.shape
    heads = C // head_dim
    xd = jax.lax.conv_general_dilated(
        x, rp['down_w'], window_strides=(2, 2), padding=((1, 1), (1, 1)),
        dimension_numbers=('NCHW', 'OIHW', 'NCHW')) + rp['down_b'][None, :, None, None]
    _, _, h, w = xd.shape
    seq = h * w
    t = xd.reshape(B, heads, head_dim, seq).transpose(0, 1, 3, 2)
    qkv = t @ rp['c_w'].T + rp['c_b']
    q, k, v = qkv[..., :head_dim], qkv[..., head_dim:2 * head_dim], qkv[..., 2 * head_dim:]
    attn = jax.nn.softmax(jnp.einsum('bhid,bhjd->bhij', k, q), axis=-1)
    out = jnp.einsum('bhij,bhjd->bhid', attn, v)
    out = out.transpose(0, 1, 3, 2).reshape(B, C, h, w)
    coarse = ref_conv_transpose(out, rp['up_w'], rp['up_b'])
    # top-k region attention (uses the provided top_k indices)
    xr = coarse.reshape(B, heads, head_dim, H, W)
    pat = (xr.reshape(B, heads, head_dim, H // 2, 2, W // 2, 2)
           .transpose(0, 1, 2, 3, 5, 4, 6).reshape(B, heads, head_dim, -1, 2, 2))
    kf = top_k.shape[-1]
    sel = jnp.take_along_axis(pat, top_k[:, :, None, :, None, None], axis=3)
    tk = sel.reshape(B, heads, head_dim, kf * 4).transpose(0, 1, 3, 2)
    qkv2 = tk @ rp['t_w'].T + rp['t_b']
    q2, k2, v2 = qkv2[..., :head_dim], qkv2[..., head_dim:2 * head_dim], qkv2[..., 2 * head_dim:]
    attn2 = jax.nn.softmax(jnp.einsum('bhid,bhjd->bhij', k2, q2), axis=-1)
    out2 = jnp.einsum('bhij,bhjd->bhid', attn2, v2)
    out2 = out2.transpose(0, 1, 3, 2).reshape(B, heads, head_dim, kf, 2, 2)
    pat_m = pat.transpose(0, 1, 3, 2, 4, 5)
    out2_m = out2.transpose(0, 1, 3, 2, 4, 5)
    bi = jnp.arange(B)[:, None, None]
    hi = jnp.arange(heads)[None, :, None]
    upd = pat_m.at[bi, hi, top_k].add(out2_m)
    region = upd.transpose(0, 1, 3, 2, 4, 5).reshape(B, C, H, W)
    xs = coarse + region
    y = jax.lax.conv_general_dilated(
        xs, rp['dw_w'], window_strides=(1, 1), padding=((1, 1), (1, 1)),
        dimension_numbers=('NCHW', 'OIHW', 'NCHW'), feature_group_count=C)
    y = jnp.clip(_bn_eval(y, rp['bn1_g'], rp['bn1_b'], rp['bn1_m'], rp['bn1_v']), 0.0, 6.0)
    y = jnp.einsum('nchw,oc->nohw', y, rp['pw_w'][:, :, 0, 0])
    y = jnp.clip(_bn_eval(y, rp['bn2_g'], rp['bn2_b'], rp['bn2_m'], rp['bn2_v']), 0.0, 6.0)
    return coarse, y


# ----------------------------------------------------------------------------- main

if __name__ == "__main__":
    B, dim, head_dim, H, W = 2, 16, 8, 16, 16
    heads = dim // head_dim
    ks = jax.random.split(jax.random.PRNGKey(0), 20)

    def uni(k, shape, fan_in):
        bnd = 1.0 / (fan_in ** 0.5)
        return jax.random.uniform(k, shape, jnp.float32, -bnd, bnd)

    x = jax.random.normal(ks[0], (B, dim, H, W), jnp.float32)
    raw = dict(
        down_w=uni(ks[1], (dim, dim, 4, 4), dim * 16), down_b=uni(ks[2], (dim,), dim * 16),
        c_w=uni(ks[3], (3 * head_dim, head_dim), head_dim), c_b=uni(ks[4], (3 * head_dim,), head_dim),
        up_w=uni(ks[5], (dim, dim, 4, 4), dim * 16), up_b=uni(ks[6], (dim,), dim * 16),
        t_w=uni(ks[7], (3 * head_dim, head_dim), head_dim), t_b=uni(ks[8], (3 * head_dim,), head_dim),
        dw_w=uni(ks[9], (dim, 1, 3, 3), 9), pw_w=uni(ks[10], (dim, dim, 1, 1), dim),
        bn1_g=jax.random.uniform(ks[11], (dim,), jnp.float32, 0.5, 1.5),
        bn1_b=0.1 * jax.random.normal(ks[12], (dim,), jnp.float32),
        bn1_m=0.1 * jax.random.normal(ks[13], (dim,), jnp.float32),
        bn1_v=jax.random.uniform(ks[14], (dim,), jnp.float32, 0.5, 1.5),
        bn2_g=jax.random.uniform(ks[15], (dim,), jnp.float32, 0.5, 1.5),
        bn2_b=0.1 * jax.random.normal(ks[16], (dim,), jnp.float32),
        bn2_m=0.1 * jax.random.normal(ks[17], (dim,), jnp.float32),
        bn2_v=jax.random.uniform(ks[18], (dim,), jnp.float32, 0.5, 1.5),
    )
    params = prepare_params(raw, head_dim)

    fwd = jax.jit(lambda xx, pp: region_selection_attention(xx, pp, head_dim))
    y, top_k, coarse = fwd(x, params)
    y = jax.block_until_ready(y)

    kf = (H // 2) * (W // 2) // 4
    assert y.shape == (B, dim, H, W)
    assert top_k.shape == (B, heads, kf)

    # Reference (f32) using the same top-k indices (avoids tie ambiguity in selection).
    coarse_ref, y_ref = ref_forward(x, raw, head_dim, top_k)
    assert jnp.allclose(coarse, coarse_ref, atol=5e-2, rtol=5e-2), \
        float(jnp.max(jnp.abs(coarse - coarse_ref)))
    assert jnp.allclose(y, y_ref, atol=5e-2, rtol=5e-2), \
        float(jnp.max(jnp.abs(y - y_ref)))

    print("KERNEL_OK")
</pallas_src>

<mosaic_0001>
module attributes {stable_mosaic.version = 11 : i64} {
  func.func @downsample_kernel(%arg0: i32, %arg1: memref<1x4x8x8x16xf32, #tpu.memory_space<vmem>>, %arg2: memref<256x16xbf16, #tpu.memory_space<vmem>>, %arg3: memref<1x16xf32, #tpu.memory_space<vmem>>, %arg4: memref<1x64x16xf32, #tpu.memory_space<vmem>>, %arg5: memref<4x10x10x16xf32, #tpu.memory_space<vmem>>) attributes {dimension_semantics = [#tpu.dimension_semantics<parallel>], iteration_bounds = array<i64: 2>, scalar_prefetch = 0 : i64, scratch_operands = 1 : i64, tpu.core_type = #tpu.core_type<tc>, window_params = [{transform_indices = @transform_0, window_bounds = array<i64: 1, 4, 8, 8, 16>}, {pipeline_mode = #tpu.pipeline_mode<synchronous>, transform_indices = @transform_1, window_bounds = array<i64: 256, 16>}, {pipeline_mode = #tpu.pipeline_mode<synchronous>, transform_indices = @transform_2, window_bounds = array<i64: 1, 16>}, {transform_indices = @transform_3, window_bounds = array<i64: 1, 64, 16>}]} {
    %cst = arith.constant 0.000000e+00 : f32
    %0 = vector.broadcast %cst : f32 to vector<4x10x10x16xf32>
    %c0 = arith.constant 0 : index
    %c0_0 = arith.constant 0 : index
    %c0_1 = arith.constant 0 : index
    %c0_2 = arith.constant 0 : index
    %1 = vector.load %arg5[%c0, %c0_0, %c0_1, %c0_2] : memref<4x10x10x16xf32, #tpu.memory_space<vmem>>, vector<4x10x10x16xf32>
    tpu.vector_store %arg5[%c0, %c0_0, %c0_1, %c0_2], %0 {strides = array<i32>} : memref<4x10x10x16xf32, #tpu.memory_space<vmem>>, vector<4x10x10x16xf32>,
    %c0_3 = arith.constant 0 : index
    %c0_4 = arith.constant 0 : index
    %c0_5 = arith.constant 0 : index
    %c0_6 = arith.constant 0 : index
    %c0_7 = arith.constant 0 : index
    %2 = vector.load %arg1[%c0_3, %c0_4, %c0_5, %c0_6, %c0_7] : memref<1x4x8x8x16xf32, #tpu.memory_space<vmem>>, vector<1x4x8x8x16xf32>
    %3 = vector.shape_cast %2 : vector<1x4x8x8x16xf32> to vector<4x8x8x16xf32>
    %c0_8 = arith.constant 0 : index
    %c1 = arith.constant 1 : index
    %c1_9 = arith.constant 1 : index
    %c0_10 = arith.constant 0 : index
    %4 = vector.load %arg5[%c0_8, %c1, %c1_9, %c0_10] : memref<4x10x10x16xf32, #tpu.memory_space<vmem>>, vector<4x8x8x16xf32>
    tpu.vector_store %arg5[%c0_8, %c1, %c1_9, %c0_10], %3 {strides = array<i32>} : memref<4x10x10x16xf32, #tpu.memory_space<vmem>>, vector<4x8x8x16xf32>,
    %c3 = arith.constant 3 : index
    %c0_11 = arith.constant 0 : index
    %c0_12 = arith.constant 0 : index
    %c0_13 = arith.constant 0 : index
    %5 = vector.load %arg5[%c3, %c0_11, %c0_12, %c0_13] : memref<4x10x10x16xf32, #tpu.memory_space<vmem>>, vector<1x8x8x16xf32>
    %6 = vector.shape_cast %5 : vector<1x8x8x16xf32> to vector<8x8x16xf32>
    %7 = vector.shape_cast %6 : vector<8x8x16xf32> to vector<64x16xf32>
    %c2 = arith.constant 2 : index
    %c0_14 = arith.constant 0 : index
    %c1_15 = arith.constant 1 : index
    %c0_16 = arith.constant 0 : index
    %8 = vector.load %arg5[%c2, %c0_14, %c1_15, %c0_16] : memref<4x10x10x16xf32, #tpu.memory_space<vmem>>, vector<1x8x8x16xf32>
    %9 = vector.shape_cast %8 : vector<1x8x8x16xf32> to vector<8x8x16xf32>
    %10 = vector.shape_cast %9 : vector<8x8x16xf32> to vector<64x16xf32>
    %c3_17 = arith.constant 3 : index
    %c0_18 = arith.constant 0 : index
    %c1_19 = arith.constant 1 : index
    %c0_20 = arith.constant 0 : index
    %11 = vector.load %arg5[%c3_17, %c0_18, %c1_19, %c0_20] : memref<4x10x10x16xf32, #tpu.memory_space<vmem>>, vector<1x8x8x16xf32>
    %12 = vector.shape_cast %11 : vector<1x8x8x16xf32> to vector<8x8x16xf32>
    %13 = vector.shape_cast %12 : vector<8x8x16xf32> to vector<64x16xf32>
    %c2_21 = arith.constant 2 : index
    %c0_22 = arith.constant 0 : index
    %c2_23 = arith.constant 2 : index
    %c0_24 = arith.constant 0 : index
    %14 = vector.load %arg5[%c2_21, %c0_22, %c2_23, %c0_24] : memref<4x10x10x16xf32, #tpu.memory_space<vmem>>, vector<1x8x8x16xf32>
    %15 = vector.shape_cast %14 : vector<1x8x8x16xf32> to vector<8x8x16xf32>
    %16 = vector.shape_cast %15 : vector<8x8x16xf32> to vector<64x16xf32>
    %c1_25 = arith.constant 1 : index
    %c1_26 = arith.constant 1 : index
    %c0_27 = arith.constant 0 : index
    %c0_28 = arith.constant 0 : index
    %17 = vector.load %arg5[%c1_25, %c1_26, %c0_27, %c0_28] : memref<4x10x10x16xf32, #tpu.memory_space<vmem>>, vector<1x8x8x16xf32>
    %18 = vector.shape_cast %17 : vector<1x8x8x16xf32> to vector<8x8x16xf32>
    %19 = vector.shape_cast %18 : vector<8x8x16xf32> to vector<64x16xf32>
    %c0_29 = arith.constant 0 : index
    %c1_30 = arith.constant 1 : index
    %c1_31 = arith.constant 1 : index
    %c0_32 = arith.constant 0 : index
    %20 = vector.load %arg5[%c0_29, %c1_30, %c1_31, %c0_32] : memref<4x10x10x16xf32, #tpu.memory_space<vmem>>, vector<1x8x8x16xf32>
    %21 = vector.shape_cast %20 : vector<1x8x8x16xf32> to vector<8x8x16xf32>
    %22 = vector.shape_cast %21 : vector<8x8x16xf32> to vector<64x16xf32>
    %c1_33 = arith.constant 1 : index
    %c1_34 = arith.constant 1 : index
    %c1_35 = arith.constant 1 : index
    %c0_36 = arith.constant 0 : index
    %23 = vector.load %arg5[%c1_33, %c1_34, %c1_35, %c0_36] : memref<4x10x10x16xf32, #tpu.memory_space<vmem>>, vector<1x8x8x16xf32>
    %24 = vector.shape_cast %23 : vector<1x8x8x16xf32> to vector<8x8x16xf32>
    %25 = vector.shape_cast %24 : vector<8x8x16xf32> to vector<64x16xf32>
    %c0_37 = arith.constant 0 : index
    %c1_38 = arith.constant 1 : index
    %c2_39 = arith.constant 2 : index
    %c0_40 = arith.constant 0 : index
    %26 = vector.load %arg5[%c0_37, %c1_38, %c2_39, %c0_40] : memref<4x10x10x16xf32, #tpu.memory_space<vmem>>, vector<1x8x8x16xf32>
    %27 = vector.shape_cast %26 : vector<1x8x8x16xf32> to vector<8x8x16xf32>
    %28 = vector.shape_cast %27 : vector<8x8x16xf32> to vector<64x16xf32>
    %c3_41 = arith.constant 3 : index
    %c1_42 = arith.constant 1 : index
    %c0_43 = arith.constant 0 : index
    %c0_44 = arith.constant 0 : index
    %29 = vector.load %arg5[%c3_41, %c1_42, %c0_43, %c0_44] : memref<4x10x10x16xf32, #tpu.memory_space<vmem>>, vector<1x8x8x16xf32>
    %30 = vector.shape_cast %29 : vector<1x8x8x16xf32> to vector<8x8x16xf32>
    %31 = vector.shape_cast %30 : vector<8x8x16xf32> to vector<64x16xf32>
    %c2_45 = arith.constant 2 : index
    %c1_46 = arith.constant 1 : index
    %c1_47 = arith.constant 1 : index
    %c0_48 = arith.constant 0 : index
    %32 = vector.load %arg5[%c2_45, %c1_46, %c1_47, %c0_48] : memref<4x10x10x16xf32, #tpu.memory_space<vmem>>, vector<1x8x8x16xf32>
    %33 = vector.shape_cast %32 : vector<1x8x8x16xf32> to vector<8x8x16xf32>
    %34 = vector.shape_cast %33 : vector<8x8x16xf32> to vector<64x16xf32>
    %c3_49 = arith.constant 3 : index
    %c1_50 = arith.constant 1 : index
    %c1_51 = arith.constant 1 : index
    %c0_52 = arith.constant 0 : index
    %35 = vector.load %arg5[%c3_49, %c1_50, %c1_51, %c0_52] : memref<4x10x10x16xf32, #tpu.memory_space<vmem>>, vector<1x8x8x16xf32>
    %36 = vector.shape_cast %35 : vector<1x8x8x16xf32> to vector<8x8x16xf32>
    %37 = vector.shape_cast %36 : vector<8x8x16xf32> to vector<64x16xf32>
    %c2_53 = arith.constant 2 : index
    %c1_54 = arith.constant 1 : index
    %c2_55 = arith.constant 2 : index
    %c0_56 = arith.constant 0 : index
    %38 = vector.load %arg5[%c2_53, %c1_54, %c2_55, %c0_56] : memref<4x10x10x16xf32, #tpu.memory_space<vmem>>, vector<1x8x8x16xf32>
    %39 = vector.shape_cast %38 : vector<1x8x8x16xf32> to vector<8x8x16xf32>
    %40 = vector.shape_cast %39 : vector<8x8x16xf32> to vector<64x16xf32>
    %c1_57 = arith.constant 1 : index
    %c2_58 = arith.constant 2 : index
    %c0_59 = arith.constant 0 : index
    %c0_60 = arith.constant 0 : index
    %41 = vector.load %arg5[%c1_57, %c2_58, %c0_59, %c0_60] : memref<4x10x10x16xf32, #tpu.memory_space<vmem>>, vector<1x8x8x16xf32>
    %42 = vector.shape_cast %41 : vector<1x8x8x16xf32> to vector<8x8x16xf32>
    %43 = vector.shape_cast %42 : vector<8x8x16xf32> to vector<64x16xf32>
    %c0_61 = arith.constant 0 : index
    %c2_62 = arith.constant 2 : index
    %c1_63 = arith.constant 1 : index
    %c0_64 = arith.constant 0 : index
    %44 = vector.load %arg5[%c0_61, %c2_62, %c1_63, %c0_64] : memref<4x10x10x16xf32, #tpu.memory_space<vmem>>, vector<1x8x8x16xf32>
    %45 = vector.shape_cast %44 : vector<1x8x8x16xf32> to vector<8x8x16xf32>
    %46 = vector.shape_cast %45 : vector<8x8x16xf32> to vector<64x16xf32>
    %c1_65 = arith.constant 1 : index
    %c2_66 = arith.constant 2 : index
    %c1_67 = arith.constant 1 : index
    %c0_68 = arith.constant 0 : index
    %47 = vector.load %arg5[%c1_65, %c2_66, %c1_67, %c0_68] : memref<4x10x10x16xf32, #tpu.memory_space<vmem>>, vector<1x8x8x16xf32>
    %48 = vector.shape_cast %47 : vector<1x8x8x16xf32> to vector<8x8x16xf32>
    %49 = vector.shape_cast %48 : vector<8x8x16xf32> to vector<64x16xf32>
    %c0_69 = arith.constant 0 : index
    %c2_70 = arith.constant 2 : index
    %c2_71 = arith.constant 2 : index
    %c0_72 = arith.constant 0 : index
    %50 = vector.load %arg5[%c0_69, %c2_70, %c2_71, %c0_72] : memref<4x10x10x16xf32, #tpu.memory_space<vmem>>, vector<1x8x8x16xf32>
    %51 = vector.shape_cast %50 : vector<1x8x8x16xf32> to vector<8x8x16xf32>
    %52 = vector.shape_cast %51 : vector<8x8x16xf32> to vector<64x16xf32>
    %53 = tpu.concatenate %7, %10, %13, %16, %19, %22, %25, %28, %31, %34, %37, %40, %43, %46, %49, %52 in 1 : vector<64x16xf32>, vector<64x16xf32>, vector<64x16xf32>, vector<64x16xf32>, vector<64x16xf32>, vector<64x16xf32>, vector<64x16xf32>, vector<64x16xf32>, vector<64x16xf32>, vector<64x16xf32>, vector<64x16xf32>, vector<64x16xf32>, vector<64x16xf32>, vector<64x16xf32>, vector<64x16xf32>, vector<64x16xf32> -> vector<64x256xf32>
    %54 = arith.truncf %53 : vector<64x256xf32> to vector<64x256xbf16>
    %c0_73 = arith.constant 0 : index
    %c0_74 = arith.constant 0 : index
    %55 = vector.load %arg2[%c0_73, %c0_74] : memref<256x16xbf16, #tpu.memory_space<vmem>>, vector<256x16xbf16>
    %cst_75 = arith.constant dense<0.000000e+00> : vector<64x16xf32>
    %56 = tpu.matmul %54, %55, %cst_75 {dimension_numbers = #tpu.dot_dimension_numbers<[1], [0], [0], [1], [0, 0, 1, 1], [], []>} : vector<64x256xbf16>, vector<256x16xbf16>, vector<64x16xf32> -> vector<64x16xf32>
    %c0_76 = arith.constant 0 : index
    %c0_77 = arith.constant 0 : index
    %57 = vector.load %arg3[%c0_76, %c0_77] : memref<1x16xf32, #tpu.memory_space<vmem>>, vector<1x16xf32>
    %58 = vector.broadcast %57 : vector<1x16xf32> to vector<64x16xf32>
    %59 = arith.addf %56, %58 : vector<64x16xf32>
    %c0_78 = arith.constant 0 : index
    %c0_79 = arith.constant 0 : index
    %c0_80 = arith.constant 0 : index
    %60 = vector.load %arg4[%c0_78, %c0_79, %c0_80] : memref<1x64x16xf32, #tpu.memory_space<vmem>>, vector<1x64x16xf32>
    %61 = vector.shape_cast %60 : vector<1x64x16xf32> to vector<64x16xf32>
    %62 = vector.shape_cast %59 : vector<64x16xf32> to vector<1x64x16xf32>
    tpu.vector_store %arg4[%c0_78, %c0_79, %c0_80], %62 {strides = array<i32>} : memref<1x64x16xf32, #tpu.memory_space<vmem>>, vector<1x64x16xf32>,
    return
  }
  func.func @transform_0(%arg0: i32) -> (i32, i32, i32, i32, i32) {
    %c0_i32 = arith.constant 0 : i32
    %c0_i32_0 = arith.constant 0 : i32
    %c0_i32_1 = arith.constant 0 : i32
    %c0_i32_2 = arith.constant 0 : i32
    %c0_i32_3 = arith.constant 0 : i32
    return %arg0, %c0_i32, %c0_i32_0, %c0_i32_1, %c0_i32_2 : i32, i32, i32, i32, i32
  }
  func.func @transform_1(%arg0: i32) -> (i32, i32) {
    %c0_i32 = arith.constant 0 : i32
    %c0_i32_0 = arith.constant 0 : i32
    %c0_i32_1 = arith.constant 0 : i32
    return %c0_i32, %c0_i32_0 : i32, i32
  }
  func.func @transform_2(%arg0: i32) -> (i32, i32) {
    %c0_i32 = arith.constant 0 : i32
    %c0_i32_0 = arith.constant 0 : i32
    %c0_i32_1 = arith.constant 0 : i32
    return %c0_i32, %c0_i32_0 : i32, i32
  }
  func.func @transform_3(%arg0: i32) -> (i32, i32, i32) {
    %c0_i32 = arith.constant 0 : i32
    %c0_i32_0 = arith.constant 0 : i32
    %c0_i32_1 = arith.constant 0 : i32
    return %arg0, %c0_i32, %c0_i32_0 : i32, i32, i32
  }
}

module attributes {stable_mosaic.version = 11 : i64} {
  func.func @attention_kernel(%arg0: i32, %arg1: memref<1x64x8xf32, #tpu.memory_space<vmem>>, %arg2: memref<8x24xf32, #tpu.memory_space<vmem>>, %arg3: memref<1x24xf32, #tpu.memory_space<vmem>>, %arg4: memref<1x8x64xf32, #tpu.memory_space<vmem>>, %arg5: memref<1x1x64xf32, #tpu.memory_space<vmem>>) attributes {dimension_semantics = [#tpu.dimension_semantics<parallel>], iteration_bounds = array<i64: 4>, scalar_prefetch = 0 : i64, scratch_operands = 0 : i64, tpu.core_type = #tpu.core_type<tc>, window_params = [{transform_indices = @transform_0, window_bounds = array<i64: 1, 64, 8>}, {pipeline_mode = #tpu.pipeline_mode<synchronous>, transform_indices = @transform_1, window_bounds = array<i64: 8, 24>}, {pipeline_mode = #tpu.pipeline_mode<synchronous>, transform_indices = @transform_2, window_bounds = array<i64: 1, 24>}, {transform_indices = @transform_3, window_bounds = array<i64: 1, 8, 64>}, {transform_indices = @transform_4, window_bounds = array<i64: 1, 1, 64>}]} {
    %c0 = arith.constant 0 : index
    %c0_0 = arith.constant 0 : index
    %c0_1 = arith.constant 0 : index
    %0 = vector.load %arg1[%c0, %c0_0, %c0_1] : memref<1x64x8xf32, #tpu.memory_space<vmem>>, vector<1x64x8xf32>
    %1 = vector.shape_cast %0 : vector<1x64x8xf32> to vector<64x8xf32>
    %c0_2 = arith.constant 0 : index
    %c0_3 = arith.constant 0 : index
    %2 = vector.load %arg2[%c0_2, %c0_3] : memref<8x24xf32, #tpu.memory_space<vmem>>, vector<8x24xf32>
    %cst = arith.constant dense<0.000000e+00> : vector<64x24xf32>
    %3 = tpu.matmul %1, %2, %cst {dimension_numbers = #tpu.dot_dimension_numbers<[1], [0], [0], [1], [0, 0, 1, 1], [], []>} : vector<64x8xf32>, vector<8x24xf32>, vector<64x24xf32> -> vector<64x24xf32>
    %c0_4 = arith.constant 0 : index
    %c0_5 = arith.constant 0 : index
    %4 = vector.load %arg3[%c0_4, %c0_5] : memref<1x24xf32, #tpu.memory_space<vmem>>, vector<1x24xf32>
    %5 = vector.broadcast %4 : vector<1x24xf32> to vector<64x24xf32>
    %6 = arith.addf %3, %5 : vector<64x24xf32>
    %7 = vector.extract_strided_slice %6 {offsets = [0, 0], sizes = [64, 8], strides = [1, 1]} : vector<64x24xf32> to vector<64x8xf32>
    %8 = vector.extract_strided_slice %6 {offsets = [0, 8], sizes = [64, 8], strides = [1, 1]} : vector<64x24xf32> to vector<64x8xf32>
    %9 = vector.extract_strided_slice %6 {offsets = [0, 16], sizes = [64, 8], strides = [1, 1]} : vector<64x24xf32> to vector<64x8xf32>
    %10 = tpu.transpose %7, [1, 0] : vector<64x8xf32> -> vector<8x64xf32>
    %cst_6 = arith.constant dense<0.000000e+00> : vector<64x64xf32>
    %11 = tpu.matmul %8, %10, %cst_6 {dimension_numbers = #tpu.dot_dimension_numbers<[1], [0], [0], [1], [0, 0, 1, 1], [], []>} : vector<64x8xf32>, vector<8x64xf32>, vector<64x64xf32> -> vector<64x64xf32>
    %cst_7 = arith.constant dense<0xFF800000> : vector<64xf32>
    %12 = vector.multi_reduction <maximumf>, %11, %cst_7 [1] : vector<64x64xf32> to vector<64xf32>
    %13 = vector.shape_cast %12 : vector<64xf32> to vector<64x1xf32>
    %14 = vector.broadcast %13 : vector<64x1xf32> to vector<64x64xf32>
    %15 = arith.subf %11, %14 : vector<64x64xf32>
    %16 = math.exp %15 : vector<64x64xf32>
    %cst_8 = arith.constant dense<0.000000e+00> : vector<64xf32>
    %17 = vector.multi_reduction <add>, %16, %cst_8 [1] : vector<64x64xf32> to vector<64xf32>
    %18 = vector.shape_cast %17 : vector<64xf32> to vector<64x1xf32>
    %19 = vector.broadcast %18 : vector<64x1xf32> to vector<64x64xf32>
    %20 = arith.divf %16, %19 : vector<64x64xf32>
    %cst_9 = arith.constant dense<0.000000e+00> : vector<64xf32>
    %21 = vector.multi_reduction <add>, %20, %cst_9 [0] : vector<64x64xf32> to vector<64xf32>
    %22 = vector.shape_cast %21 : vector<64xf32> to vector<1x64xf32>
    %c0_10 = arith.constant 0 : index
    %c0_11 = arith.constant 0 : index
    %c0_12 = arith.constant 0 : index
    %23 = vector.load %arg5[%c0_10, %c0_11, %c0_12] : memref<1x1x64xf32, #tpu.memory_space<vmem>>, vector<1x1x64xf32>
    %24 = vector.shape_cast %23 : vector<1x1x64xf32> to vector<1x64xf32>
    %25 = vector.shape_cast %22 : vector<1x64xf32> to vector<1x1x64xf32>
    tpu.vector_store %arg5[%c0_10, %c0_11, %c0_12], %25 {strides = array<i32>} : memref<1x1x64xf32, #tpu.memory_space<vmem>>, vector<1x1x64xf32>,
    %cst_13 = arith.constant dense<0.000000e+00> : vector<64x8xf32>
    %26 = tpu.matmul %20, %9, %cst_13 {dimension_numbers = #tpu.dot_dimension_numbers<[1], [0], [0], [1], [0, 0, 1, 1], [], []>} : vector<64x64xf32>, vector<64x8xf32>, vector<64x8xf32> -> vector<64x8xf32>
    %27 = tpu.transpose %26, [1, 0] : vector<64x8xf32> -> vector<8x64xf32>
    %c0_14 = arith.constant 0 : index
    %c0_15 = arith.constant 0 : index
    %c0_16 = arith.constant 0 : index
    %28 = vector.load %arg4[%c0_14, %c0_15, %c0_16] : memref<1x8x64xf32, #tpu.memory_space<vmem>>, vector<1x8x64xf32>
    %29 = vector.shape_cast %28 : vector<1x8x64xf32> to vector<8x64xf32>
    %30 = vector.shape_cast %27 : vector<8x64xf32> to vector<1x8x64xf32>
    tpu.vector_store %arg4[%c0_14, %c0_15, %c0_16], %30 {strides = array<i32>} : memref<1x8x64xf32, #tpu.memory_space<vmem>>, vector<1x8x64xf32>,
    return
  }
  func.func @transform_0(%arg0: i32) -> (i32, i32, i32) {
    %c0_i32 = arith.constant 0 : i32
    %c0_i32_0 = arith.constant 0 : i32
    %c0_i32_1 = arith.constant 0 : i32
    return %arg0, %c0_i32, %c0_i32_0 : i32, i32, i32
  }
  func.func @transform_1(%arg0: i32) -> (i32, i32) {
    %c0_i32 = arith.constant 0 : i32
    %c0_i32_0 = arith.constant 0 : i32
    %c0_i32_1 = arith.constant 0 : i32
    return %c0_i32, %c0_i32_0 : i32, i32
  }
  func.func @transform_2(%arg0: i32) -> (i32, i32) {
    %c0_i32 = arith.constant 0 : i32
    %c0_i32_0 = arith.constant 0 : i32
    %c0_i32_1 = arith.constant 0 : i32
    return %c0_i32, %c0_i32_0 : i32, i32
  }
  func.func @transform_3(%arg0: i32) -> (i32, i32, i32) {
    %c0_i32 = arith.constant 0 : i32
    %c0_i32_0 = arith.constant 0 : i32
    %c0_i32_1 = arith.constant 0 : i32
    return %arg0, %c0_i32, %c0_i32_0 : i32, i32, i32
  }
  func.func @transform_4(%arg0: i32) -> (i32, i32, i32) {
    %c0_i32 = arith.constant 0 : i32
    %c0_i32_0 = arith.constant 0 : i32
    %c0_i32_1 = arith.constant 0 : i32
    return %arg0, %c0_i32, %c0_i32_0 : i32, i32, i32
  }
}

module attributes {stable_mosaic.version = 11 : i64} {
  func.func @upsample_kernel(%arg0: i32, %arg1: memref<1x16x64xf32, #tpu.memory_space<vmem>>, %arg2: memref<144x64xbf16, #tpu.memory_space<vmem>>, %arg3: memref<1x64xf32, #tpu.memory_space<vmem>>, %arg4: memref<1x64x64xf32, #tpu.memory_space<vmem>>, %arg5: memref<10x10x16xf32, #tpu.memory_space<vmem>>) attributes {dimension_semantics = [#tpu.dimension_semantics<parallel>], iteration_bounds = array<i64: 2>, scalar_prefetch = 0 : i64, scratch_operands = 1 : i64, tpu.core_type = #tpu.core_type<tc>, window_params = [{transform_indices = @transform_0, window_bounds = array<i64: 1, 16, 64>}, {pipeline_mode = #tpu.pipeline_mode<synchronous>, transform_indices = @transform_1, window_bounds = array<i64: 144, 64>}, {pipeline_mode = #tpu.pipeline_mode<synchronous>, transform_indices = @transform_2, window_bounds = array<i64: 1, 64>}, {transform_indices = @transform_3, window_bounds = array<i64: 1, 64, 64>}]} {
    %c0 = arith.constant 0 : index
    %c0_0 = arith.constant 0 : index
    %c0_1 = arith.constant 0 : index
    %0 = vector.load %arg1[%c0, %c0_0, %c0_1] : memref<1x16x64xf32, #tpu.memory_space<vmem>>, vector<1x16x64xf32>
    %1 = vector.shape_cast %0 : vector<1x16x64xf32> to vector<16x64xf32>
    %2 = tpu.transpose %1, [1, 0] : vector<16x64xf32> -> vector<64x16xf32>
    %3 = vector.shape_cast %2 : vector<64x16xf32> to vector<8x8x16xf32>
    %cst = arith.constant 0.000000e+00 : f32
    %4 = vector.broadcast %cst : f32 to vector<10x10x16xf32>
    %c0_2 = arith.constant 0 : index
    %c0_3 = arith.constant 0 : index
    %c0_4 = arith.constant 0 : index
    %5 = vector.load %arg5[%c0_2, %c0_3, %c0_4] : memref<10x10x16xf32, #tpu.memory_space<vmem>>, vector<10x10x16xf32>
    tpu.vector_store %arg5[%c0_2, %c0_3, %c0_4], %4 {strides = array<i32>} : memref<10x10x16xf32, #tpu.memory_space<vmem>>, vector<10x10x16xf32>,
    %c1 = arith.constant 1 : index
    %c1_5 = arith.constant 1 : index
    %c0_6 = arith.constant 0 : index
    %6 = vector.load %arg5[%c1, %c1_5, %c0_6] : memref<10x10x16xf32, #tpu.memory_space<vmem>>, vector<8x8x16xf32>
    tpu.vector_store %arg5[%c1, %c1_5, %c0_6], %3 {strides = array<i32>} : memref<10x10x16xf32, #tpu.memory_space<vmem>>, vector<8x8x16xf32>,
    %c0_7 = arith.constant 0 : index
    %c0_8 = arith.constant 0 : index
    %c0_9 = arith.constant 0 : index
    %7 = vector.load %arg5[%c0_7, %c0_8, %c0_9] : memref<10x10x16xf32, #tpu.memory_space<vmem>>, vector<8x8x16xf32>
    %8 = vector.shape_cast %7 : vector<8x8x16xf32> to vector<64x16xf32>
    %c0_10 = arith.constant 0 : index
    %c1_11 = arith.constant 1 : index
    %c0_12 = arith.constant 0 : index
    %9 = vector.load %arg5[%c0_10, %c1_11, %c0_12] : memref<10x10x16xf32, #tpu.memory_space<vmem>>, vector<8x8x16xf32>
    %10 = vector.shape_cast %9 : vector<8x8x16xf32> to vector<64x16xf32>
    %c0_13 = arith.constant 0 : index
    %c2 = arith.constant 2 : index
    %c0_14 = arith.constant 0 : index
    %11 = vector.load %arg5[%c0_13, %c2, %c0_14] : memref<10x10x16xf32, #tpu.memory_space<vmem>>, vector<8x8x16xf32>
    %12 = vector.shape_cast %11 : vector<8x8x16xf32> to vector<64x16xf32>
    %c1_15 = arith.constant 1 : index
    %c0_16 = arith.constant 0 : index
    %c0_17 = arith.constant 0 : index
    %13 = vector.load %arg5[%c1_15, %c0_16, %c0_17] : memref<10x10x16xf32, #tpu.memory_space<vmem>>, vector<8x8x16xf32>
    %14 = vector.shape_cast %13 : vector<8x8x16xf32> to vector<64x16xf32>
    %c1_18 = arith.constant 1 : index
    %c1_19 = arith.constant 1 : index
    %c0_20 = arith.constant 0 : index
    %15 = vector.load %arg5[%c1_18, %c1_19, %c0_20] : memref<10x10x16xf32, #tpu.memory_space<vmem>>, vector<8x8x16xf32>
    %16 = vector.shape_cast %15 : vector<8x8x16xf32> to vector<64x16xf32>
    %c1_21 = arith.constant 1 : index
    %c2_22 = arith.constant 2 : index
    %c0_23 = arith.constant 0 : index
    %17 = vector.load %arg5[%c1_21, %c2_22, %c0_23] : memref<10x10x16xf32, #tpu.memory_space<vmem>>, vector<8x8x16xf32>
    %18 = vector.shape_cast %17 : vector<8x8x16xf32> to vector<64x16xf32>
    %c2_24 = arith.constant 2 : index
    %c0_25 = arith.constant 0 : index
    %c0_26 = arith.constant 0 : index
    %19 = vector.load %arg5[%c2_24, %c0_25, %c0_26] : memref<10x10x16xf32, #tpu.memory_space<vmem>>, vector<8x8x16xf32>
    %20 = vector.shape_cast %19 : vector<8x8x16xf32> to vector<64x16xf32>
    %c2_27 = arith.constant 2 : index
    %c1_28 = arith.constant 1 : index
    %c0_29 = arith.constant 0 : index
    %21 = vector.load %arg5[%c2_27, %c1_28, %c0_29] : memref<10x10x16xf32, #tpu.memory_space<vmem>>, vector<8x8x16xf32>
    %22 = vector.shape_cast %21 : vector<8x8x16xf32> to vector<64x16xf32>
    %c2_30 = arith.constant 2 : index
    %c2_31 = arith.constant 2 : index
    %c0_32 = arith.constant 0 : index
    %23 = vector.load %arg5[%c2_30, %c2_31, %c0_32] : memref<10x10x16xf32, #tpu.memory_space<vmem>>, vector<8x8x16xf32>
    %24 = vector.shape_cast %23 : vector<8x8x16xf32> to vector<64x16xf32>
    %25 = tpu.concatenate %8, %10, %12, %14, %16, %18, %20, %22, %24 in 1 : vector<64x16xf32>, vector<64x16xf32>, vector<64x16xf32>, vector<64x16xf32>, vector<64x16xf32>, vector<64x16xf32>, vector<64x16xf32>, vector<64x16xf32>, vector<64x16xf32> -> vector<64x144xf32>
    %26 = arith.truncf %25 : vector<64x144xf32> to vector<64x144xbf16>
    %c0_33 = arith.constant 0 : index
    %c0_34 = arith.constant 0 : index
    %27 = vector.load %arg2[%c0_33, %c0_34] : memref<144x64xbf16, #tpu.memory_space<vmem>>, vector<144x64xbf16>
    %cst_35 = arith.constant dense<0.000000e+00> : vector<64x64xf32>
    %28 = tpu.matmul %26, %27, %cst_35 {dimension_numbers = #tpu.dot_dimension_numbers<[1], [0], [0], [1], [0, 0, 1, 1], [], []>} : vector<64x144xbf16>, vector<144x64xbf16>, vector<64x64xf32> -> vector<64x64xf32>
    %c0_36 = arith.constant 0 : index
    %c0_37 = arith.constant 0 : index
    %29 = vector.load %arg3[%c0_36, %c0_37] : memref<1x64xf32, #tpu.memory_space<vmem>>, vector<1x64xf32>
    %30 = vector.broadcast %29 : vector<1x64xf32> to vector<64x64xf32>
    %31 = arith.addf %28, %30 : vector<64x64xf32>
    %c0_38 = arith.constant 0 : index
    %c0_39 = arith.constant 0 : index
    %c0_40 = arith.constant 0 : index
    %32 = vector.load %arg4[%c0_38, %c0_39, %c0_40] : memref<1x64x64xf32, #tpu.memory_space<vmem>>, vector<1x64x64xf32>
    %33 = vector.shape_cast %32 : vector<1x64x64xf32> to vector<64x64xf32>
    %34 = vector.shape_cast %31 : vector<64x64xf32> to vector<1x64x64xf32>
    tpu.vector_store %arg4[%c0_38, %c0_39, %c0_40], %34 {strides = array<i32>} : memref<1x64x64xf32, #tpu.memory_space<vmem>>, vector<1x64x64xf32>,
    return
  }
  func.func @transform_0(%arg0: i32) -> (i32, i32, i32) {
    %c0_i32 = arith.constant 0 : i32
    %c0_i32_0 = arith.constant 0 : i32
    %c0_i32_1 = arith.constant 0 : i32
    return %arg0, %c0_i32, %c0_i32_0 : i32, i32, i32
  }
  func.func @transform_1(%arg0: i32) -> (i32, i32) {
    %c0_i32 = arith.constant 0 : i32
    %c0_i32_0 = arith.constant 0 : i32
    %c0_i32_1 = arith.constant 0 : i32
    return %c0_i32, %c0_i32_0 : i32, i32
  }
  func.func @transform_2(%arg0: i32) -> (i32, i32) {
    %c0_i32 = arith.constant 0 : i32
    %c0_i32_0 = arith.constant 0 : i32
    %c0_i32_1 = arith.constant 0 : i32
    return %c0_i32, %c0_i32_0 : i32, i32
  }
  func.func @transform_3(%arg0: i32) -> (i32, i32, i32) {
    %c0_i32 = arith.constant 0 : i32
    %c0_i32_0 = arith.constant 0 : i32
    %c0_i32_1 = arith.constant 0 : i32
    return %arg0, %c0_i32, %c0_i32_0 : i32, i32, i32
  }
}

module attributes {stable_mosaic.version = 11 : i64} {
  func.func @attention_kernel(%arg0: i32, %arg1: memref<1x64x8xf32, #tpu.memory_space<vmem>>, %arg2: memref<8x24xf32, #tpu.memory_space<vmem>>, %arg3: memref<1x24xf32, #tpu.memory_space<vmem>>, %arg4: memref<1x8x64xf32, #tpu.memory_space<vmem>>, %arg5: memref<1x1x64xf32, #tpu.memory_space<vmem>>) attributes {dimension_semantics = [#tpu.dimension_semantics<parallel>], iteration_bounds = array<i64: 4>, scalar_prefetch = 0 : i64, scratch_operands = 0 : i64, tpu.core_type = #tpu.core_type<tc>, window_params = [{transform_indices = @transform_0, window_bounds = array<i64: 1, 64, 8>}, {pipeline_mode = #tpu.pipeline_mode<synchronous>, transform_indices = @transform_1, window_bounds = array<i64: 8, 24>}, {pipeline_mode = #tpu.pipeline_mode<synchronous>, transform_indices = @transform_2, window_bounds = array<i64: 1, 24>}, {transform_indices = @transform_3, window_bounds = array<i64: 1, 8, 64>}, {transform_indices = @transform_4, window_bounds = array<i64: 1, 1, 64>}]} {
    %c0 = arith.constant 0 : index
    %c0_0 = arith.constant 0 : index
    %c0_1 = arith.constant 0 : index
    %0 = vector.load %arg1[%c0, %c0_0, %c0_1] : memref<1x64x8xf32, #tpu.memory_space<vmem>>, vector<1x64x8xf32>
    %1 = vector.shape_cast %0 : vector<1x64x8xf32> to vector<64x8xf32>
    %c0_2 = arith.constant 0 : index
    %c0_3 = arith.constant 0 : index
    %2 = vector.load %arg2[%c0_2, %c0_3] : memref<8x24xf32, #tpu.memory_space<vmem>>, vector<8x24xf32>
    %cst = arith.constant dense<0.000000e+00> : vector<64x24xf32>
    %3 = tpu.matmul %1, %2, %cst {dimension_numbers = #tpu.dot_dimension_numbers<[1], [0], [0], [1], [0, 0, 1, 1], [], []>} : vector<64x8xf32>, vector<8x24xf32>, vector<64x24xf32> -> vector<64x24xf32>
    %c0_4 = arith.constant 0 : index
    %c0_5 = arith.constant 0 : index
    %4 = vector.load %arg3[%c0_4, %c0_5] : memref<1x24xf32, #tpu.memory_space<vmem>>, vector<1x24xf32>
    %5 = vector.broadcast %4 : vector<1x24xf32> to vector<64x24xf32>
    %6 = arith.addf %3, %5 : vector<64x24xf32>
    %7 = vector.extract_strided_slice %6 {offsets = [0, 0], sizes = [64, 8], strides = [1, 1]} : vector<64x24xf32> to vector<64x8xf32>
    %8 = vector.extract_strided_slice %6 {offsets = [0, 8], sizes = [64, 8], strides = [1, 1]} : vector<64x24xf32> to vector<64x8xf32>
    %9 = vector.extract_strided_slice %6 {offsets = [0, 16], sizes = [64, 8], strides = [1, 1]} : vector<64x24xf32> to vector<64x8xf32>
    %10 = tpu.transpose %7, [1, 0] : vector<64x8xf32> -> vector<8x64xf32>
    %cst_6 = arith.constant dense<0.000000e+00> : vector<64x64xf32>
    %11 = tpu.matmul %8, %10, %cst_6 {dimension_numbers = #tpu.dot_dimension_numbers<[1], [0], [0], [1], [0, 0, 1, 1], [], []>} : vector<64x8xf32>, vector<8x64xf32>, vector<64x64xf32> -> vector<64x64xf32>
    %cst_7 = arith.constant dense<0xFF800000> : vector<64xf32>
    %12 = vector.multi_reduction <maximumf>, %11, %cst_7 [1] : vector<64x64xf32> to vector<64xf32>
    %13 = vector.shape_cast %12 : vector<64xf32> to vector<64x1xf32>
    %14 = vector.broadcast %13 : vector<64x1xf32> to vector<64x64xf32>
    %15 = arith.subf %11, %14 : vector<64x64xf32>
    %16 = math.exp %15 : vector<64x64xf32>
    %cst_8 = arith.constant dense<0.000000e+00> : vector<64xf32>
    %17 = vector.multi_reduction <add>, %16, %cst_8 [1] : vector<64x64xf32> to vector<64xf32>
    %18 = vector.shape_cast %17 : vector<64xf32> to vector<64x1xf32>
    %19 = vector.broadcast %18 : vector<64x1xf32> to vector<64x64xf32>
    %20 = arith.divf %16, %19 : vector<64x64xf32>
    %cst_9 = arith.constant dense<0.000000e+00> : vector<64xf32>
    %21 = vector.multi_reduction <add>, %20, %cst_9 [0] : vector<64x64xf32> to vector<64xf32>
    %22 = vector.shape_cast %21 : vector<64xf32> to vector<1x64xf32>
    %c0_10 = arith.constant 0 : index
    %c0_11 = arith.constant 0 : index
    %c0_12 = arith.constant 0 : index
    %23 = vector.load %arg5[%c0_10, %c0_11, %c0_12] : memref<1x1x64xf32, #tpu.memory_space<vmem>>, vector<1x1x64xf32>
    %24 = vector.shape_cast %23 : vector<1x1x64xf32> to vector<1x64xf32>
    %25 = vector.shape_cast %22 : vector<1x64xf32> to vector<1x1x64xf32>
    tpu.vector_store %arg5[%c0_10, %c0_11, %c0_12], %25 {strides = array<i32>} : memref<1x1x64xf32, #tpu.memory_space<vmem>>, vector<1x1x64xf32>,
    %cst_13 = arith.constant dense<0.000000e+00> : vector<64x8xf32>
    %26 = tpu.matmul %20, %9, %cst_13 {dimension_numbers = #tpu.dot_dimension_numbers<[1], [0], [0], [1], [0, 0, 1, 1], [], []>} : vector<64x64xf32>, vector<64x8xf32>, vector<64x8xf32> -> vector<64x8xf32>
    %27 = tpu.transpose %26, [1, 0] : vector<64x8xf32> -> vector<8x64xf32>
    %c0_14 = arith.constant 0 : index
    %c0_15 = arith.constant 0 : index
    %c0_16 = arith.constant 0 : index
    %28 = vector.load %arg4[%c0_14, %c0_15, %c0_16] : memref<1x8x64xf32, #tpu.memory_space<vmem>>, vector<1x8x64xf32>
    %29 = vector.shape_cast %28 : vector<1x8x64xf32> to vector<8x64xf32>
    %30 = vector.shape_cast %27 : vector<8x64xf32> to vector<1x8x64xf32>
    tpu.vector_store %arg4[%c0_14, %c0_15, %c0_16], %30 {strides = array<i32>} : memref<1x8x64xf32, #tpu.memory_space<vmem>>, vector<1x8x64xf32>,
    return
  }
  func.func @transform_0(%arg0: i32) -> (i32, i32, i32) {
    %c0_i32 = arith.constant 0 : i32
    %c0_i32_0 = arith.constant 0 : i32
    %c0_i32_1 = arith.constant 0 : i32
    return %arg0, %c0_i32, %c0_i32_0 : i32, i32, i32
  }
  func.func @transform_1(%arg0: i32) -> (i32, i32) {
    %c0_i32 = arith.constant 0 : i32
    %c0_i32_0 = arith.constant 0 : i32
    %c0_i32_1 = arith.constant 0 : i32
    return %c0_i32, %c0_i32_0 : i32, i32
  }
  func.func @transform_2(%arg0: i32) -> (i32, i32) {
    %c0_i32 = arith.constant 0 : i32
    %c0_i32_0 = arith.constant 0 : i32
    %c0_i32_1 = arith.constant 0 : i32
    return %c0_i32, %c0_i32_0 : i32, i32
  }
  func.func @transform_3(%arg0: i32) -> (i32, i32, i32) {
    %c0_i32 = arith.constant 0 : i32
    %c0_i32_0 = arith.constant 0 : i32
    %c0_i32_1 = arith.constant 0 : i32
    return %arg0, %c0_i32, %c0_i32_0 : i32, i32, i32
  }
  func.func @transform_4(%arg0: i32) -> (i32, i32, i32) {
    %c0_i32 = arith.constant 0 : i32
    %c0_i32_0 = arith.constant 0 : i32
    %c0_i32_1 = arith.constant 0 : i32
    return %arg0, %c0_i32, %c0_i32_0 : i32, i32, i32
  }
}

module attributes {stable_mosaic.version = 11 : i64} {
  func.func @dwconv_kernel(%arg0: i32, %arg1: memref<1x16x16x16xf32, #tpu.memory_space<vmem>>, %arg2: memref<9x16xf32, #tpu.memory_space<vmem>>, %arg3: memref<1x16xf32, #tpu.memory_space<vmem>>, %arg4: memref<1x16xf32, #tpu.memory_space<vmem>>, %arg5: memref<16x16xbf16, #tpu.memory_space<vmem>>, %arg6: memref<1x16xf32, #tpu.memory_space<vmem>>, %arg7: memref<1x16xf32, #tpu.memory_space<vmem>>, %arg8: memref<1x16x16x16xf32, #tpu.memory_space<vmem>>, %arg9: memref<18x18x16xf32, #tpu.memory_space<vmem>>) attributes {dimension_semantics = [#tpu.dimension_semantics<parallel>], iteration_bounds = array<i64: 2>, scalar_prefetch = 0 : i64, scratch_operands = 1 : i64, tpu.core_type = #tpu.core_type<tc>, window_params = [{transform_indices = @transform_0, window_bounds = array<i64: 1, 16, 16, 16>}, {pipeline_mode = #tpu.pipeline_mode<synchronous>, transform_indices = @transform_1, window_bounds = array<i64: 9, 16>}, {pipeline_mode = #tpu.pipeline_mode<synchronous>, transform_indices = @transform_2, window_bounds = array<i64: 1, 16>}, {pipeline_mode = #tpu.pipeline_mode<synchronous>, transform_indices = @transform_3, window_bounds = array<i64: 1, 16>}, {pipeline_mode = #tpu.pipeline_mode<synchronous>, transform_indices = @transform_4, window_bounds = array<i64: 16, 16>}, {pipeline_mode = #tpu.pipeline_mode<synchronous>, transform_indices = @transform_5, window_bounds = array<i64: 1, 16>}, {pipeline_mode = #tpu.pipeline_mode<synchronous>, transform_indices = @transform_6, window_bounds = array<i64: 1, 16>}, {transform_indices = @transform_7, window_bounds = array<i64: 1, 16, 16, 16>}]} {
    %cst = arith.constant 0.000000e+00 : f32
    %0 = vector.broadcast %cst : f32 to vector<18x18x16xf32>
    %c0 = arith.constant 0 : index
    %c0_0 = arith.constant 0 : index
    %c0_1 = arith.constant 0 : index
    %1 = vector.load %arg9[%c0, %c0_0, %c0_1] : memref<18x18x16xf32, #tpu.memory_space<vmem>>, vector<18x18x16xf32>
    tpu.vector_store %arg9[%c0, %c0_0, %c0_1], %0 {strides = array<i32>} : memref<18x18x16xf32, #tpu.memory_space<vmem>>, vector<18x18x16xf32>,
    %c0_2 = arith.constant 0 : index
    %c0_3 = arith.constant 0 : index
    %c0_4 = arith.constant 0 : index
    %c0_5 = arith.constant 0 : index
    %2 = vector.load %arg1[%c0_2, %c0_3, %c0_4, %c0_5] : memref<1x16x16x16xf32, #tpu.memory_space<vmem>>, vector<1x16x16x16xf32>
    %3 = vector.shape_cast %2 : vector<1x16x16x16xf32> to vector<16x16x16xf32>
    %c1 = arith.constant 1 : index
    %c1_6 = arith.constant 1 : index
    %c0_7 = arith.constant 0 : index
    %4 = vector.load %arg9[%c1, %c1_6, %c0_7] : memref<18x18x16xf32, #tpu.memory_space<vmem>>, vector<16x16x16xf32>
    tpu.vector_store %arg9[%c1, %c1_6, %c0_7], %3 {strides = array<i32>} : memref<18x18x16xf32, #tpu.memory_space<vmem>>, vector<16x16x16xf32>,
    %cst_8 = arith.constant 0.000000e+00 : f32
    %5 = vector.broadcast %cst_8 : f32 to vector<16x16x16xf32>
    %c0_9 = arith.constant 0 : index
    %c0_10 = arith.constant 0 : index
    %c0_11 = arith.constant 0 : index
    %6 = vector.load %arg9[%c0_9, %c0_10, %c0_11] : memref<18x18x16xf32, #tpu.memory_space<vmem>>, vector<16x16x16xf32>
    %c0_12 = arith.constant 0 : index
    %c0_13 = arith.constant 0 : index
    %7 = vector.load %arg2[%c0_12, %c0_13] : memref<9x16xf32, #tpu.memory_space<vmem>>, vector<1x16xf32>
    %8 = vector.shape_cast %7 : vector<1x16xf32> to vector<16xf32>
    %9 = vector.shape_cast %8 : vector<16xf32> to vector<1x1x16xf32>
    %10 = vector.broadcast %9 : vector<1x1x16xf32> to vector<16x16x16xf32>
    %11 = arith.mulf %6, %10 : vector<16x16x16xf32>
    %12 = arith.addf %5, %11 : vector<16x16x16xf32>
    %c0_14 = arith.constant 0 : index
    %c1_15 = arith.constant 1 : index
    %c0_16 = arith.constant 0 : index
    %13 = vector.load %arg9[%c0_14, %c1_15, %c0_16] : memref<18x18x16xf32, #tpu.memory_space<vmem>>, vector<16x16x16xf32>
    %c1_17 = arith.constant 1 : index
    %c0_18 = arith.constant 0 : index
    %14 = vector.load %arg2[%c1_17, %c0_18] : memref<9x16xf32, #tpu.memory_space<vmem>>, vector<1x16xf32>
    %15 = vector.shape_cast %14 : vector<1x16xf32> to vector<16xf32>
    %16 = vector.shape_cast %15 : vector<16xf32> to vector<1x1x16xf32>
    %17 = vector.broadcast %16 : vector<1x1x16xf32> to vector<16x16x16xf32>
    %18 = arith.mulf %13, %17 : vector<16x16x16xf32>
    %19 = arith.addf %12, %18 : vector<16x16x16xf32>
    %c0_19 = arith.constant 0 : index
    %c2 = arith.constant 2 : index
    %c0_20 = arith.constant 0 : index
    %20 = vector.load %arg9[%c0_19, %c2, %c0_20] : memref<18x18x16xf32, #tpu.memory_space<vmem>>, vector<16x16x16xf32>
    %c2_21 = arith.constant 2 : index
    %c0_22 = arith.constant 0 : index
    %21 = vector.load %arg2[%c2_21, %c0_22] : memref<9x16xf32, #tpu.memory_space<vmem>>, vector<1x16xf32>
    %22 = vector.shape_cast %21 : vector<1x16xf32> to vector<16xf32>
    %23 = vector.shape_cast %22 : vector<16xf32> to vector<1x1x16xf32>
    %24 = vector.broadcast %23 : vector<1x1x16xf32> to vector<16x16x16xf32>
    %25 = arith.mulf %20, %24 : vector<16x16x16xf32>
    %26 = arith.addf %19, %25 : vector<16x16x16xf32>
    %c1_23 = arith.constant 1 : index
    %c0_24 = arith.constant 0 : index
    %c0_25 = arith.constant 0 : index
    %27 = vector.load %arg9[%c1_23, %c0_24, %c0_25] : memref<18x18x16xf32, #tpu.memory_space<vmem>>, vector<16x16x16xf32>
    %c3 = arith.constant 3 : index
    %c0_26 = arith.constant 0 : index
    %28 = vector.load %arg2[%c3, %c0_26] : memref<9x16xf32, #tpu.memory_space<vmem>>, vector<1x16xf32>
    %29 = vector.shape_cast %28 : vector<1x16xf32> to vector<16xf32>
    %30 = vector.shape_cast %29 : vector<16xf32> to vector<1x1x16xf32>
    %31 = vector.broadcast %30 : vector<1x1x16xf32> to vector<16x16x16xf32>
    %32 = arith.mulf %27, %31 : vector<16x16x16xf32>
    %33 = arith.addf %26, %32 : vector<16x16x16xf32>
    %c1_27 = arith.constant 1 : index
    %c1_28 = arith.constant 1 : index
    %c0_29 = arith.constant 0 : index
    %34 = vector.load %arg9[%c1_27, %c1_28, %c0_29] : memref<18x18x16xf32, #tpu.memory_space<vmem>>, vector<16x16x16xf32>
    %c4 = arith.constant 4 : index
    %c0_30 = arith.constant 0 : index
    %35 = vector.load %arg2[%c4, %c0_30] : memref<9x16xf32, #tpu.memory_space<vmem>>, vector<1x16xf32>
    %36 = vector.shape_cast %35 : vector<1x16xf32> to vector<16xf32>
    %37 = vector.shape_cast %36 : vector<16xf32> to vector<1x1x16xf32>
    %38 = vector.broadcast %37 : vector<1x1x16xf32> to vector<16x16x16xf32>
    %39 = arith.mulf %34, %38 : vector<16x16x16xf32>
    %40 = arith.addf %33, %39 : vector<16x16x16xf32>
    %c1_31 = arith.constant 1 : index
    %c2_32 = arith.constant 2 : index
    %c0_33 = arith.constant 0 : index
    %41 = vector.load %arg9[%c1_31, %c2_32, %c0_33] : memref<18x18x16xf32, #tpu.memory_space<vmem>>, vector<16x16x16xf32>
    %c5 = arith.constant 5 : index
    %c0_34 = arith.constant 0 : index
    %42 = vector.load %arg2[%c5, %c0_34] : memref<9x16xf32, #tpu.memory_space<vmem>>, vector<1x16xf32>
    %43 = vector.shape_cast %42 : vector<1x16xf32> to vector<16xf32>
    %44 = vector.shape_cast %43 : vector<16xf32> to vector<1x1x16xf32>
    %45 = vector.broadcast %44 : vector<1x1x16xf32> to vector<16x16x16xf32>
    %46 = arith.mulf %41, %45 : vector<16x16x16xf32>
    %47 = arith.addf %40, %46 : vector<16x16x16xf32>
    %c2_35 = arith.constant 2 : index
    %c0_36 = arith.constant 0 : index
    %c0_37 = arith.constant 0 : index
    %48 = vector.load %arg9[%c2_35, %c0_36, %c0_37] : memref<18x18x16xf32, #tpu.memory_space<vmem>>, vector<16x16x16xf32>
    %c6 = arith.constant 6 : index
    %c0_38 = arith.constant 0 : index
    %49 = vector.load %arg2[%c6, %c0_38] : memref<9x16xf32, #tpu.memory_space<vmem>>, vector<1x16xf32>
    %50 = vector.shape_cast %49 : vector<1x16xf32> to vector<16xf32>
    %51 = vector.shape_cast %50 : vector<16xf32> to vector<1x1x16xf32>
    %52 = vector.broadcast %51 : vector<1x1x16xf32> to vector<16x16x16xf32>
    %53 = arith.mulf %48, %52 : vector<16x16x16xf32>
    %54 = arith.addf %47, %53 : vector<16x16x16xf32>
    %c2_39 = arith.constant 2 : index
    %c1_40 = arith.constant 1 : index
    %c0_41 = arith.constant 0 : index
    %55 = vector.load %arg9[%c2_39, %c1_40, %c0_41] : memref<18x18x16xf32, #tpu.memory_space<vmem>>, vector<16x16x16xf32>
    %c7 = arith.constant 7 : index
    %c0_42 = arith.constant 0 : index
    %56 = vector.load %arg2[%c7, %c0_42] : memref<9x16xf32, #tpu.memory_space<vmem>>, vector<1x16xf32>
    %57 = vector.shape_cast %56 : vector<1x16xf32> to vector<16xf32>
    %58 = vector.shape_cast %57 : vector<16xf32> to vector<1x1x16xf32>
    %59 = vector.broadcast %58 : vector<1x1x16xf32> to vector<16x16x16xf32>
    %60 = arith.mulf %55, %59 : vector<16x16x16xf32>
    %61 = arith.addf %54, %60 : vector<16x16x16xf32>
    %c2_43 = arith.constant 2 : index
    %c2_44 = arith.constant 2 : index
    %c0_45 = arith.constant 0 : index
    %62 = vector.load %arg9[%c2_43, %c2_44, %c0_45] : memref<18x18x16xf32, #tpu.memory_space<vmem>>, vector<16x16x16xf32>
    %c8 = arith.constant 8 : index
    %c0_46 = arith.constant 0 : index
    %63 = vector.load %arg2[%c8, %c0_46] : memref<9x16xf32, #tpu.memory_space<vmem>>, vector<1x16xf32>
    %64 = vector.shape_cast %63 : vector<1x16xf32> to vector<16xf32>
    %65 = vector.shape_cast %64 : vector<16xf32> to vector<1x1x16xf32>
    %66 = vector.broadcast %65 : vector<1x1x16xf32> to vector<16x16x16xf32>
    %67 = arith.mulf %62, %66 : vector<16x16x16xf32>
    %68 = arith.addf %61, %67 : vector<16x16x16xf32>
    %c0_47 = arith.constant 0 : index
    %c0_48 = arith.constant 0 : index
    %69 = vector.load %arg3[%c0_47, %c0_48] : memref<1x16xf32, #tpu.memory_space<vmem>>, vector<1x16xf32>
    %70 = vector.shape_cast %69 : vector<1x16xf32> to vector<1x1x16xf32>
    %71 = vector.broadcast %70 : vector<1x1x16xf32> to vector<16x16x16xf32>
    %72 = arith.mulf %68, %71 : vector<16x16x16xf32>
    %c0_49 = arith.constant 0 : index
    %c0_50 = arith.constant 0 : index
    %73 = vector.load %arg4[%c0_49, %c0_50] : memref<1x16xf32, #tpu.memory_space<vmem>>, vector<1x16xf32>
    %74 = vector.shape_cast %73 : vector<1x16xf32> to vector<1x1x16xf32>
    %75 = vector.broadcast %74 : vector<1x1x16xf32> to vector<16x16x16xf32>
    %76 = arith.addf %72, %75 : vector<16x16x16xf32>
    %cst_51 = arith.constant 0.000000e+00 : f32
    %cst_52 = arith.constant 6.000000e+00 : f32
    %77 = vector.broadcast %cst_51 : f32 to vector<16x16x16xf32>
    %78 = arith.maximumf %77, %76 : vector<16x16x16xf32>
    %79 = vector.broadcast %cst_52 : f32 to vector<16x16x16xf32>
    %80 = arith.minimumf %79, %78 : vector<16x16x16xf32>
    %81 = vector.shape_cast %80 : vector<16x16x16xf32> to vector<256x16xf32>
    %82 = arith.truncf %81 : vector<256x16xf32> to vector<256x16xbf16>
    %c0_53 = arith.constant 0 : index
    %c0_54 = arith.constant 0 : index
    %83 = vector.load %arg5[%c0_53, %c0_54] : memref<16x16xbf16, #tpu.memory_space<vmem>>, vector<16x16xbf16>
    %cst_55 = arith.constant dense<0.000000e+00> : vector<256x16xf32>
    %84 = tpu.matmul %82, %83, %cst_55 {dimension_numbers = #tpu.dot_dimension_numbers<[1], [0], [0], [1], [0, 0, 1, 1], [], []>} : vector<256x16xbf16>, vector<16x16xbf16>, vector<256x16xf32> -> vector<256x16xf32>
    %c0_56 = arith.constant 0 : index
    %c0_57 = arith.constant 0 : index
    %85 = vector.load %arg6[%c0_56, %c0_57] : memref<1x16xf32, #tpu.memory_space<vmem>>, vector<1x16xf32>
    %86 = vector.broadcast %85 : vector<1x16xf32> to vector<256x16xf32>
    %87 = arith.mulf %84, %86 : vector<256x16xf32>
    %c0_58 = arith.constant 0 : index
    %c0_59 = arith.constant 0 : index
    %88 = vector.load %arg7[%c0_58, %c0_59] : memref<1x16xf32, #tpu.memory_space<vmem>>, vector<1x16xf32>
    %89 = vector.broadcast %88 : vector<1x16xf32> to vector<256x16xf32>
    %90 = arith.addf %87, %89 : vector<256x16xf32>
    %cst_60 = arith.constant 0.000000e+00 : f32
    %cst_61 = arith.constant 6.000000e+00 : f32
    %91 = vector.broadcast %cst_60 : f32 to vector<256x16xf32>
    %92 = arith.maximumf %91, %90 : vector<256x16xf32>
    %93 = vector.broadcast %cst_61 : f32 to vector<256x16xf32>
    %94 = arith.minimumf %93, %92 : vector<256x16xf32>
    %95 = vector.shape_cast %94 : vector<256x16xf32> to vector<16x16x16xf32>
    %c0_62 = arith.constant 0 : index
    %c0_63 = arith.constant 0 : index
    %c0_64 = arith.constant 0 : index
    %c0_65 = arith.constant 0 : index
    %96 = vector.load %arg8[%c0_62, %c0_63, %c0_64, %c0_65] : memref<1x16x16x16xf32, #tpu.memory_space<vmem>>, vector<1x16x16x16xf32>
    %97 = vector.shape_cast %96 : vector<1x16x16x16xf32> to vector<16x16x16xf32>
    %98 = vector.shape_cast %95 : vector<16x16x16xf32> to vector<1x16x16x16xf32>
    tpu.vector_store %arg8[%c0_62, %c0_63, %c0_64, %c0_65], %98 {strides = array<i32>} : memref<1x16x16x16xf32, #tpu.memory_space<vmem>>, vector<1x16x16x16xf32>,
    return
  }
  func.func @transform_0(%arg0: i32) -> (i32, i32, i32, i32) {
    %c0_i32 = arith.constant 0 : i32
    %c0_i32_0 = arith.constant 0 : i32
    %c0_i32_1 = arith.constant 0 : i32
    %c0_i32_2 = arith.constant 0 : i32
    return %arg0, %c0_i32, %c0_i32_0, %c0_i32_1 : i32, i32, i32, i32
  }
  func.func @transform_1(%arg0: i32) -> (i32, i32) {
    %c0_i32 = arith.constant 0 : i32
    %c0_i32_0 = arith.constant 0 : i32
    %c0_i32_1 = arith.constant 0 : i32
    return %c0_i32, %c0_i32_0 : i32, i32
  }
  func.func @transform_2(%arg0: i32) -> (i32, i32) {
    %c0_i32 = arith.constant 0 : i32
    %c0_i32_0 = arith.constant 0 : i32
    %c0_i32_1 = arith.constant 0 : i32
    return %c0_i32, %c0_i32_0 : i32, i32
  }
  func.func @transform_3(%arg0: i32) -> (i32, i32) {
    %c0_i32 = arith.constant 0 : i32
    %c0_i32_0 = arith.constant 0 : i32
    %c0_i32_1 = arith.constant 0 : i32
    return %c0_i32, %c0_i32_0 : i32, i32
  }
  func.func @transform_4(%arg0: i32) -> (i32, i32) {
    %c0_i32 = arith.constant 0 : i32
    %c0_i32_0 = arith.constant 0 : i32
    %c0_i32_1 = arith.constant 0 : i32
    return %c0_i32, %c0_i32_0 : i32, i32
  }
  func.func @transform_5(%arg0: i32) -> (i32, i32) {
    %c0_i32 = arith.constant 0 : i32
    %c0_i32_0 = arith.constant 0 : i32
    %c0_i32_1 = arith.constant 0 : i32
    return %c0_i32, %c0_i32_0 : i32, i32
  }
  func.func @transform_6(%arg0: i32) -> (i32, i32) {
    %c0_i32 = arith.constant 0 : i32
    %c0_i32_0 = arith.constant 0 : i32
    %c0_i32_1 = arith.constant 0 : i32
    return %c0_i32, %c0_i32_0 : i32, i32
  }
  func.func @transform_7(%arg0: i32) -> (i32, i32, i32, i32) {
    %c0_i32 = arith.constant 0 : i32
    %c0_i32_0 = arith.constant 0 : i32
    %c0_i32_1 = arith.constant 0 : i32
    %c0_i32_2 = arith.constant 0 : i32
    return %arg0, %c0_i32, %c0_i32_0, %c0_i32_1 : i32, i32, i32, i32
  }
}

</mosaic_0001>

<bundles_post_ra>
// kernel: _lambda_.6
= control target key start
LH: loop header
LB: loop body
LE: loop exit
PB: predicated region body
PF: predicated region fallthrough
CT: control target
= control target key end

     0   :  { %s1181_s15 = smov 0   ;;  %s1351_s0 = inlined_call_operand.vmem [shape: f32[4,64,8], index: 0, kind: input, shape index: {}]   ;;  %s1352_s1 = inlined_call_operand.vmem [shape: f32[8,24], index: 1, kind: input, shape index: {}]   ;;  %s1353_s2 = inlined_call_operand.vmem [shape: f32[1,24], index: 2, kind: input, shape index: {}]   ;;  %s1354_s3 = inlined_call_operand.vmem [shape: f32[4,8,64], index: 3, kind: output, shape index: {0}]   ;;  %s1355_s4 = inlined_call_operand.vmem [shape: f32[4,1,64], index: 4, kind: output, shape index: {1}]  }
   0x1 LB: > { %s888_s16 = sadd.s32 4294967295, %s1152_s15   ;;  %p892_p0 = scmp.ge.s32.totalorder %s1152_s15, 1  ;;  %s1152_s15 = sphi %s1181_s15, %s15_s15  }
   0x2   : > { %p165_p1 = scmp.lt.s32.totalorder %s1152_s15, 5 }
   0x4   : > { %p166_p2 = pnand %p892_p0, %p165_p1 }
   0x5   : > { %v213_v0 = vld [vmem:[%s1352_s1] sm:$0xff] (!%p166_p2)  ;;  %p193_p3 = scmp.lt.s32.totalorder (!%p166_p2), %s888_s16, 3  ;;  %vm221_vm0 = vcmask (!%p166_p2), 64512   ;;  %s1154_s25 = smov (!%p166_p2), 120   ;;  %vm512_vm2 = vcmask (!%p166_p2), 523264   ;;  %vm622_vm3 = vcmask (!%p166_p2), 516096  }
   0x6   : > { %169 = sbr.rel (%p166_p2) target bundleno = 1249 (0x4e1), region = 32  ;;  %973 = vmatprep.subr.mxu0 (!%p166_p2), %v213_v0  ;;  %v896_v9 = vld [vmem:[%s1353_s2] ss:$0 sm:$0xff] (!%p166_p2)  ;;  %vm1215_vm1 = vmpackc.low (!%p166_p2), %vm221_vm0, %vm221_vm0  ;;  %s1155_s26 = smov (!%p166_p2), 112  }
   0x7   : > { %974 = vmatpush3.msra.mxu0 (!%p166_p2), %v213_v0 }
   0xd   : > { %s1359_s16 = smov (!%p193_p3, %s888_s16), 3 }
   0xe   : > { %s931_s19 = sshll.u32 %s1359_s16, 6  ;;  %s204_s29 = scalar_lea.vmem %s1355_s4, %s1359_s16 }
   0xf   : > { %s197_s22 = scalar_lea.vmem %s1351_s0, %s931_s19  ;;  %s895_s30 = sshll.u32 %s1359_s16, 3 }
  0x10   : > { %v205_v1 = vld [vmem:[%s197_s22] sm:$0xff]  ;;  %v206_v2 = vld [vmem:[%s197_s22 + $0x8] sm:$0xff]  ;;  %v207_v3 = vld [vmem:[%s197_s22 + $0x10] sm:$0xff]  ;;  %s201_s7 = scalar_lea.vmem %s1354_s3, %s895_s30 }
  0x11   : > { %975 = vmatprep.mubr.msk.f32.mxu0 %vm221_vm0, %v205_v1  ;;  %v208_v4 = vld [vmem:[%s197_s22 + $0x18] sm:$0xff]  ;;  %v209_v5 = vld [vmem:[%s197_s22 + $0x20] sm:$0xff]  ;;  %v210_v6 = vld [vmem:[%s197_s22 + $0x28] sm:$0xff] }
  0x12   : > { %976 = vmatmul.mubr.msk.f32.vlgmr.msra.gmra.mrb[0].mxu0 %vm221_vm0, %v206_v2  ;;  %v211_v7 = vld [vmem:[%s197_s22 + $0x30] sm:$0xff]  ;;  %v212_v8 = vld [vmem:[%s197_s22 + $0x38] sm:$0xff] }
  0x13   : > { %978 = vmatprep.mubr.msk.f32.mxu0 %vm221_vm0, %v207_v3 }
  0x16   : > { %979 = vmatmul.mubr.msk.f32.gmra.mrb[2].mxu0 %vm221_vm0, %v208_v4 }
  0x17   : > { %981 = vmatprep.mubr.msk.f32.mxu0 %vm221_vm0, %v209_v5 }
  0x1a   : > { %982 = vmatmul.mubr.msk.f32.gmra.mrb[4].mxu0 %vm221_vm0, %v210_v6 }
  0x1b   : > { %984 = vmatprep.mubr.msk.f32.mxu0 %vm221_vm0, %v211_v7 }
  0x1e   : > { %985 = vmatmul.mubr.msk.f32.gmra.mrb[6].mxu0 %vm221_vm0, %v212_v8 }
  0xe5   : > { %v977_v10 = vpop.f32.mrb[0].mxu0 }
  0xe6   : > { %v1209_v11 = vadd.f32 %v977_v10, %v896_v9  ;;  %v312_v12 = vpop.f32.mrb[1].mxu0 }
  0xe7   : > { %v1211_v13 = vadd.f32 %v896_v9, %v312_v12 }
  0xe9   : > { %v980_v15 = vpop.f32.mrb[2].mxu0  ;;  %359 = vrot.lane.b32.xlu0 %v1211_v13, %s1154_s25  ;;  %v1043_v16 = vpack.c.bf16 %v1209_v11, %v1211_v13  ;;  %v1094_v17 = vpack.i.bf16 %v1209_v11, %v1211_v13 }
  0xea   : > { %v1225_v18 = vadd.f32 %v980_v15, %v896_v9  ;;  %v322_v19 = vpop.f32.mrb[3].mxu0 }
  0xeb   : > { %v1227_v20 = vadd.f32 %v896_v9, %v322_v19  ;;  %1045 = vmatprep.subr.msk.bf16.mxu1 %vm1215_vm1, %v1043_v16 }
  0xec   : > { %1048 = vmatpush3.bf16.xpose.msk.msra.mxu1 %vm1215_vm1, %v1043_v16 }
  0xed   : > { %v1049_v21 = vpack.c.bf16 %v1225_v18, %v1227_v20  ;;  %363 = vrot.lane.b32.xlu1 %v1227_v20, %s1154_s25  ;;  %361 = vrot.lane.b32.xlu0 %v1209_v11, %s1154_s25  ;;  %v983_v22 = vpop.f32.mrb[4].mxu0  ;;  %v1099_v23 = vpack.i.bf16 %v1225_v18, %v1227_v20 }
  0xee   : > { %v332_v24 = vpop.f32.mrb[5].mxu0  ;;  %v1243_v25 = vadd.f32 %v983_v22, %v896_v9 }
  0xef   : > { %1051 = vmatprep.subr.msk.bf16.mxu1 %vm1215_vm1, %v1049_v21  ;;  %v1245_v26 = vadd.f32 %v896_v9, %v332_v24 }
  0xf1   : > { %v1055_v27 = vpack.c.bf16 %v1243_v25, %v1245_v26  ;;  %365 = vrot.lane.b32.xlu1 %v1225_v18, %s1154_s25  ;;  %v986_v28 = vpop.f32.mrb[6].mxu0  ;;  %367 = vrot.lane.b32.xlu0 %v1245_v26, %s1154_s25  ;;  %v1104_v29 = vpack.i.bf16 %v1243_v25, %v1245_v26 }
  0xf2   : > { %v342_v30 = vpop.f32.mrb[7].mxu0  ;;  %v1255_v31 = vadd.f32 %v986_v28, %v896_v9 }
  0xf3   : > { %v1257_v32 = vadd.f32 %v896_v9, %v342_v30 }
  0xf4   : > { %1054 = vmatpush3.bf16.xpose.msk.msra.mxu1 %vm1215_vm1, %v1049_v21 }
  0xf5   : > { %v1061_v33 = vpack.c.bf16 %v1255_v31, %v1257_v32  ;;  %369 = vrot.lane.b32.xlu1 %v1243_v25, %s1154_s25  ;;  %371 = vrot.lane.b32.xlu0 %v1257_v32, %s1154_s25  ;;  %v1109_v34 = vpack.i.bf16 %v1255_v31, %v1257_v32 }
  0xf6   : > { %1057 = vmatprep.subr.msk.bf16.mxu1 %vm1215_vm1, %v1055_v27 }
  0xf9   : > { %373 = vrot.lane.b32.xlu1 %v1255_v31, %s1154_s25 }
  0xfc   : > { %1060 = vmatpush3.bf16.xpose.msk.msra.mxu1 %vm1215_vm1, %v1055_v27 }
  0xfd   : > { %1063 = vmatprep.subr.msk.bf16.mxu1 %vm1215_vm1, %v1061_v33 }
 0x104   : > { %1066 = vmatpush3.bf16.xpose.msk.msra.mxu1 %vm1215_vm1, %v1061_v33 }
 0x15b   : > { %v360_v35 = vpop.permute.xlu0 %359 }
 0x15c   : > { %1003 = vmatprep.mubr.msk.f32.mxu1 %vm221_vm0, %v360_v35 }
 0x15f   : > { %v364_v36 = vpop.permute.xlu1 %363  ;;  %v362_v37 = vpop.permute.xlu0 %361 }
 0x160   : > { %1004 = vmatmul.mubr.msk.f32.vlgmr.msra.gmra.mrb[0].mxu1 %vm221_vm0, %v362_v37 }
 0x161   : > { %1006 = vmatprep.mubr.msk.f32.mxu1 %vm221_vm0, %v364_v36 }
 0x163   : > { %v366_v38 = vpop.permute.xlu1 %365  ;;  %v368_v39 = vpop.permute.xlu0 %367 }
 0x164   : > { %1007 = vmatmul.mubr.msk.f32.gmra.mrb[2].mxu1 %vm221_vm0, %v366_v38 }
 0x165   : > { %1009 = vmatprep.mubr.msk.f32.mxu1 %vm221_vm0, %v368_v39 }
 0x167   : > { %v370_v40 = vpop.permute.xlu1 %369  ;;  %v372_v41 = vpop.permute.xlu0 %371 }
 0x168   : > { %1010 = vmatmul.mubr.msk.f32.gmra.mrb[4].mxu1 %vm221_vm0, %v370_v40 }
 0x169   : > { %1012 = vmatprep.mubr.msk.f32.mxu1 %vm221_vm0, %v372_v41 }
 0x16b   : > { %v374_v42 = vpop.permute.xlu1 %373 }
 0x16c   : > { %1013 = vmatmul.mubr.msk.f32.gmra.mrb[6].mxu1 %vm221_vm0, %v374_v42 }
 0x233   : > { %v1005_v43 = vpop.f32.mrb[0].mxu1 }
 0x234   : > { %v473_v44 = vpop.f32.mrb[1].mxu1  ;;  %v516_v45 = vsel %vm512_vm2, %v1005_v43, -inf }
 0x235   : > { %517 = vmax.xlane.f32.xlu1 %v516_v45  ;;  %v513_v46 = vsel %vm512_vm2, %v473_v44, -inf }
 0x236   : > { %514 = vmax.xlane.f32.xlu0 %v513_v46 }
 0x237   : > { %v1008_v47 = vpop.f32.mrb[2].mxu1 }
 0x238   : > { %v483_v48 = vpop.f32.mrb[3].mxu1  ;;  %v522_v52 = vsel %vm512_vm2, %v1008_v47, -inf }
 0x239   : > { %v519_v49 = vsel %vm512_vm2, %v483_v48, -inf }
 0x23a   : > { %520 = vmax.xlane.f32.xlu0 %v519_v49 }
 0x23b   : > { %v1011_v50 = vpop.f32.mrb[4].mxu1 }
 0x23c   : > { %v493_v51 = vpop.f32.mrb[5].mxu1  ;;  %v528_v56 = vsel %vm512_vm2, %v1011_v50, -inf }
 0x23d   : > { %v525_v53 = vsel %vm512_vm2, %v493_v51, -inf }
 0x23e   : > { %523 = vmax.xlane.f32.xlu0 %v522_v52  ;;  %526 = vmax.xlane.f32.xlu1 %v525_v53 }
 0x23f   : > { %v1014_v54 = vpop.f32.mrb[6].mxu1 }
 0x240   : > { %v503_v55 = vpop.f32.mrb[7].mxu1  ;;  %v534_v58 = vsel %vm512_vm2, %v1014_v54, -inf }
 0x241   : > { %v531_v57 = vsel %vm512_vm2, %v503_v55, -inf }
 0x242   : > { %529 = vmax.xlane.f32.xlu0 %v528_v56  ;;  %532 = vmax.xlane.f32.xlu1 %v531_v57 }
 0x246   : > { %535 = vmax.xlane.f32.xlu0 %v534_v58 }
 0x253   : > { %1095 = vrot.lane.b32.xlu1 %v1094_v17, %s1155_s26 }
 0x2c2   : > { %v518_v59 = vpop.xlane.xlu1 %517 }
 0x2c3   : > { %v538_v60 = vsub.f32 %v1005_v43, %v518_v59  ;;  %v515_v61 = vpop.xlane.xlu0 %514 }
 0x2c4   : > { %v537_v62 = vsub.f32 %v473_v44, %v515_v61 }
 0x2c5   : > { %v547_v63 = vmul.f32 1.442695, %v538_v60 }
 0x2c6   : > { %v545_v0 = vmul.f32 1.442695, %v537_v62 }
 0x2c7   : > { %1114 = vpow2.f32 %v547_v63  ;;  %v521_v1 = vpop.xlane.xlu0 %520 }
 0x2c8   : > { %1116 = vpow2.f32 %v545_v0  ;;  %v539_v2 = vsub.f32 %v483_v48, %v521_v1 }
 0x2ca   : > { %v549_v3 = vmul.f32 1.442695, %v539_v2 }
 0x2cb   : > { %v524_v4 = vpop.xlane.xlu0 %523  ;;  %v527_v5 = vpop.xlane.xlu1 %526 }
 0x2cc   : > { %1118 = vpow2.f32 %v549_v3  ;;  %v540_v6 = vsub.f32 %v1008_v47, %v524_v4  ;;  %v541_v7 = vsub.f32 %v493_v51, %v527_v5 }
 0x2ce   : > { %v551_v8 = vmul.f32 1.442695, %v540_v6  ;;  %v553_v9 = vmul.f32 1.442695, %v541_v7 }
 0x2cf   : > { %v530_v10 = vpop.xlane.xlu0 %529  ;;  %v533_v11 = vpop.xlane.xlu1 %532 }
 0x2d0   : > { %1120 = vpow2.f32 %v551_v8  ;;  %v542_v12 = vsub.f32 %v1011_v50, %v530_v10  ;;  %v543_v16 = vsub.f32 %v503_v55, %v533_v11 }
 0x2d1   : > { %v1115_v13 = vpop.eup %1114  ;;  %1122 = vpow2.f32 %v553_v9 }
 0x2d2   : > { %v1117_v14 = vpop.eup %1116  ;;  %v555_v15 = vmul.f32 1.442695, %v542_v12  ;;  %v564_v17 = vsel %vm512_vm2, %v1115_v13, 0.0  ;;  %v557_v33 = vmul.f32 1.442695, %v543_v16 }
 0x2d3   : > { %565 = vadd.xlane.f32.xlu0 %v564_v17  ;;  %v536_v19 = vpop.xlane.xlu0 %535  ;;  %v1096_v21 = vpop.permute.xlu1 %1095  ;;  %v561_v22 = vsel %vm512_vm2, %v1117_v14, 0.0 }
 0x2d4   : > { %1124 = vpow2.f32 %v555_v15  ;;  %v544_v24 = vsub.f32 %v1014_v54, %v536_v19  ;;  %v1098_v27 = vunpack.i.h.bf16 %v1096_v21  ;;  %v1097_v28 = vunpack.i.l.bf16 %v1096_v21  ;;  %562 = vadd.xlane.f32.xlu1 %v561_v22 }
 0x2d6   : > { %v1119_v30 = vpop.eup %1118  ;;  %v559_v35 = vmul.f32 1.442695, %v544_v24  ;;  %v1067_v36 = vpack.c.bf16 %v1098_v27, %v1097_v28 }
 0x2d7   : > { %v567_v37 = vsel %vm512_vm2, %v1119_v30, 0.0 }
 0x2d8   : > { %1126 = vpow2.f32 %v559_v35  ;;  %568 = vadd.xlane.f32.xlu1 %v567_v37  ;;  %1068 = vmatprep.subr.bf16.mxu0 %v1067_v36 }
 0x2d9   : > { %1070 = vmatpush3.bf16.msra.mxu0 %v1067_v36  ;;  %1128 = vpow2.f32 %v557_v33 }
 0x2da   : > { %v1121_v38 = vpop.eup %1120 }
 0x2db   : > { %v1123_v39 = vpop.eup %1122  ;;  %v570_v40 = vsel %vm512_vm2, %v1121_v38, 0.0 }
 0x2dc   : > { %571 = vadd.xlane.f32.xlu0 %v570_v40  ;;  %v573_v41 = vsel %vm512_vm2, %v1123_v39, 0.0 }
 0x2dd   : > { %574 = vadd.xlane.f32.xlu1 %v573_v41 }
 0x2de   : > { %v1125_v42 = vpop.eup %1124 }
 0x2df   : > { %v576_v43 = vsel %vm512_vm2, %v1125_v42, 0.0 }
 0x2e0   : > { %577 = vadd.xlane.f32.xlu0 %v576_v43 }
 0x2e2   : > { %v1305_v44 = vpop.eup %1126 }
 0x2e3   : > { %v582_v45 = vsel %vm512_vm2, %v1305_v44, 0.0  ;;  %v1129_v46 = vpop.eup %1128 }
 0x2e4   : > { %583 = vadd.xlane.f32.xlu0 %v582_v45  ;;  %v579_v47 = vsel %vm512_vm2, %v1129_v46, 0.0 }
 0x2e8   : > { %580 = vadd.xlane.f32.xlu0 %v579_v47 }
 0x2ee   : > { %1105 = vrot.lane.b32.xlu1 %v1104_v29, %s1155_s26 }
 0x2f2   : > { %1110 = vrot.lane.b32.xlu1 %v1109_v34, %s1155_s26 }
 0x2fe   : > { %1100 = vrot.lane.b32.xlu0 %v1099_v23, %s1155_s26 }
 0x360   : > { %v566_v48 = vpop.xlane.xlu0 %565 }
 0x361   : > { %1130 = vrcp.f32 %v566_v48  ;;  %v563_v49 = vpop.xlane.xlu1 %562 }
 0x362   : > { %1132 = vrcp.f32 %v563_v49 }
 0x365   : > { %v569_v50 = vpop.xlane.xlu1 %568 }
 0x366   : > { %1134 = vrcp.f32 %v569_v50 }
 0x369   : > { %v572_v51 = vpop.xlane.xlu0 %571 }
 0x36a   : > { %1136 = vrcp.f32 %v572_v51  ;;  %v575_v25 = vpop.xlane.xlu1 %574 }
 0x36b   : > { %v1131_v26 = vpop.eup %1130  ;;  %1138 = vrcp.f32 %v575_v25 }
 0x36c   : > { %v1133_v29 = vpop.eup %1132  ;;  %v588_v32 = vmul.f32 %v1131_v26, %v1115_v13 }
 0x36d   : > { %v578_v52 = vpop.xlane.xlu0 %577  ;;  %v586_v31 = vmul.f32 %v1133_v29, %v1117_v14 }
 0x36e   : > { %1140 = vrcp.f32 %v578_v52  ;;  %v602_v53 = vsel %vm512_vm2, %v588_v32, 0.0  ;;  %v1106_v55 = vpop.permute.xlu1 %1105 }
 0x36f   : > { %1031 = vmatprep.mubr.msk.f32.mxu0 %vm512_vm2, %v586_v31  ;;  %v601_v34 = vsel %vm512_vm2, %v586_v31, 0.0  ;;  %v1108_v0 = vunpack.i.h.bf16 %v1106_v55  ;;  %v1107_v3 = vunpack.i.l.bf16 %v1106_v55 }
 0x370   : > { %v1135_v18 = vpop.eup %1134  ;;  %v603_v60 = vadd.f32 %v602_v53, %v601_v34 }
 0x371   : > { %v584_v20 = vpop.xlane.xlu0 %583  ;;  %v590_v23 = vmul.f32 %v1135_v18, %v1119_v30  ;;  %v1075_v12 = vpack.c.bf16 %v1108_v0, %v1107_v3 }
 0x372   : > { %1142 = vrcp.f32 %v584_v20  ;;  %v1111_v7 = vpop.permute.xlu1 %1110 }
 0x373   : > { %v604_v57 = vsel %vm512_vm2, %v590_v23, 0.0  ;;  %v1113_v13 = vunpack.i.h.bf16 %v1111_v7  ;;  %v1112_v14 = vunpack.i.l.bf16 %v1111_v7 }
 0x374   : > { %v1137_v54 = vpop.eup %1136  ;;  %v605_v63 = vadd.f32 %v604_v57, %v603_v60 }
 0x375   : > { %v581_v56 = vpop.xlane.xlu0 %580  ;;  %v592_v58 = vmul.f32 %v1137_v54, %v1121_v38  ;;  %v1139_v59 = vpop.eup %1138  ;;  %v1079_v22 = vpack.c.bf16 %v1113_v13, %v1112_v14 }
 0x376   : > { %1144 = vrcp.f32 %v581_v56  ;;  %v594_v2 = vmul.f32 %v1139_v59, %v1123_v39 }
 0x377   : > { %v606_v61 = vsel %vm512_vm2, %v592_v58, 0.0 }
 0x378   : > { %v1141_v62 = vpop.eup %1140  ;;  %v607_v6 = vadd.f32 %v606_v61, %v605_v63  ;;  %v608_v10 = vsel %vm512_vm2, %v594_v2, 0.0 }
 0x379   : > { %v1101_v1 = vpop.permute.xlu0 %1100  ;;  %v596_v8 = vmul.f32 %v1141_v62, %v1125_v42 }
 0x37a   : > { %v1103_v4 = vunpack.i.h.bf16 %v1101_v1  ;;  %v1102_v5 = vunpack.i.l.bf16 %v1101_v1  ;;  %v609_v15 = vadd.f32 %v608_v10, %v607_v6 }
 0x37b   : > { %v610_v16 = vsel %vm512_vm2, %v596_v8, 0.0 }
 0x37c   : > { %v1071_v9 = vpack.c.bf16 %v1103_v4, %v1102_v5  ;;  %v1143_v11 = vpop.eup %1142  ;;  %v611_v24 = vadd.f32 %v610_v16, %v609_v15 }
 0x37d   : > { %v600_v21 = vmul.f32 %v1143_v11, %v1305_v44 }
 0x37e   : > { %1072 = vmatprep.subr.bf16.mxu0 %v1071_v9 }
 0x37f   : > { %1074 = vmatpush3.bf16.msra.mxu0 %v1071_v9  ;;  %v614_v30 = vsel %vm512_vm2, %v600_v21, 0.0 }
 0x380   : > { %v1145_v17 = vpop.eup %1144  ;;  %1076 = vmatprep.subr.bf16.mxu0 %v1075_v12 }
 0x381   : > { %v598_v19 = vmul.f32 %v1145_v17, %v1129_v46 }
 0x383   : > { %1078 = vmatpush3.bf16.msra.mxu0 %v1075_v12  ;;  %v612_v27 = vsel %vm512_vm2, %v598_v19, 0.0 }
 0x384   : > { %1080 = vmatprep.subr.bf16.mxu0 %v1079_v22  ;;  %v613_v28 = vadd.f32 %v612_v27, %v611_v24 }
 0x386   : > { %v615_v33 = vadd.f32 %v614_v30, %v613_v28 }
 0x387   : > { %1082 = vmatpush3.bf16.msra.mxu0 %v1079_v22 }
 0x388   : > { %v616_v35 = vrot.slane %v615_v33, 4 }
 0x38a   : > { %1032 = vmatmul.mubr.msk.f32.vlgmr.msra.gmra.mrb[8].mxu0 %vm512_vm2, %v588_v32  ;;  %v617_v36 = vadd.f32 %v616_v35, %v615_v33 }
 0x38b   : > { %1034 = vmatprep.mubr.msk.f32.mxu0 %vm512_vm2, %v590_v23 }
 0x38c   : > { %v618_v37 = vrot.slane %v617_v36, 2 }
 0x38e   : > { %1035 = vmatmul.mubr.msk.f32.gmra.mrb[10].mxu0 %vm512_vm2, %v592_v58  ;;  %v619_v38 = vadd.f32 %v618_v37, %v617_v36 }
 0x38f   : > { %1037 = vmatprep.mubr.msk.f32.mxu0 %vm512_vm2, %v594_v2 }
 0x390   : > { %v620_v39 = vrot.slane %v619_v38, 1 }
 0x392   : > { %1038 = vmatmul.mubr.msk.f32.gmra.mrb[12].mxu0 %vm512_vm2, %v596_v8  ;;  %v621_v40 = vadd.f32 %v620_v39, %v619_v38 }
 0x393   : > { %1040 = vmatprep.mubr.msk.f32.mxu0 %vm512_vm2, %v598_v19 }
 0x394   : > { %623 = vst.msk [vmem:[%s204_s29] sm:$0x1] %vm622_vm3, %v621_v40 }
 0x396   : > { %1041 = vmatmul.mubr.msk.f32.gmra.mrb[14].mxu0 %vm512_vm2, %v600_v21 }
 0x45d   : > { %v1033_v41 = vpop.f32.mrb[8].mxu0 }
 0x45e   : > { %v738_v42 = vpop.f32.mrb[9].mxu0 }
 0x45f   : > { %777 = vxpose.xlu1.b32.start [1/8] (short) (narrow) %v738_v42, 8 }
 0x461   : > { %v1036_v43 = vpop.f32.mrb[10].mxu0 }
 0x462   : > { %v748_v44 = vpop.f32.mrb[11].mxu0 }
 0x463   : > { %778 = vxpose.xlu1.b32.cont [2/8] (short) (narrow) %v1033_v41, 8 }
 0x465   : > { %v1039_v45 = vpop.f32.mrb[12].mxu0 }
 0x466   : > { %v758_v46 = vpop.f32.mrb[13].mxu0 }
 0x467   : > { %779 = vxpose.xlu1.b32.cont [3/8] (short) (narrow) %v748_v44, 8 }
 0x469   : > { %v1042_v47 = vpop.f32.mrb[14].mxu0 }
 0x46a   : > { %v768_v48 = vpop.f32.mrb[15].mxu0 }
 0x46b   : > { %780 = vxpose.xlu1.b32.cont [4/8] (short) (narrow) %v1036_v43, 8 }
 0x46f   : > { %781 = vxpose.xlu1.b32.cont [5/8] (short) (narrow) %v758_v46, 8 }
 0x473   : > { %782 = vxpose.xlu1.b32.cont [6/8] (short) (narrow) %v1039_v45, 8 }
 0x477   : > { %783 = vxpose.xlu1.b32.cont [7/8] (short) (narrow) %v768_v48, 8 }
 0x47b   : > { %784 = vxpose.xlu1.b32.end [8/8] (short) (narrow) %v1042_v47, 8 }
 0x4df   : > { %v793_v49 = vpop.trf.xlu1 }
 0x4e0   : > { %809 = vst.msk [vmem:[%s201_s7] sm:$0xff] %vm512_vm2, %v793_v49 }
 0x4e1 PF: > { %s15_s15 = sadd.s32 1, %s1152_s15  }
 0x4e2   : > { %p12_p4 = scmp.ge.s32.totalorder %s15_s15, 6  }
 0x4e4   :  { %14 = sbr.rel (!%p12_p4) target bundleno = 1 (0x1), region = 74 }

// kernel: _lambda_.5
= control target key start
LH: loop header
LB: loop body
LE: loop exit
PB: predicated region body
PF: predicated region fallthrough
CT: control target
= control target key end

     0   :  { %s1725_s12 = smov 0   ;;  %s2383_s0 = inlined_call_operand.vmem [shape: f32[2,4,8,8,16], index: 0, kind: input, shape index: {}]   ;;  %s2384_s1 = inlined_call_operand.vmem [shape: bf16[256,16], index: 1, kind: input, shape index: {}]   ;;  %s2385_s2 = inlined_call_operand.vmem [shape: f32[1,16], index: 2, kind: input, shape index: {}]   ;;  %s2386_s3 = inlined_call_operand.vmem [shape: f32[2,64,16], index: 3, kind: output, shape index: {}]  }
   0x1 LB: > { %s1291_s13 = sadd.s32 4294967295, %s1695_s12   ;;  %p1295_p0 = scmp.ge.s32.totalorder %s1695_s12, 1  ;;  %s1695_s12 = sphi %s1725_s12, %s13_s12  }
   0x2   : > { %p137_p1 = scmp.lt.s32.totalorder %s1695_s12, 3 }
   0x4   : > { %p138_p2 = pnand %p1295_p0, %p137_p1 }
   0x5   : > { %p1735_p3 = scmp.lt.s32.totalorder (!%p138_p2), %s1291_s13, 1  ;;  %vm172_vm0 = vcmask (!%p138_p2), 130048   ;;  %vm174_vm1 = vcmask (!%p138_p2), 123904   ;;  %v1697_v0 = vmov (!%p138_p2), 0.0   ;;  %s1698_s19 = smov (!%p138_p2), 16   ;;  %vm910_vm2 = vcmask (!%p138_p2), 261120  }
   0x6   : > { %141 = sbr.rel (%p138_p2) target bundleno = 500 (0x1f4), region = 32  ;;  %216 = vst.msk [vmem:[#allocation2 + $0x150] sm:$0xff] (!%p138_p2), %vm172_vm0, %v1697_v0  ;;  %218 = vst.msk [vmem:[#allocation2 + $0x160] sm:$0xff] (!%p138_p2), %vm172_vm0, %v1697_v0  ;;  %s1699_s20 = smov (!%p138_p2), 32   ;;  %vm919_vm3 = vcmask (!%p138_p2), 392192   ;;  %vm928_vm4 = vcmask (!%p138_p2), 523264  }
   0x7   : > { %217 = vst.msk [vmem:[#allocation2 + $0x158] sm:$0x3] (!%p138_p2), %vm174_vm1, %v1697_v0  ;;  %219 = vst.msk [vmem:[#allocation2 + $0x168] sm:$0x3] (!%p138_p2), %vm174_vm1, %v1697_v0  ;;  %s1700_s21 = smov (!%p138_p2), 48   ;;  %s1701_s28 = smov (!%p138_p2), 64  }
   0x8   : > { %176 = vst.msk [vmem:[#allocation2 + $0x10] sm:$0xff] (!%p138_p2), %vm172_vm0, %v1697_v0  ;;  %178 = vst.msk [vmem:[#allocation2 + $0x20] sm:$0xff] (!%p138_p2), %vm172_vm0, %v1697_v0  ;;  %s1702_s14 = smov (!%p138_p2), 80   ;;  %s1703_s24 = smov (!%p138_p2), 96   ;;  %vm937_vm5 = vcmask (!%p138_p2), 654336   ;;  %vm946_vm6 = vcmask (!%p138_p2), 785408  }
   0x9   : > { %177 = vst.msk [vmem:[#allocation2 + $0x18] sm:$0x3] (!%p138_p2), %vm174_vm1, %v1697_v0  ;;  %179 = vst.msk [vmem:[#allocation2 + $0x28] sm:$0x3] (!%p138_p2), %vm174_vm1, %v1697_v0  ;;  %s1704_s7 = smov (!%p138_p2), 112   ;;  %vm955_vm7 = vcmask (!%p138_p2), 916480  }
   0xa   : > { %180 = vst.msk [vmem:[#allocation2 + $0x30] sm:$0xff] (!%p138_p2), %vm172_vm0, %v1697_v0  ;;  %182 = vst.msk [vmem:[#allocation2 + $0x40] sm:$0xff] (!%p138_p2), %vm172_vm0, %v1697_v0 }
   0xb   : > { %181 = vst.msk [vmem:[#allocation2 + $0x38] sm:$0x3] (!%p138_p2), %vm174_vm1, %v1697_v0  ;;  %183 = vst.msk [vmem:[#allocation2 + $0x48] sm:$0x3] (!%p138_p2), %vm174_vm1, %v1697_v0 }
   0xc   : > { %184 = vst.msk [vmem:[#allocation2 + $0x50] sm:$0xff] (!%p138_p2), %vm172_vm0, %v1697_v0  ;;  %186 = vst.msk [vmem:[#allocation2 + $0x60] sm:$0xff] (!%p138_p2), %vm172_vm0, %v1697_v0 }
   0xd   : > { %185 = vst.msk [vmem:[#allocation2 + $0x58] sm:$0x3] %vm174_vm1, %v1697_v0  ;;  %187 = vst.msk [vmem:[#allocation2 + $0x68] sm:$0x3] %vm174_vm1, %v1697_v0  ;;  %s2389_s13 = smov (!%p1735_p3, %s1291_s13), 1 }
   0xe   : > { %188 = vst.msk [vmem:[#allocation2 + $0x70] sm:$0xff] %vm172_vm0, %v1697_v0  ;;  %190 = vst.msk [vmem:[#allocation2 + $0x80] sm:$0xff] %vm172_vm0, %v1697_v0  ;;  %s1319_s15 = sshll.u32 %s2389_s13, 8 }
   0xf   : > { %189 = vst.msk [vmem:[#allocation2 + $0x78] sm:$0x3] %vm174_vm1, %v1697_v0  ;;  %191 = vst.msk [vmem:[#allocation2 + $0x88] sm:$0x3] %vm174_vm1, %v1697_v0  ;;  %s1893_s18 = scalar_lea.vmem %s2383_s0, %s1319_s15 }
  0x10   : > { %192 = vst.msk [vmem:[#allocation2 + $0x90] sm:$0xff] %vm172_vm0, %v1697_v0  ;;  %196 = vst.msk [vmem:[#allocation2 + $0xb0] sm:$0xff] %vm172_vm0, %v1697_v0  ;;  %v270_v1 = vld [vmem:[%s1893_s18 + $0x80] sm:$0xff]  ;;  %v271_v2 = vld [vmem:[%s1893_s18 + $0x88] sm:$0xff] }
  0x11   : > { %193 = vst.msk [vmem:[#allocation2 + $0x98] sm:$0x3] %vm174_vm1, %v1697_v0  ;;  %197 = vst.msk [vmem:[#allocation2 + $0xb8] sm:$0x3] %vm174_vm1, %v1697_v0  ;;  %v274_v3 = vld [vmem:[%s1893_s18 + $0xa0] sm:$0xff]  ;;  %v275_v4 = vld [vmem:[%s1893_s18 + $0xa8] sm:$0xff] }
  0x12   : > { %198 = vst.msk [vmem:[#allocation2 + $0xc0] sm:$0xff] %vm172_vm0, %v1697_v0  ;;  %200 = vst.msk [vmem:[#allocation2 + $0xd0] sm:$0xff] %vm172_vm0, %v1697_v0  ;;  %v273_v5 = vld [vmem:[%s1893_s18 + $0x98] sm:$0xff]  ;;  %v278_v6 = vld [vmem:[%s1893_s18 + $0xc0] sm:$0xff] }
  0x13   : > { %199 = vst.msk [vmem:[#allocation2 + $0xc8] sm:$0x3] %vm174_vm1, %v1697_v0  ;;  %201 = vst.msk [vmem:[#allocation2 + $0xd8] sm:$0x3] %vm174_vm1, %v1697_v0  ;;  %v279_v7 = vld [vmem:[%s1893_s18 + $0xc8] sm:$0xff]  ;;  %v282_v8 = vld [vmem:[%s1893_s18 + $0xe0] sm:$0xff] }
  0x14   : > { %202 = vst.msk [vmem:[#allocation2 + $0xe0] sm:$0xff] %vm172_vm0, %v1697_v0  ;;  %204 = vst.msk [vmem:[#allocation2 + $0xf0] sm:$0xff] %vm172_vm0, %v1697_v0  ;;  %v283_v9 = vld [vmem:[%s1893_s18 + $0xe8] sm:$0xff]  ;;  %v281_v10 = vld [vmem:[%s1893_s18 + $0xd8] sm:$0xff] }
  0x15   : > { %203 = vst.msk [vmem:[#allocation2 + $0xe8] sm:$0x3] %vm174_vm1, %v1697_v0  ;;  %205 = vst.msk [vmem:[#allocation2 + $0xf8] sm:$0x3] %vm174_vm1, %v1697_v0  ;;  %v267_v12 = vld [vmem:[%s1893_s18 + $0x68] sm:$0xff]  ;;  %v268_v13 = vld [vmem:[%s1893_s18 + $0x70] sm:$0xff] }
  0x16   : > { %206 = vst.msk [vmem:[#allocation2 + $0x100] sm:$0xff] %vm172_vm0, %v1697_v0  ;;  %208 = vst.msk [vmem:[#allocation2 + $0x110] sm:$0xff] %vm172_vm0, %v1697_v0  ;;  %v263_v14 = vld [vmem:[%s1893_s18 + $0x48] sm:$0xff]  ;;  %v264_v15 = vld [vmem:[%s1893_s18 + $0x50] sm:$0xff] }
  0x17   : > { %207 = vst.msk [vmem:[#allocation2 + $0x108] sm:$0x3] %vm174_vm1, %v1697_v0  ;;  %209 = vst.msk [vmem:[#allocation2 + $0x118] sm:$0x3] %vm174_vm1, %v1697_v0  ;;  %v266_v16 = vld [vmem:[%s1893_s18 + $0x60] sm:$0xff]  ;;  %v259_v18 = vld [vmem:[%s1893_s18 + $0x28] sm:$0xff] }
  0x18   : > { %210 = vst.msk [vmem:[#allocation2 + $0x120] sm:$0xff] %vm172_vm0, %v1697_v0  ;;  %212 = vst.msk [vmem:[#allocation2 + $0x130] sm:$0xff] %vm172_vm0, %v1697_v0  ;;  %v262_v17 = vld [vmem:[%s1893_s18 + $0x40] sm:$0xff]  ;;  %v260_v19 = vld [vmem:[%s1893_s18 + $0x30] sm:$0xff] }
  0x19   : > { %211 = vst.msk [vmem:[#allocation2 + $0x128] sm:$0x3] %vm174_vm1, %v1697_v0  ;;  %213 = vst.msk [vmem:[#allocation2 + $0x138] sm:$0x3] %vm174_vm1, %v1697_v0  ;;  %v255_v20 = vld [vmem:[%s1893_s18 + $0x8] sm:$0xff]  ;;  %v256_v21 = vld [vmem:[%s1893_s18 + $0x10] sm:$0xff] }
  0x1a   : > { %214 = vst.msk [vmem:[#allocation2 + $0x140] sm:$0xff] %vm172_vm0, %v1697_v0  ;;  %220 = vst.msk [vmem:[#allocation2 + $0x170] sm:$0xff] %vm172_vm0, %v1697_v0  ;;  %v258_v22 = vld [vmem:[%s1893_s18 + $0x20] sm:$0xff]  ;;  %v276_v47 = vld [vmem:[%s1893_s18 + $0xb0] sm:$0xff] }
  0x1b   : > { %215 = vst.msk [vmem:[#allocation2 + $0x148] sm:$0x3] %vm174_vm1, %v1697_v0  ;;  %221 = vst.msk [vmem:[#allocation2 + $0x178] sm:$0x3] %vm174_vm1, %v1697_v0  ;;  %v254_v40 = vld [vmem:[%s1893_s18] sm:$0xff]  ;;  %v277_v48 = vld [vmem:[%s1893_s18 + $0xb8] sm:$0xff] }
  0x1c   : > { %222 = vst.msk [vmem:[#allocation2 + $0x180] sm:$0xff] %vm172_vm0, %v1697_v0  ;;  %224 = vst.msk [vmem:[#allocation2 + $0x190] sm:$0xff] %vm172_vm0, %v1697_v0  ;;  %v272_v49 = vld [vmem:[%s1893_s18 + $0x90] sm:$0xff]  ;;  %v285_v51 = vld [vmem:[%s1893_s18 + $0xf8] sm:$0xff] }
  0x1d   : > { %223 = vst.msk [vmem:[#allocation2 + $0x188] sm:$0x3] %vm174_vm1, %v1697_v0  ;;  %225 = vst.msk [vmem:[#allocation2 + $0x198] sm:$0x3] %vm174_vm1, %v1697_v0  ;;  %v284_v50 = vld [vmem:[%s1893_s18 + $0xf0] sm:$0xff]  ;;  %v269_v53 = vld [vmem:[%s1893_s18 + $0x78] sm:$0xff] }
  0x1e   : > { %226 = vst.msk [vmem:[#allocation2 + $0x1a0] sm:$0xff] %vm172_vm0, %v1697_v0  ;;  %228 = vst.msk [vmem:[#allocation2 + $0x1b0] sm:$0xff] %vm172_vm0, %v1697_v0  ;;  %v280_v52 = vld [vmem:[%s1893_s18 + $0xd0] sm:$0xff]  ;;  %v265_v56 = vld [vmem:[%s1893_s18 + $0x58] sm:$0xff] }
  0x1f   : > { %227 = vst.msk [vmem:[#allocation2 + $0x1a8] sm:$0x3] %vm174_vm1, %v1697_v0  ;;  %229 = vst.msk [vmem:[#allocation2 + $0x1b8] sm:$0x3] %vm174_vm1, %v1697_v0  ;;  %v261_v57 = vld [vmem:[%s1893_s18 + $0x38] sm:$0xff] }
  0x20   : > { %230 = vst.msk [vmem:[#allocation2 + $0x1c0] sm:$0xff] %vm172_vm0, %v1697_v0  ;;  %234 = vst.msk [vmem:[#allocation2 + $0x1e0] sm:$0xff] %vm172_vm0, %v1697_v0  ;;  %v257_v60 = vld [vmem:[%s1893_s18 + $0x18] sm:$0xff] }
  0x21   : > { %231 = vst.msk [vmem:[#allocation2 + $0x1c8] sm:$0x3] %vm174_vm1, %v1697_v0  ;;  %235 = vst.msk [vmem:[#allocation2 + $0x1e8] sm:$0x3] %vm174_vm1, %v1697_v0 }
  0x22   : > { %236 = vst.msk [vmem:[#allocation2 + $0x1f0] sm:$0xff] %vm172_vm0, %v1697_v0  ;;  %238 = vst.msk [vmem:[#allocation2 + $0x200] sm:$0xff] %vm172_vm0, %v1697_v0  ;;  %v329_v11 = vld [vmem:[#allocation2 + $0x141] sm:$0xff] }
  0x23   : > { %237 = vst.msk [vmem:[#allocation2 + $0x1f8] sm:$0x3] %vm174_vm1, %v1697_v0  ;;  %239 = vst.msk [vmem:[#allocation2 + $0x208] sm:$0x3] %vm174_vm1, %v1697_v0  ;;  %v345_v58 = vld [vmem:[#allocation2 + $0x142] sm:$0xff] }
  0x24   : > { %240 = vst.msk [vmem:[#allocation2 + $0x210] sm:$0xff] %vm172_vm0, %v1697_v0  ;;  %242 = vst.msk [vmem:[#allocation2 + $0x220] sm:$0xff] %vm172_vm0, %v1697_v0 }
  0x25   : > { %241 = vst.msk [vmem:[#allocation2 + $0x218] sm:$0x3] %vm174_vm1, %v1697_v0  ;;  %243 = vst.msk [vmem:[#allocation2 + $0x228] sm:$0x3] %vm174_vm1, %v1697_v0 }
  0x26   : > { %244 = vst.msk [vmem:[#allocation2 + $0x230] sm:$0xff] %vm172_vm0, %v1697_v0  ;;  %246 = vst.msk [vmem:[#allocation2 + $0x240] sm:$0xff] %vm172_vm0, %v1697_v0 }
  0x27   : > { %245 = vst.msk [vmem:[#allocation2 + $0x238] sm:$0x3] %vm174_vm1, %v1697_v0  ;;  %247 = vst.msk [vmem:[#allocation2 + $0x248] sm:$0x3] %vm174_vm1, %v1697_v0 }
  0x28   : > { %248 = vst.msk [vmem:[#allocation2 + $0x250] sm:$0xff] %vm172_vm0, %v1697_v0  ;;  %250 = vst.msk [vmem:[#allocation2 + $0x260] sm:$0xff] %vm172_vm0, %v1697_v0  ;;  %v337_v38 = vld [vmem:[#allocation2 + $0x1e1] sm:$0xff] }
  0x29   : > { %249 = vst.msk [vmem:[#allocation2 + $0x258] sm:$0x3] %vm174_vm1, %v1697_v0  ;;  %251 = vst.msk [vmem:[#allocation2 + $0x268] sm:$0x3] %vm174_vm1, %v1697_v0 }
  0x2a   : > { %303 = vst.msk [vmem:[#allocation2 + $0x151] sm:$0xff] %vm172_vm0, %v270_v1  ;;  %304 = vst.msk [vmem:[#allocation2 + $0x161] sm:$0xff] %vm172_vm0, %v271_v2 }
  0x2b   : > { %307 = vst.msk [vmem:[#allocation2 + $0x191] sm:$0xff] %vm172_vm0, %v274_v3  ;;  %308 = vst.msk [vmem:[#allocation2 + $0x1a1] sm:$0xff] %vm172_vm0, %v275_v4  ;;  %v1673_v3 = vld [vmem:[%s2384_s1 + $0x40] sm:$0xff]  }
  0x2c   : > { %306 = vst.msk [vmem:[#allocation2 + $0x181] sm:$0xff] %vm172_vm0, %v273_v5  ;;  %311 = vst.msk [vmem:[#allocation2 + $0x1f1] sm:$0xff] %vm172_vm0, %v278_v6  ;;  %1321 = vmatprep.subr.bf16.mxu0 %v1673_v3  ;;  %1361 = vmatprep.subr.bf16.mxu1 %v1673_v3 }
  0x2d   : > { %312 = vst.msk [vmem:[#allocation2 + $0x201] sm:$0xff] %vm172_vm0, %v279_v7  ;;  %315 = vst.msk [vmem:[#allocation2 + $0x231] sm:$0xff] %vm172_vm0, %v282_v8 }
  0x2e   : > { %316 = vst.msk [vmem:[#allocation2 + $0x241] sm:$0xff] %vm172_vm0, %v283_v9  ;;  %314 = vst.msk [vmem:[#allocation2 + $0x221] sm:$0xff] %vm172_vm0, %v281_v10  ;;  %v1674_v10 = vld [vmem:[%s2384_s1] sm:$0xff]  }
  0x2f   : > { %300 = vst.msk [vmem:[#allocation2 + $0x101] sm:$0xff] %vm172_vm0, %v267_v12  ;;  %301 = vst.msk [vmem:[#allocation2 + $0x111] sm:$0xff] %vm172_vm0, %v268_v13  ;;  %1322 = vmatpush3.bf16.msra.mxu0 %v1674_v10  ;;  %1369 = vmatpush3.bf16.msra.mxu1 %v1674_v10 }
  0x30   : > { %296 = vst.msk [vmem:[#allocation2 + $0xc1] sm:$0xff] %vm172_vm0, %v263_v14  ;;  %297 = vst.msk [vmem:[#allocation2 + $0xd1] sm:$0xff] %vm172_vm0, %v264_v15 }
  0x31   : > { %299 = vst.msk [vmem:[#allocation2 + $0xf1] sm:$0xff] %vm172_vm0, %v266_v16  ;;  %295 = vst.msk [vmem:[#allocation2 + $0xb1] sm:$0xff] %vm172_vm0, %v262_v17  ;;  %v396_v23 = vld [vmem:[#allocation2 + $0x151] sm:$0xff]  ;;  %v1934_v24 = vld [vmem:[#allocation2 + $0x161] sm:$0xff] }
  0x32   : > { %292 = vst.msk [vmem:[#allocation2 + $0x61] sm:$0xff] %vm172_vm0, %v259_v18  ;;  %293 = vst.msk [vmem:[#allocation2 + $0x71] sm:$0xff] %vm172_vm0, %v260_v19  ;;  %v400_v25 = vld [vmem:[#allocation2 + $0x191] sm:$0xff]  ;;  %v1393_v26 = vpack.i.bf16 %v1934_v24, %v396_v23  ;;  %v1403_v27 = vpack.i.bf16 %v396_v23, %v329_v11  ;;  %v1940_v28 = vld [vmem:[#allocation2 + $0x1a1] sm:$0xff] }
  0x33   : > { %288 = vst.msk [vmem:[#allocation2 + $0x21] sm:$0xff] %vm172_vm0, %v255_v20  ;;  %289 = vst.msk [vmem:[#allocation2 + $0x31] sm:$0xff] %vm172_vm0, %v256_v21  ;;  %v1942_v29 = vld [vmem:[#allocation2 + $0x181] sm:$0xff]  ;;  %v1398_v30 = vpack.i.bf16 %v1940_v28, %v400_v25  ;;  %v404_v32 = vld [vmem:[#allocation2 + $0x1f1] sm:$0xff] }
  0x34   : > { %291 = vst.msk [vmem:[#allocation2 + $0x51] sm:$0xff] %vm172_vm0, %v258_v22  ;;  %1394 = vrot.lane.b32.xlu0 %v1393_v26, %s1698_s19  ;;  %1404 = vrot.lane.b32.xlu1 %v1403_v27, %s1698_s19  ;;  %v1408_v31 = vpack.i.bf16 %v400_v25, %v1942_v29  ;;  %v1948_v33 = vld [vmem:[#allocation2 + $0x201] sm:$0xff]  ;;  %v408_v34 = vld [vmem:[#allocation2 + $0x231] sm:$0xff]  ;;  %287 = vst.msk [vmem:[#allocation2 + $0x11] sm:$0xff] %vm172_vm0, %v254_v40  ;;  %v1423_v41 = vpack.i.bf16 %v404_v32, %v337_v38 }
  0x35   : > { %v1950_v35 = vld [vmem:[#allocation2 + $0x241] sm:$0xff]  ;;  %v1413_v36 = vpack.i.bf16 %v1948_v33, %v404_v32  ;;  %v412_v43 = vld [vmem:[#allocation2 + $0x152] sm:$0xff]  ;;  %309 = vst.msk [vmem:[#allocation2 + $0x1b1] sm:$0xff] %vm172_vm0, %v276_v47  ;;  %310 = vst.msk [vmem:[#allocation2 + $0x1c1] sm:$0xff] %vm172_vm0, %v277_v48 }
  0x36   : > { %v1418_v37 = vpack.i.bf16 %v1950_v35, %v408_v34  ;;  %v1956_v39 = vld [vmem:[#allocation2 + $0x221] sm:$0xff]  ;;  %v416_v45 = vld [vmem:[#allocation2 + $0x192] sm:$0xff]  ;;  %305 = vst.msk [vmem:[#allocation2 + $0x171] sm:$0xff] %vm172_vm0, %v272_v49  ;;  %317 = vst.msk [vmem:[#allocation2 + $0x251] sm:$0xff] %vm172_vm0, %v284_v50  ;;  %v1443_v61 = vpack.i.bf16 %v412_v43, %v345_v58 }
  0x37   : > { %v1428_v42 = vpack.i.bf16 %v408_v34, %v1956_v39  ;;  %v1963_v44 = vld [vmem:[#allocation2 + $0x162] sm:$0xff]  ;;  %318 = vst.msk [vmem:[#allocation2 + $0x261] sm:$0xff] %vm172_vm0, %v285_v51  ;;  %313 = vst.msk [vmem:[#allocation2 + $0x211] sm:$0xff] %vm172_vm0, %v280_v52  ;;  %v1996_v0 = vld [vmem:[#allocation2 + $0x110] sm:$0xff] }
  0x38   : > { %1399 = vrot.lane.b32.xlu0 %v1398_v30, %s1698_s19  ;;  %1409 = vrot.lane.b32.xlu1 %v1408_v31, %s1698_s19  ;;  %v1965_v46 = vld [vmem:[#allocation2 + $0x1a2] sm:$0xff]  ;;  %v1433_v54 = vpack.i.bf16 %v1963_v44, %v412_v43  ;;  %302 = vst.msk [vmem:[#allocation2 + $0x121] sm:$0xff] %vm172_vm0, %v269_v53  ;;  %298 = vst.msk [vmem:[#allocation2 + $0xe1] sm:$0xff] %vm172_vm0, %v265_v56  ;;  %v1998_v2 = vld [vmem:[#allocation2 + $0xd0] sm:$0xff] }
  0x39   : > { %v1438_v55 = vpack.i.bf16 %v1965_v46, %v416_v45  ;;  %v1987_v59 = vld [vmem:[#allocation2 + $0x182] sm:$0xff]  ;;  %294 = vst.msk [vmem:[#allocation2 + $0x81] sm:$0xff] %vm172_vm0, %v261_v57  ;;  %290 = vst.msk [vmem:[#allocation2 + $0x41] sm:$0xff] %vm172_vm0, %v257_v60  ;;  %v2007_v6 = vld [vmem:[#allocation2 + $0xf0] sm:$0xff] }
  0x3a   : > { %v1448_v62 = vpack.i.bf16 %v416_v45, %v1987_v59  ;;  %v425_v63 = vld [vmem:[#allocation2 + $0x100] sm:$0xff]  ;;  %v354_v7 = vld [vmem:[#allocation2 + $0xb0] sm:$0xff]  ;;  %v1675_v11 = vld [vmem:[%s2384_s1 + $0x48] sm:$0xff]  }
  0x3b   : > { %v421_v1 = vld [vmem:[#allocation2 + $0xc0] sm:$0xff]  ;;  %v1458_v4 = vpack.i.bf16 %v1996_v0, %v425_v63  ;;  %v2009_v9 = vld [vmem:[#allocation2 + $0x71] sm:$0xff]  ;;  %v1468_v12 = vpack.i.bf16 %v425_v63, %v2007_v6  ;;  %v1676_v16 = vld [vmem:[%s2384_s1 + $0x8] sm:$0xff]   ;;  %1323 = vmatprep.subr.bf16.mxu0 %v1675_v11  ;;  %1362 = vmatprep.subr.bf16.mxu1 %v1675_v11 }
  0x3c   : > { %1414 = vrot.lane.b32.xlu0 %v1413_v36, %s1699_s20  ;;  %1419 = vrot.lane.b32.xlu1 %v1418_v37, %s1699_s20  ;;  %v1453_v5 = vpack.i.bf16 %v1998_v2, %v421_v1  ;;  %v434_v8 = vld [vmem:[#allocation2 + $0x61] sm:$0xff]  ;;  %v1463_v13 = vpack.i.bf16 %v421_v1, %v354_v7  ;;  %v2020_v15 = vld [vmem:[#allocation2 + $0x31] sm:$0xff] }
  0x3d   : > { %v430_v14 = vld [vmem:[#allocation2 + $0x21] sm:$0xff]  ;;  %v1677_v17 = vld [vmem:[%s2384_s1 + $0x50] sm:$0xff]   ;;  %v1478_v18 = vpack.i.bf16 %v2009_v9, %v434_v8  ;;  %1324 = vmatpush3.bf16.msra.mxu0 %v1676_v16  ;;  %1370 = vmatpush3.bf16.msra.mxu1 %v1676_v16  ;;  %v1679_v23 = vld [vmem:[%s2384_s1 + $0x58] sm:$0xff]  }
  0x3e   : > { %v1473_v19 = vpack.i.bf16 %v2020_v15, %v430_v14  ;;  %v2032_v20 = vld [vmem:[#allocation2 + $0x51] sm:$0xff]  ;;  %1325 = vmatprep.subr.bf16.mxu0 %v1677_v17  ;;  %v442_v25 = vld [vmem:[#allocation2 + $0x101] sm:$0xff]  ;;  %1363 = vmatprep.subr.bf16.mxu1 %v1677_v17 }
  0x3f   : > { %v362_v21 = vld [vmem:[#allocation2 + $0x11] sm:$0xff]  ;;  %v438_v27 = vld [vmem:[#allocation2 + $0xc1] sm:$0xff]  ;;  %v1488_v31 = vpack.i.bf16 %v434_v8, %v2032_v20 }
  0x40   : > { %1424 = vrot.lane.b32.xlu0 %v1423_v41, %s1699_s20  ;;  %1429 = vrot.lane.b32.xlu1 %v1428_v42, %s1699_s20  ;;  %v1678_v22 = vld [vmem:[%s2384_s1 + $0x10] sm:$0xff]   ;;  %v1680_v30 = vld [vmem:[%s2384_s1 + $0x18] sm:$0xff]   ;;  %v1483_v32 = vpack.i.bf16 %v430_v14, %v362_v21  ;;  %v450_v48 = vld [vmem:[#allocation2 + $0x62] sm:$0xff] }
  0x41   : > { %v2040_v26 = vld [vmem:[#allocation2 + $0x111] sm:$0xff]  ;;  %1326 = vmatpush3.bf16.msra.mxu0 %v1678_v22  ;;  %1371 = vmatpush3.bf16.msra.mxu1 %v1678_v22  ;;  %v1681_v36 = vld [vmem:[%s2384_s1 + $0x60] sm:$0xff]   ;;  %v1683_v43 = vld [vmem:[%s2384_s1 + $0x68] sm:$0xff]  }
  0x42   : > { %v2048_v34 = vld [vmem:[#allocation2 + $0xd1] sm:$0xff]  ;;  %1327 = vmatprep.subr.bf16.mxu0 %v1679_v23  ;;  %1364 = vmatprep.subr.bf16.mxu1 %v1679_v23  ;;  %v1498_v37 = vpack.i.bf16 %v2040_v26, %v442_v25  ;;  %v1682_v42 = vld [vmem:[%s2384_s1 + $0x20] sm:$0xff]   ;;  %v1684_v52 = vld [vmem:[%s2384_s1 + $0x28] sm:$0xff]  }
  0x43   : > { %v1493_v38 = vpack.i.bf16 %v2048_v34, %v438_v27  ;;  %v2057_v40 = vld [vmem:[#allocation2 + $0xf1] sm:$0xff]  ;;  %v446_v50 = vld [vmem:[#allocation2 + $0x22] sm:$0xff] }
  0x44   : > { %1434 = vrot.lane.b32.xlu0 %v1433_v54, %s1700_s21  ;;  %1439 = vrot.lane.b32.xlu1 %v1438_v55, %s1700_s21  ;;  %v370_v41 = vld [vmem:[#allocation2 + $0xb1] sm:$0xff]  ;;  %v1508_v45 = vpack.i.bf16 %v442_v25, %v2057_v40  ;;  %v403_v1 = vld [vmem:[#allocation2 + $0x1c1] sm:$0xff] }
  0x45   : > { %1328 = vmatpush3.bf16.msra.mxu0 %v1680_v30  ;;  %1372 = vmatpush3.bf16.msra.mxu1 %v1680_v30  ;;  %v1503_v47 = vpack.i.bf16 %v438_v27, %v370_v41  ;;  %v2068_v49 = vld [vmem:[#allocation2 + $0x72] sm:$0xff]  ;;  %v427_v22 = vld [vmem:[#allocation2 + $0x120] sm:$0xff] }
  0x46   : > { %1329 = vmatprep.subr.bf16.mxu0 %v1681_v36  ;;  %1365 = vmatprep.subr.bf16.mxu1 %v1681_v36  ;;  %v2070_v51 = vld [vmem:[#allocation2 + $0x32] sm:$0xff]  ;;  %v1518_v54 = vpack.i.bf16 %v2068_v49, %v450_v48  ;;  %v423_v23 = vld [vmem:[#allocation2 + $0xe0] sm:$0xff] }
  0x47   : > { %v1685_v53 = vld [vmem:[%s2384_s1 + $0x70] sm:$0xff]   ;;  %v1513_v55 = vpack.i.bf16 %v2070_v51, %v446_v50  ;;  %v1687_v60 = vld [vmem:[%s2384_s1 + $0x78] sm:$0xff]   ;;  %v1593_v27 = vpack.i.bf16 %v2007_v6, %v423_v23  ;;  %v436_v30 = vld [vmem:[#allocation2 + $0x81] sm:$0xff] }
  0x48   : > { %1444 = vrot.lane.b32.xlu0 %v1443_v61, %s1700_s21  ;;  %1449 = vrot.lane.b32.xlu1 %v1448_v62, %s1700_s21  ;;  %v2082_v56 = vld [vmem:[#allocation2 + $0x52] sm:$0xff]  ;;  %v1628_v6 = vpack.i.bf16 %v436_v30, %v2009_v9 }
  0x49   : > { %1330 = vmatpush3.bf16.msra.mxu0 %v1682_v42  ;;  %1373 = vmatpush3.bf16.msra.mxu1 %v1682_v42  ;;  %v378_v57 = vld [vmem:[#allocation2 + $0x12] sm:$0xff]  ;;  %v1528_v61 = vpack.i.bf16 %v450_v48, %v2082_v56 }
  0x4a   : > { %1331 = vmatprep.subr.bf16.mxu0 %v1683_v43  ;;  %1366 = vmatprep.subr.bf16.mxu1 %v1683_v43  ;;  %v1686_v58 = vld [vmem:[%s2384_s1 + $0x30] sm:$0xff]   ;;  %v1523_v62 = vpack.i.bf16 %v446_v50, %v378_v57  ;;  %v452_v43 = vld [vmem:[#allocation2 + $0x82] sm:$0xff] }
  0x4b   : > { %v402_v63 = vld [vmem:[#allocation2 + $0x1b1] sm:$0xff] }
  0x4c   : > { %1459 = vrot.lane.b32.xlu1 %v1458_v4, %s1701_s28  ;;  %1454 = vrot.lane.b32.xlu0 %v1453_v5, %s1701_s28  ;;  %v398_v3 = vld [vmem:[#allocation2 + $0x171] sm:$0xff]  ;;  %v1538_v5 = vpack.i.bf16 %v403_v1, %v402_v63  ;;  %v1548_v8 = vpack.i.bf16 %v402_v63, %v1940_v28  ;;  %v2163_v1 = vld [vmem:[#allocation2 + $0x200] sm:$0xff] }
  0x4d   : > { %1332 = vmatpush3.bf16.msra.mxu0 %v1684_v52  ;;  %1374 = vmatpush3.bf16.msra.mxu1 %v1684_v52  ;;  %v1688_v4 = vld [vmem:[%s2384_s1 + $0x38] sm:$0xff]   ;;  %v1533_v7 = vpack.i.bf16 %v1942_v29, %v398_v3  ;;  %v1543_v10 = vpack.i.bf16 %v398_v3, %v1934_v24  ;;  %v419_v24 = vld [vmem:[#allocation2 + $0x1c2] sm:$0xff] }
  0x4e   : > { %1333 = vmatprep.subr.bf16.mxu0 %v1685_v53  ;;  %1367 = vmatprep.subr.bf16.mxu1 %v1685_v53  ;;  %v410_v11 = vld [vmem:[#allocation2 + $0x251] sm:$0xff] }
  0x4f   : > { %v1568_v16 = vpack.i.bf16 %v410_v11, %v1950_v35  ;;  %v418_v17 = vld [vmem:[#allocation2 + $0x1b2] sm:$0xff] }
  0x50   : > { %1469 = vrot.lane.b32.xlu1 %v1468_v12, %s1701_s28  ;;  %1464 = vrot.lane.b32.xlu0 %v1463_v13, %s1701_s28  ;;  %v411_v12 = vld [vmem:[#allocation2 + $0x261] sm:$0xff]  ;;  %v406_v13 = vld [vmem:[#allocation2 + $0x211] sm:$0xff] }
  0x51   : > { %1334 = vmatpush3.bf16.msra.mxu0 %v1686_v58  ;;  %1375 = vmatpush3.bf16.msra.mxu1 %v1686_v58  ;;  %v1558_v14 = vpack.i.bf16 %v411_v12, %v410_v11  ;;  %v1553_v29 = vpack.i.bf16 %v1956_v39, %v406_v13  ;;  %v1563_v28 = vpack.i.bf16 %v406_v13, %v1948_v33  ;;  %v428_v33 = vld [vmem:[#allocation2 + $0x130] sm:$0xff] }
  0x52   : > { %1335 = vmatprep.subr.bf16.mxu0 %v1687_v60  ;;  %1368 = vmatprep.subr.bf16.mxu1 %v1687_v60  ;;  %v1588_v39 = vpack.i.bf16 %v418_v17, %v1965_v46  ;;  %v1598_v25 = vpack.i.bf16 %v428_v33, %v427_v22  ;;  %v1603_v46 = vpack.i.bf16 %v423_v23, %v1998_v2  ;;  %v445_v2 = vld [vmem:[#allocation2 + $0x131] sm:$0xff] }
  0x53   : > { %v391_v13 = vld [vmem:[#allocation2 + $0x230] sm:$0xff] }
  0x54   : > { %1479 = vrot.lane.b32.xlu1 %v1478_v18, %s1702_s14  ;;  %1474 = vrot.lane.b32.xlu0 %v1473_v19, %s1702_s14  ;;  %v414_v18 = vld [vmem:[#allocation2 + $0x172] sm:$0xff]  ;;  %v1578_v19 = vpack.i.bf16 %v419_v24, %v418_v17 }
  0x55   : > { %1336 = vmatpush3.bf16.msra.mxu0 %v1688_v4  ;;  %1376 = vmatpush3.bf16.msra.mxu1 %v1688_v4  ;;  %v1573_v21 = vpack.i.bf16 %v1987_v59, %v414_v18  ;;  %v1583_v35 = vpack.i.bf16 %v414_v18, %v1963_v44  ;;  %v1608_v59 = vpack.i.bf16 %v427_v22, %v1996_v0  ;;  %v437_v44 = vld [vmem:[#allocation2 + $0x91] sm:$0xff] }
  0x58   : > { %1489 = vrot.lane.b32.xlu1 %v1488_v31, %s1702_s14  ;;  %1484 = vrot.lane.b32.xlu0 %v1483_v32, %s1702_s14  ;;  %v432_v31 = vld [vmem:[#allocation2 + $0x41] sm:$0xff]  ;;  %v1618_v32 = vpack.i.bf16 %v437_v44, %v436_v30 }
  0x59   : > { %v1613_v36 = vpack.i.bf16 %v2032_v20, %v432_v31  ;;  %v1623_v0 = vpack.i.bf16 %v432_v31, %v2020_v15  ;;  %v453_v15 = vld [vmem:[#allocation2 + $0x92] sm:$0xff] }
  0x5c   : > { %1499 = vrot.lane.b32.xlu1 %v1498_v37, %s1703_s24  ;;  %1494 = vrot.lane.b32.xlu0 %v1493_v38, %s1703_s24  ;;  %v444_v37 = vld [vmem:[#allocation2 + $0x121] sm:$0xff] }
  0x5d   : > { %v440_v38 = vld [vmem:[#allocation2 + $0xe1] sm:$0xff]  ;;  %v1638_v41 = vpack.i.bf16 %v445_v2, %v444_v37  ;;  %v1648_v20 = vpack.i.bf16 %v444_v37, %v2040_v26 }
  0x5e   : > { %v1633_v42 = vpack.i.bf16 %v2057_v40, %v440_v38  ;;  %v1643_v9 = vpack.i.bf16 %v440_v38, %v2048_v34  ;;  %v1668_v40 = vpack.i.bf16 %v452_v43, %v2068_v49 }
  0x60   : > { %1509 = vrot.lane.b32.xlu1 %v1508_v45, %s1703_s24  ;;  %1504 = vrot.lane.b32.xlu0 %v1503_v47, %s1703_s24  ;;  %v448_v45 = vld [vmem:[#allocation2 + $0x42] sm:$0xff]  ;;  %v1658_v47 = vpack.i.bf16 %v453_v15, %v452_v43 }
  0x61   : > { %v1653_v48 = vpack.i.bf16 %v2082_v56, %v448_v45  ;;  %v1663_v26 = vpack.i.bf16 %v448_v45, %v2070_v51 }
  0x64   : > { %1519 = vrot.lane.b32.xlu1 %v1518_v54, %s1704_s7  ;;  %1514 = vrot.lane.b32.xlu0 %v1513_v55, %s1704_s7 }
  0x68   : > { %1529 = vrot.lane.b32.xlu1 %v1528_v61, %s1704_s7  ;;  %1524 = vrot.lane.b32.xlu0 %v1523_v62, %s1704_s7 }
  0x6c   : > { %1539 = vrot.lane.b32.xlu1 %v1538_v5, %s1698_s19  ;;  %1534 = vrot.lane.b32.xlu0 %v1533_v7, %s1698_s19  ;;  %v387_v7 = vld [vmem:[#allocation2 + $0x1f0] sm:$0xff] }
  0x70   : > { %1549 = vrot.lane.b32.xlu1 %v1548_v8, %s1698_s19  ;;  %1544 = vrot.lane.b32.xlu0 %v1543_v10, %s1698_s19  ;;  %v320_v8 = vld [vmem:[#allocation2 + $0x1e0] sm:$0xff]  ;;  %s1320_s19 = sshll.u32 %s2389_s13, 6 }
  0x71   : > { %s2362_s11 = scalar_lea.vmem %s2386_s3, %s1320_s19 }
  0x74   : > { %1559 = vrot.lane.b32.xlu1 %v1558_v14, %s1699_s20  ;;  %1554 = vrot.lane.b32.xlu0 %v1553_v29, %s1699_s20  ;;  %v2165_v14 = vld [vmem:[#allocation2 + $0x240] sm:$0xff] }
  0x78   : > { %1569 = vrot.lane.b32.xlu1 %v1568_v16, %s1699_s20  ;;  %1564 = vrot.lane.b32.xlu0 %v1563_v28, %s1699_s20 }
  0x7c   : > { %1579 = vrot.lane.b32.xlu1 %v1578_v19, %s1700_s21  ;;  %1574 = vrot.lane.b32.xlu0 %v1573_v21, %s1700_s21  ;;  %v2173_v19 = vld [vmem:[#allocation2 + $0x220] sm:$0xff] }
  0x80   : > { %1589 = vrot.lane.b32.xlu1 %v1588_v39, %s1700_s21  ;;  %1584 = vrot.lane.b32.xlu0 %v1583_v35, %s1700_s21 }
  0x84   : > { %1599 = vrot.lane.b32.xlu1 %v1598_v25, %s1701_s28  ;;  %1594 = vrot.lane.b32.xlu0 %v1593_v27, %s1701_s28 }
  0x88   : > { %1609 = vrot.lane.b32.xlu1 %v1608_v59, %s1701_s28  ;;  %1604 = vrot.lane.b32.xlu0 %v1603_v46, %s1701_s28 }
  0x8c   : > { %1619 = vrot.lane.b32.xlu1 %v1618_v32, %s1702_s14  ;;  %1614 = vrot.lane.b32.xlu0 %v1613_v36, %s1702_s14 }
  0x90   : > { %1629 = vrot.lane.b32.xlu1 %v1628_v6, %s1702_s14  ;;  %1624 = vrot.lane.b32.xlu0 %v1623_v0, %s1702_s14 }
  0x94   : > { %1639 = vrot.lane.b32.xlu1 %v1638_v41, %s1703_s24  ;;  %1634 = vrot.lane.b32.xlu0 %v1633_v42, %s1703_s24 }
  0x98   : > { %1649 = vrot.lane.b32.xlu1 %v1648_v20, %s1703_s24  ;;  %1644 = vrot.lane.b32.xlu0 %v1643_v9, %s1703_s24 }
  0x9c   : > { %1659 = vrot.lane.b32.xlu1 %v1658_v47, %s1704_s7  ;;  %1654 = vrot.lane.b32.xlu0 %v1653_v48, %s1704_s7 }
  0xa0   : > { %1669 = vrot.lane.b32.xlu1 %v1668_v40, %s1704_s7  ;;  %1664 = vrot.lane.b32.xlu0 %v1663_v26, %s1704_s7 }
  0xa6   : > { %v1395_v34 = vpop.permute.xlu0 %1394  ;;  %v1405_v50 = vpop.permute.xlu1 %1404 }
  0xa7   : > { %v1397_v63 = vunpack.i.h.bf16 %v1395_v34  ;;  %v1396_v3 = vunpack.i.l.bf16 %v1395_v34  ;;  %v1407_v4 = vunpack.i.h.bf16 %v1405_v50  ;;  %v1406_v5 = vunpack.i.l.bf16 %v1405_v50 }
  0xa9   : > { %v965_v18 = vsel %vm172_vm0, %v2163_v1, %v1397_v63  ;;  %v964_v21 = vsel %vm172_vm0, %v387_v7, %v1396_v3  ;;  %v903_v39 = vsel %vm172_vm0, %v387_v7, %v1407_v4  ;;  %v902_v35 = vsel %vm172_vm0, %v320_v8, %v1406_v5 }
  0xaa   : > { %v1400_v52 = vpop.permute.xlu0 %1399  ;;  %v1410_v53 = vpop.permute.xlu1 %1409 }
  0xab   : > { %v1402_v10 = vunpack.i.h.bf16 %v1400_v52  ;;  %v1401_v11 = vunpack.i.l.bf16 %v1400_v52  ;;  %v1412_v12 = vunpack.i.h.bf16 %v1410_v53  ;;  %v1411_v29 = vunpack.i.l.bf16 %v1410_v53 }
  0xad   : > { %v969_v33 = vsel %vm172_vm0, %v2165_v14, %v1402_v10  ;;  %v968_v23 = vsel %vm172_vm0, %v391_v13, %v1401_v11  ;;  %v907_v25 = vsel %vm172_vm0, %v391_v13, %v1412_v12  ;;  %v906_v59 = vsel %vm172_vm0, %v2173_v19, %v1411_v29 }
  0xae   : > { %v1415_v54 = vpop.permute.xlu0 %1414  ;;  %v1420_v55 = vpop.permute.xlu1 %1419 }
  0xaf   : > { %v1417_v16 = vunpack.i.h.bf16 %v1415_v54  ;;  %v1416_v28 = vunpack.i.l.bf16 %v1415_v54  ;;  %v1422_v22 = vunpack.i.h.bf16 %v1420_v55  ;;  %v1421_v27 = vunpack.i.l.bf16 %v1420_v55 }
  0xb1   : > { %v972_v46 = vsel %vm910_vm2, %v964_v21, %v1416_v28  ;;  %v973_v30 = vsel %vm910_vm2, %v965_v18, %v1417_v16  ;;  %v977_v2 = vsel %vm910_vm2, %v969_v33, %v1422_v22  ;;  %v976_v20 = vsel %vm910_vm2, %v968_v23, %v1421_v27 }
  0xb2   : > { %v2147_v57 = vpop.permute.xlu0 %1424  ;;  %v2149_v56 = vpop.permute.xlu1 %1429 }
  0xb3   : > { %v1426_v44 = vunpack.i.l.bf16 %v2147_v57  ;;  %v1427_v36 = vunpack.i.h.bf16 %v2147_v57  ;;  %v1432_v6 = vunpack.i.h.bf16 %v2149_v56  ;;  %v1431_v0 = vunpack.i.l.bf16 %v2149_v56 }
  0xb5   : > { %v911_v45 = vsel %vm910_vm2, %v902_v35, %v1426_v44  ;;  %v912_v50 = vsel %vm910_vm2, %v903_v39, %v1427_v36  ;;  %v915_v52 = vsel %vm910_vm2, %v906_v59, %v1431_v0  ;;  %v916_v53 = vsel %vm910_vm2, %v907_v25, %v1432_v6 }
  0xb6   : > { %v2151_v58 = vpop.permute.xlu0 %1434  ;;  %v2153_v60 = vpop.permute.xlu1 %1439 }
  0xb7   : > { %v1436_v37 = vunpack.i.l.bf16 %v2151_v58  ;;  %v1437_v38 = vunpack.i.h.bf16 %v2151_v58  ;;  %v1442_v41 = vunpack.i.h.bf16 %v2153_v60  ;;  %v1441_v42 = vunpack.i.l.bf16 %v2153_v60 }
  0xb9   : > { %v980_v54 = vsel %vm919_vm3, %v972_v46, %v1436_v37  ;;  %v981_v55 = vsel %vm919_vm3, %v973_v30, %v1437_v38  ;;  %v984_v57 = vsel %vm919_vm3, %v976_v20, %v1441_v42  ;;  %v985_v56 = vsel %vm919_vm3, %v977_v2, %v1442_v41 }
  0xba   : > { %v2155_v49 = vpop.permute.xlu0 %1444  ;;  %v2157_v51 = vpop.permute.xlu1 %1449 }
  0xbb   : > { %v1447_v9 = vunpack.i.h.bf16 %v2155_v49  ;;  %v1446_v43 = vunpack.i.l.bf16 %v2155_v49  ;;  %v1451_v15 = vunpack.i.l.bf16 %v2157_v51  ;;  %v1452_v47 = vunpack.i.h.bf16 %v2157_v51 }
  0xbd   : > { %v920_v60 = vsel %vm919_vm3, %v911_v45, %v1446_v43  ;;  %v921_v49 = vsel %vm919_vm3, %v912_v50, %v1447_v9  ;;  %v924_v51 = vsel %vm919_vm3, %v915_v52, %v1451_v15  ;;  %v925_v63 = vsel %vm919_vm3, %v916_v53, %v1452_v47 }
  0xbe   : > { %v2159_v61 = vpop.permute.xlu1 %1459  ;;  %v2161_v62 = vpop.permute.xlu0 %1454 }
  0xbf   : > { %v1462_v48 = vunpack.i.h.bf16 %v2159_v61  ;;  %v1461_v40 = vunpack.i.l.bf16 %v2159_v61  ;;  %v1457_v58 = vunpack.i.h.bf16 %v2161_v62  ;;  %v1456_v61 = vunpack.i.l.bf16 %v2161_v62 }
  0xc1   : > { %v993_v3 = vsel %vm928_vm4, %v985_v56, %v1462_v48  ;;  %v992_v4 = vsel %vm928_vm4, %v984_v57, %v1461_v40  ;;  %v989_v62 = vsel %vm928_vm4, %v981_v55, %v1457_v58  ;;  %v988_v18 = vsel %vm928_vm4, %v980_v54, %v1456_v61 }
  0xc2   : > { %v2167_v17 = vpop.permute.xlu1 %1469  ;;  %v2169_v24 = vpop.permute.xlu0 %1464 }
  0xc3   : > { %v1472_v5 = vunpack.i.h.bf16 %v2167_v17  ;;  %v1471_v10 = vunpack.i.l.bf16 %v2167_v17  ;;  %v1467_v11 = vunpack.i.h.bf16 %v2169_v24  ;;  %v1466_v12 = vunpack.i.l.bf16 %v2169_v24 }
  0xc5   : > { %v934_v35 = vsel %vm928_vm4, %v925_v63, %v1472_v5  ;;  %v933_v27 = vsel %vm928_vm4, %v924_v51, %v1471_v10  ;;  %v930_v59 = vsel %vm928_vm4, %v921_v49, %v1467_v11  ;;  %v929_v46 = vsel %vm928_vm4, %v920_v60, %v1466_v12 }
  0xc6   : > { %v2187_v31 = vpop.permute.xlu1 %1479  ;;  %v2189_v32 = vpop.permute.xlu0 %1474 }
  0xc7   : > { %v1476_v13 = vunpack.i.l.bf16 %v2189_v32  ;;  %v1482_v29 = vunpack.i.h.bf16 %v2187_v31  ;;  %v1481_v16 = vunpack.i.l.bf16 %v2187_v31  ;;  %v1477_v28 = vunpack.i.h.bf16 %v2189_v32 }
  0xc9   : > { %v996_v30 = vsel %vm937_vm5, %v988_v18, %v1476_v13  ;;  %v997_v31 = vsel %vm937_vm5, %v989_v62, %v1477_v28  ;;  %v1000_v32 = vsel %vm937_vm5, %v992_v4, %v1481_v16  ;;  %v1001_v36 = vsel %vm937_vm5, %v993_v3, %v1482_v29 }
  0xca   : > { %v1490_v26 = vpop.permute.xlu1 %1489  ;;  %v2207_v34 = vpop.permute.xlu0 %1484 }
  0xcb   : > { %v1492_v21 = vunpack.i.h.bf16 %v1490_v26  ;;  %v1491_v39 = vunpack.i.l.bf16 %v1490_v26  ;;  %v1487_v17 = vunpack.i.h.bf16 %v2207_v34  ;;  %v1486_v2 = vunpack.i.l.bf16 %v2207_v34 }
  0xcd   : > { %v943_v6 = vsel %vm937_vm5, %v934_v35, %v1492_v21  ;;  %v942_v0 = vsel %vm937_vm5, %v933_v27, %v1491_v39  ;;  %v939_v37 = vsel %vm937_vm5, %v930_v59, %v1487_v17  ;;  %v938_v57 = vsel %vm937_vm5, %v929_v46, %v1486_v2 }
  0xce   : > { %v1500_v7 = vpop.permute.xlu1 %1499  ;;  %v1495_v8 = vpop.permute.xlu0 %1494 }
  0xcf   : > { %v1501_v22 = vunpack.i.l.bf16 %v1500_v7  ;;  %v1497_v24 = vunpack.i.h.bf16 %v1495_v8  ;;  %v1496_v33 = vunpack.i.l.bf16 %v1495_v8  ;;  %v1502_v44 = vunpack.i.h.bf16 %v1500_v7 }
  0xd1   : > { %v1004_v20 = vsel %vm946_vm6, %v996_v30, %v1496_v33  ;;  %v1005_v9 = vsel %vm946_vm6, %v997_v31, %v1497_v24  ;;  %v1008_v43 = vsel %vm946_vm6, %v1000_v32, %v1501_v22  ;;  %v1009_v52 = vsel %vm946_vm6, %v1001_v36, %v1502_v44  ;;  %v394_v30 = vld [vmem:[#allocation2 + $0x260] sm:$0xff]  ;;  %v393_v36 = vld [vmem:[#allocation2 + $0x250] sm:$0xff] }
  0xd2   : > { %v1510_v23 = vpop.permute.xlu1 %1509  ;;  %v1505_v25 = vpop.permute.xlu0 %1504 }
  0xd3   : > { %v1511_v38 = vunpack.i.l.bf16 %v1510_v23  ;;  %v1512_v40 = vunpack.i.h.bf16 %v1510_v23  ;;  %v1507_v26 = vunpack.i.h.bf16 %v1505_v25  ;;  %v1506_v50 = vunpack.i.l.bf16 %v1505_v25 }
  0xd5   : > { %v951_v56 = vsel %vm946_vm6, %v942_v0, %v1511_v38  ;;  %v952_v5 = vsel %vm946_vm6, %v943_v6, %v1512_v40  ;;  %v947_v7 = vsel %vm946_vm6, %v938_v57, %v1506_v50  ;;  %v948_v8 = vsel %vm946_vm6, %v939_v37, %v1507_v26  ;;  %v389_v6 = vld [vmem:[#allocation2 + $0x210] sm:$0xff] }
  0xd6   : > { %v1520_v41 = vpop.permute.xlu1 %1519  ;;  %v1515_v42 = vpop.permute.xlu0 %1514 }
  0xd7   : > { %v1522_v15 = vunpack.i.h.bf16 %v1520_v41  ;;  %v1521_v45 = vunpack.i.l.bf16 %v1520_v41  ;;  %v1517_v47 = vunpack.i.h.bf16 %v1515_v42  ;;  %v1516_v48 = vunpack.i.l.bf16 %v1515_v42 }
  0xd9   : > { %v1012_v34 = vsel %vm955_vm7, %v1004_v20, %v1516_v48  ;;  %v1013_v53 = vsel %vm955_vm7, %v1005_v9, %v1517_v47  ;;  %v1016_v54 = vsel %vm955_vm7, %v1008_v43, %v1521_v45  ;;  %v1017_v55 = vsel %vm955_vm7, %v1009_v52, %v1522_v15 }
  0xda   : > { %v1530_v58 = vpop.permute.xlu1 %1529  ;;  %v1525_v60 = vpop.permute.xlu0 %1524  ;;  %v1021_v49 = vpack.c.bf16 %v1013_v53, %v1012_v34  ;;  %v1025_v51 = vpack.c.bf16 %v1017_v55, %v1016_v54 }
  0xdb   : > { %v1532_v61 = vunpack.i.h.bf16 %v1530_v58  ;;  %v1531_v63 = vunpack.i.l.bf16 %v1530_v58  ;;  %v1527_v3 = vunpack.i.h.bf16 %v1525_v60  ;;  %v1526_v4 = vunpack.i.l.bf16 %v1525_v60 }
  0xdc   : > { %1195 = vmatprep.mubr.bf16.mxu0 %v1021_v49  ;;  %1211 = vmatprep.mubr.bf16.mxu1 %v1025_v51 }
  0xdd   : > { %v956_v10 = vsel %vm955_vm7, %v947_v7, %v1526_v4  ;;  %v957_v11 = vsel %vm955_vm7, %v948_v8, %v1527_v3  ;;  %v960_v12 = vsel %vm955_vm7, %v951_v56, %v1531_v63  ;;  %v961_v13 = vsel %vm955_vm7, %v952_v5, %v1532_v61 }
  0xde   : > { %v1540_v62 = vpop.permute.xlu1 %1539  ;;  %v1535_v29 = vpop.permute.xlu0 %1534  ;;  %v1020_v16 = vpack.c.bf16 %v957_v11, %v956_v10  ;;  %v1024_v28 = vpack.c.bf16 %v961_v13, %v960_v12 }
  0xdf   : > { %v1542_v46 = vunpack.i.h.bf16 %v1540_v62  ;;  %v1541_v44 = vunpack.i.l.bf16 %v1540_v62  ;;  %v1537_v31 = vunpack.i.h.bf16 %v1535_v29  ;;  %v1536_v32 = vunpack.i.l.bf16 %v1535_v29 }
  0xe0   : > { %1196 = vmatmul.mubr.bf16.vlgmr.msra.gmra.mrb[0].mxu0 %v1020_v16  ;;  %1212 = vmatmul.mubr.bf16.vlgmr.msra.gmra.mrb[0].mxu1 %v1024_v28 }
  0xe1   : > { %v971_v43 = vsel %vm172_vm0, %v394_v30, %v1542_v46  ;;  %v970_v15 = vsel %vm172_vm0, %v393_v36, %v1541_v44  ;;  %v967_v45 = vsel %vm172_vm0, %v2173_v19, %v1537_v31  ;;  %v966_v47 = vsel %vm172_vm0, %v389_v6, %v1536_v32 }
  0xe2   : > { %v1550_v18 = vpop.permute.xlu1 %1549  ;;  %v1545_v21 = vpop.permute.xlu0 %1544 }
  0xe3   : > { %v1552_v0 = vunpack.i.h.bf16 %v1550_v18  ;;  %v1551_v37 = vunpack.i.l.bf16 %v1550_v18  ;;  %v1547_v2 = vunpack.i.h.bf16 %v1545_v21  ;;  %v1546_v38 = vunpack.i.l.bf16 %v1545_v21 }
  0xe5   : > { %v909_v40 = vsel %vm172_vm0, %v393_v36, %v1552_v0  ;;  %v908_v26 = vsel %vm172_vm0, %v2165_v14, %v1551_v37  ;;  %v905_v50 = vsel %vm172_vm0, %v389_v6, %v1547_v2  ;;  %v904_v34 = vsel %vm172_vm0, %v2163_v1, %v1546_v38 }
  0xe6   : > { %v1560_v39 = vpop.permute.xlu1 %1559  ;;  %v1555_v17 = vpop.permute.xlu0 %1554 }
  0xe7   : > { %v1562_v41 = vunpack.i.h.bf16 %v1560_v39  ;;  %v1561_v42 = vunpack.i.l.bf16 %v1560_v39  ;;  %v1556_v48 = vunpack.i.l.bf16 %v1555_v17  ;;  %v1557_v52 = vunpack.i.h.bf16 %v1555_v17 }
  0xe9   : > { %v978_v53 = vsel %vm910_vm2, %v970_v15, %v1561_v42  ;;  %v979_v54 = vsel %vm910_vm2, %v971_v43, %v1562_v41  ;;  %v974_v14 = vsel %vm910_vm2, %v966_v47, %v1556_v48  ;;  %v975_v3 = vsel %vm910_vm2, %v967_v45, %v1557_v52 }
  0xea   : > { %v1570_v35 = vpop.permute.xlu1 %1569  ;;  %v1565_v22 = vpop.permute.xlu0 %1564 }
  0xeb   : > { %v1571_v55 = vunpack.i.l.bf16 %v1570_v35  ;;  %v1572_v56 = vunpack.i.h.bf16 %v1570_v35  ;;  %v1567_v58 = vunpack.i.h.bf16 %v1565_v22  ;;  %v1566_v60 = vunpack.i.l.bf16 %v1565_v22 }
  0xed   : > { %v917_v7 = vsel %vm910_vm2, %v908_v26, %v1571_v55  ;;  %v918_v62 = vsel %vm910_vm2, %v909_v40, %v1572_v56  ;;  %v913_v29 = vsel %vm910_vm2, %v904_v34, %v1566_v60  ;;  %v914_v16 = vsel %vm910_vm2, %v905_v50, %v1567_v58 }
  0xee   : > { %v1580_v24 = vpop.permute.xlu1 %1579  ;;  %v1575_v33 = vpop.permute.xlu0 %1574 }
  0xef   : > { %v1581_v49 = vunpack.i.l.bf16 %v1580_v24  ;;  %v1582_v51 = vunpack.i.h.bf16 %v1580_v24  ;;  %v1577_v61 = vunpack.i.h.bf16 %v1575_v33  ;;  %v1576_v63 = vunpack.i.l.bf16 %v1575_v33 }
  0xf1   : > { %v986_v28 = vsel %vm919_vm3, %v978_v53, %v1581_v49  ;;  %v987_v18 = vsel %vm919_vm3, %v979_v54, %v1582_v51  ;;  %v982_v21 = vsel %vm919_vm3, %v974_v14, %v1576_v63  ;;  %v983_v39 = vsel %vm919_vm3, %v975_v3, %v1577_v61 }
  0xf2   : > { %v2264_v23 = vpop.permute.xlu1 %1589  ;;  %v2266_v25 = vpop.permute.xlu0 %1584 }
  0xf3   : > { %v1592_v1 = vunpack.i.h.bf16 %v2264_v23  ;;  %v1591_v4 = vunpack.i.l.bf16 %v2264_v23  ;;  %v1586_v5 = vunpack.i.l.bf16 %v2266_v25  ;;  %v1587_v8 = vunpack.i.h.bf16 %v2266_v25 }
  0xf5   : > { %v926_v35 = vsel %vm919_vm3, %v917_v7, %v1591_v4  ;;  %v927_v22 = vsel %vm919_vm3, %v918_v62, %v1592_v1  ;;  %v922_v24 = vsel %vm919_vm3, %v913_v29, %v1586_v5  ;;  %v923_v23 = vsel %vm919_vm3, %v914_v16, %v1587_v8 }
  0xf6   : > { %v2268_v27 = vpop.permute.xlu1 %1599  ;;  %v2270_v59 = vpop.permute.xlu0 %1594 }
  0xf7   : > { %v1602_v10 = vunpack.i.h.bf16 %v2268_v27  ;;  %v1601_v11 = vunpack.i.l.bf16 %v2268_v27  ;;  %v1596_v17 = vunpack.i.l.bf16 %v2270_v59  ;;  %v1597_v33 = vunpack.i.h.bf16 %v2270_v59 }
  0xf9   : > { %v994_v25 = vsel %vm928_vm4, %v986_v28, %v1601_v11  ;;  %v995_v27 = vsel %vm928_vm4, %v987_v18, %v1602_v10  ;;  %v990_v0 = vsel %vm928_vm4, %v982_v21, %v1596_v17  ;;  %v991_v38 = vsel %vm928_vm4, %v983_v39, %v1597_v33 }
  0xfa   : > { %v2272_v20 = vpop.permute.xlu1 %1609  ;;  %v2274_v9 = vpop.permute.xlu0 %1604 }
  0xfb   : > { %v1611_v46 = vunpack.i.l.bf16 %v2272_v20  ;;  %v1612_v31 = vunpack.i.h.bf16 %v2272_v20  ;;  %v1607_v32 = vunpack.i.h.bf16 %v2274_v9  ;;  %v1606_v36 = vunpack.i.l.bf16 %v2274_v9 }
  0xfd   : > { %v935_v20 = vsel %vm928_vm4, %v926_v35, %v1611_v46  ;;  %v936_v40 = vsel %vm928_vm4, %v927_v22, %v1612_v31  ;;  %v931_v26 = vsel %vm928_vm4, %v922_v24, %v1606_v36  ;;  %v932_v50 = vsel %vm928_vm4, %v923_v23, %v1607_v32 }
  0xfe   : > { %v1620_v19 = vpop.permute.xlu1 %1619  ;;  %v2289_v57 = vpop.permute.xlu0 %1614 }
  0xff   : > { %v1621_v6 = vunpack.i.l.bf16 %v1620_v19  ;;  %v1622_v59 = vunpack.i.h.bf16 %v1620_v19  ;;  %v1617_v37 = vunpack.i.h.bf16 %v2289_v57  ;;  %v1616_v2 = vunpack.i.l.bf16 %v2289_v57 }
 0x101   : > { %v1002_v52 = vsel %vm937_vm5, %v994_v25, %v1621_v6  ;;  %v1003_v34 = vsel %vm937_vm5, %v995_v27, %v1622_v59  ;;  %v998_v53 = vsel %vm937_vm5, %v990_v0, %v1616_v2  ;;  %v999_v54 = vsel %vm937_vm5, %v991_v38, %v1617_v37  ;;  %v1300_v59 = vld [vmem:[%s2385_s2] ss:$0 sm:$0xff] }
 0x102   : > { %v1630_v12 = vpop.permute.xlu1 %1629  ;;  %v2300_v13 = vpop.permute.xlu0 %1624 }
 0x103   : > { %v1632_v41 = vunpack.i.h.bf16 %v1630_v12  ;;  %v1631_v42 = vunpack.i.l.bf16 %v1630_v12  ;;  %v1626_v43 = vunpack.i.l.bf16 %v2300_v13  ;;  %v1627_v56 = vunpack.i.h.bf16 %v2300_v13 }
 0x105   : > { %v944_v19 = vsel %vm937_vm5, %v935_v20, %v1631_v42  ;;  %v945_v57 = vsel %vm937_vm5, %v936_v40, %v1632_v41  ;;  %v940_v58 = vsel %vm937_vm5, %v931_v26, %v1626_v43  ;;  %v941_v16 = vsel %vm937_vm5, %v932_v50, %v1627_v56 }
 0x106   : > { %v1640_v30 = vpop.permute.xlu1 %1639  ;;  %v1635_v44 = vpop.permute.xlu0 %1634 }
 0x107   : > { %v1642_v15 = vunpack.i.h.bf16 %v1640_v30  ;;  %v1641_v45 = vunpack.i.l.bf16 %v1640_v30  ;;  %v1636_v47 = vunpack.i.l.bf16 %v1635_v44  ;;  %v1637_v55 = vunpack.i.h.bf16 %v1635_v44 }
 0x109   : > { %v1010_v60 = vsel %vm946_vm6, %v1002_v52, %v1641_v45  ;;  %v1011_v49 = vsel %vm946_vm6, %v1003_v34, %v1642_v15  ;;  %v1006_v14 = vsel %vm946_vm6, %v998_v53, %v1636_v47  ;;  %v1007_v7 = vsel %vm946_vm6, %v999_v54, %v1637_v55 }
 0x10a   : > { %v1650_v9 = vpop.permute.xlu1 %1649  ;;  %v1645_v48 = vpop.permute.xlu0 %1644 }
 0x10b   : > { %v1651_v51 = vunpack.i.l.bf16 %v1650_v9  ;;  %v1652_v8 = vunpack.i.h.bf16 %v1650_v9  ;;  %v1647_v10 = vunpack.i.h.bf16 %v1645_v48  ;;  %v1646_v11 = vunpack.i.l.bf16 %v1645_v48 }
 0x10d   : > { %v953_v28 = vsel %vm946_vm6, %v944_v19, %v1651_v51  ;;  %v954_v23 = vsel %vm946_vm6, %v945_v57, %v1652_v8  ;;  %v949_v25 = vsel %vm946_vm6, %v940_v58, %v1646_v11  ;;  %v950_v27 = vsel %vm946_vm6, %v941_v16, %v1647_v10 }
 0x10e   : > { %v1660_v61 = vpop.permute.xlu1 %1659  ;;  %v1655_v63 = vpop.permute.xlu0 %1654 }
 0x10f   : > { %v1662_v3 = vunpack.i.h.bf16 %v1660_v61  ;;  %v1661_v1 = vunpack.i.l.bf16 %v1660_v61  ;;  %v1657_v4 = vunpack.i.h.bf16 %v1655_v63  ;;  %v1656_v5 = vunpack.i.l.bf16 %v1655_v63 }
 0x111   : > { %v1014_v12 = vsel %vm955_vm7, %v1006_v14, %v1656_v5  ;;  %v1015_v13 = vsel %vm955_vm7, %v1007_v7, %v1657_v4  ;;  %v1018_v62 = vsel %vm955_vm7, %v1010_v60, %v1661_v1  ;;  %v1019_v29 = vsel %vm955_vm7, %v1011_v49, %v1662_v3 }
 0x112   : > { %v1670_v18 = vpop.permute.xlu1 %1669  ;;  %v1665_v21 = vpop.permute.xlu0 %1664  ;;  %v1023_v39 = vpack.c.bf16 %v1015_v13, %v1014_v12  ;;  %v1027_v17 = vpack.c.bf16 %v1019_v29, %v1018_v62 }
 0x113   : > { %v1672_v35 = vunpack.i.h.bf16 %v1670_v18  ;;  %v1671_v22 = vunpack.i.l.bf16 %v1670_v18  ;;  %v1667_v24 = vunpack.i.h.bf16 %v1665_v21  ;;  %v1666_v33 = vunpack.i.l.bf16 %v1665_v21 }
 0x114   : > { %1203 = vmatprep.mubr.bf16.mxu0 %v1023_v39  ;;  %1219 = vmatprep.mubr.bf16.mxu1 %v1027_v17 }
 0x115   : > { %v958_v46 = vsel %vm955_vm7, %v949_v25, %v1666_v33  ;;  %v959_v30 = vsel %vm955_vm7, %v950_v27, %v1667_v24  ;;  %v962_v44 = vsel %vm955_vm7, %v953_v28, %v1671_v22  ;;  %v963_v31 = vsel %vm955_vm7, %v954_v23, %v1672_v35 }
 0x116   : > { %v1022_v32 = vpack.c.bf16 %v959_v30, %v958_v46  ;;  %v1026_v36 = vpack.c.bf16 %v963_v31, %v962_v44 }
 0x118   : > { %1204 = vmatmul.mubr.bf16.gmra.mrb[4].mxu0 %v1022_v32  ;;  %1220 = vmatmul.mubr.bf16.gmra.mrb[4].mxu1 %v1026_v36 }
 0x1b3   : > { %v1337_v6 = vpop.f32.mrb[0].mxu0  ;;  %v1349_v0 = vpop.f32.mrb[0].mxu1 }
 0x1b4   : > { %v1338_v37 = vpop.f32.mrb[1].mxu0  ;;  %v1350_v2 = vpop.f32.mrb[1].mxu1 }
 0x1b5   : > { %v1339_v38 = vadd.f32 %v1338_v37, %v1337_v6  ;;  %v1351_v41 = vadd.f32 %v1350_v2, %v1349_v0  ;;  %v1340_v42 = vpop.f32.mrb[2].mxu0  ;;  %v1352_v43 = vpop.f32.mrb[2].mxu1 }
 0x1b6   : > { %v1341_v20 = vpop.f32.mrb[3].mxu0  ;;  %v1353_v15 = vpop.f32.mrb[3].mxu1 }
 0x1b7   : > { %v1198_v45 = vadd.f32 %v1339_v38, %v1300_v59  ;;  %v1214_v47 = vadd.f32 %v1351_v41, %v1300_v59  ;;  %v1342_v9 = vadd.f32 %v1341_v20, %v1340_v42  ;;  %v1354_v48 = vadd.f32 %v1353_v15, %v1352_v43 }
 0x1b9   : > { %1228 = vst.msk [vmem:[%s2362_s11] sm:$0xff] %vm172_vm0, %v1198_v45  ;;  %1232 = vst.msk [vmem:[%s2362_s11 + $0x20] sm:$0xff] %vm172_vm0, %v1214_v47  ;;  %v1201_v40 = vadd.f32 %v1342_v9, %v1300_v59  ;;  %v1217_v26 = vadd.f32 %v1354_v48, %v1300_v59 }
 0x1bb   : > { %1229 = vst.msk [vmem:[%s2362_s11 + $0x8] sm:$0xff] %vm172_vm0, %v1201_v40  ;;  %1233 = vst.msk [vmem:[%s2362_s11 + $0x28] sm:$0xff] %vm172_vm0, %v1217_v26 }
 0x1eb   : > { %v1343_v50 = vpop.f32.mrb[4].mxu0  ;;  %v1355_v52 = vpop.f32.mrb[4].mxu1 }
 0x1ec   : > { %v1344_v34 = vpop.f32.mrb[5].mxu0  ;;  %v1356_v53 = vpop.f32.mrb[5].mxu1 }
 0x1ed   : > { %v1345_v54 = vadd.f32 %v1344_v34, %v1343_v50  ;;  %v1357_v55 = vadd.f32 %v1356_v53, %v1355_v52  ;;  %v1346_v19 = vpop.f32.mrb[6].mxu0  ;;  %v1358_v57 = vpop.f32.mrb[6].mxu1 }
 0x1ee   : > { %v1347_v56 = vpop.f32.mrb[7].mxu0  ;;  %v1359_v58 = vpop.f32.mrb[7].mxu1 }
 0x1ef   : > { %v1206_v60 = vadd.f32 %v1345_v54, %v1300_v59  ;;  %v1222_v49 = vadd.f32 %v1357_v55, %v1300_v59  ;;  %v1348_v14 = vadd.f32 %v1347_v56, %v1346_v19  ;;  %v1360_v51 = vadd.f32 %v1359_v58, %v1358_v57 }
 0x1f1   : > { %1230 = vst.msk [vmem:[%s2362_s11 + $0x10] sm:$0xff] %vm172_vm0, %v1206_v60  ;;  %1234 = vst.msk [vmem:[%s2362_s11 + $0x30] sm:$0xff] %vm172_vm0, %v1222_v49  ;;  %v1209_v61 = vadd.f32 %v1348_v14, %v1300_v59  ;;  %v1225_v63 = vadd.f32 %v1360_v51, %v1300_v59 }
 0x1f3   : > { %1231 = vst.msk [vmem:[%s2362_s11 + $0x18] sm:$0xff] %vm172_vm0, %v1209_v61  ;;  %1235 = vst.msk [vmem:[%s2362_s11 + $0x38] sm:$0xff] %vm172_vm0, %v1225_v63 }
 0x1f4 PF: > { %s13_s12 = sadd.s32 1, %s1695_s12  }
 0x1f5   : > { %p10_p4 = scmp.ge.s32.totalorder %s13_s12, 4  }
 0x1f7   :  { %12 = sbr.rel (!%p10_p4) target bundleno = 1 (0x1), region = 70 }

// kernel: _lambda_.7
= control target key start
LH: loop header
LB: loop body
LE: loop exit
PB: predicated region body
PF: predicated region fallthrough
CT: control target
= control target key end

     0   :  { %s1071_s12 = smov 0   ;;  %s1331_s0 = inlined_call_operand.vmem [shape: f32[2,16,64], index: 0, kind: input, shape index: {}]   ;;  %s1332_s1 = inlined_call_operand.vmem [shape: bf16[144,64], index: 1, kind: input, shape index: {}]   ;;  %s1333_s2 = inlined_call_operand.vmem [shape: f32[1,64], index: 2, kind: input, shape index: {}]   ;;  %s1334_s3 = inlined_call_operand.vmem [shape: f32[2,64,64], index: 3, kind: output, shape index: {}]  }
   0x1 LB: > { %s823_s13 = sadd.s32 4294967295, %s1040_s12   ;;  %p827_p0 = scmp.ge.s32.totalorder %s1040_s12, 1  ;;  %s1040_s12 = sphi %s1071_s12, %s13_s12  }
   0x2   : > { %p137_p1 = scmp.lt.s32.totalorder %s1040_s12, 3 }
   0x4   : > { %p138_p2 = pnand %p827_p0, %p137_p1 }
   0x5   : > { %p1079_p3 = scmp.lt.s32.totalorder (!%p138_p2), %s823_s13, 1  ;;  %vm206_vm0 = vcmask (!%p138_p2), 130048   ;;  %vm208_vm1 = vcmask (!%p138_p2), 123904   ;;  %v1042_v0 = vmov (!%p138_p2), 0.0   ;;  %v1025_v3 = vld [vmem:[%s1332_s1] sm:$0xff] (!%p138_p2)   ;;  %v1043_v4 = vmov (!%p138_p2), 0  }
   0x6   : > { %141 = sbr.rel (%p138_p2) target bundleno = 582 (0x246), region = 32  ;;  %210 = vst.msk [vmem:[#allocation2 + $0x10] sm:$0xff] (!%p138_p2), %vm206_vm0, %v1042_v0  ;;  %207 = vst.msk [vmem:[#allocation2] sm:$0xff] (!%p138_p2), %vm206_vm0, %v1042_v0  ;;  %695 = vmatprep.subr.bf16.mxu0 (!%p138_p2), %v1043_v4  ;;  %850 = vmatprep.subr.bf16.mxu1 (!%p138_p2), %v1043_v4  ;;  %v1026_v5 = vld [vmem:[%s1332_s1 + $0x8] sm:$0xff] (!%p138_p2)   ;;  %v1027_v6 = vld [vmem:[%s1332_s1 + $0x10] sm:$0xff] (!%p138_p2)   ;;  %s1044_s6 = smov (!%p138_p2), 32  }
   0x7   : > { %211 = vst.msk [vmem:[#allocation2 + $0x18] sm:$0x3] (!%p138_p2), %vm208_vm1, %v1042_v0  ;;  %209 = vst.msk [vmem:[#allocation2 + $0x8] sm:$0x3] (!%p138_p2), %vm208_vm1, %v1042_v0  ;;  %696 = vmatpush1.bf16.msra.mxu0 (!%p138_p2), %v1025_v3  ;;  %859 = vmatpush1.bf16.msra.mxu1 (!%p138_p2), %v1025_v3  ;;  %v1028_v7 = vld [vmem:[%s1332_s1 + $0x18] sm:$0xff] (!%p138_p2)   ;;  %v1029_v9 = vld [vmem:[%s1332_s1 + $0x20] sm:$0xff] (!%p138_p2)  }
   0x8   : > { %212 = vst.msk [vmem:[#allocation2 + $0x20] sm:$0xff] (!%p138_p2), %vm206_vm0, %v1042_v0  ;;  %214 = vst.msk [vmem:[#allocation2 + $0x30] sm:$0xff] (!%p138_p2), %vm206_vm0, %v1042_v0  ;;  %697 = vmatprep.subr.bf16.mxu0 (!%p138_p2), %v1043_v4  ;;  %851 = vmatprep.subr.bf16.mxu1 (!%p138_p2), %v1043_v4  ;;  %v1030_v13 = vld [vmem:[%s1332_s1 + $0x28] sm:$0xff] (!%p138_p2)   ;;  %v1031_v19 = vld [vmem:[%s1332_s1 + $0x30] sm:$0xff] (!%p138_p2)   ;;  %s1045_s7 = smov (!%p138_p2), 16   ;;  %s1046_s10 = smov (!%p138_p2), 48  }
   0x9   : > { %213 = vst.msk [vmem:[#allocation2 + $0x28] sm:$0x3] (!%p138_p2), %vm208_vm1, %v1042_v0  ;;  %215 = vst.msk [vmem:[#allocation2 + $0x38] sm:$0x3] (!%p138_p2), %vm208_vm1, %v1042_v0  ;;  %v1032_v25 = vld [vmem:[%s1332_s1 + $0x38] sm:$0xff] (!%p138_p2)   ;;  %v1033_v31 = vld [vmem:[%s1332_s1 + $0x40] sm:$0xff] (!%p138_p2)  }
   0xa   : > { %216 = vst.msk [vmem:[#allocation2 + $0x40] sm:$0xff] (!%p138_p2), %vm206_vm0, %v1042_v0  ;;  %218 = vst.msk [vmem:[#allocation2 + $0x50] sm:$0xff] (!%p138_p2), %vm206_vm0, %v1042_v0  ;;  %s1048_s16 = smov (!%p138_p2), 80   ;;  %s1049_s17 = smov (!%p138_p2), 96   ;;  %vm542_vm2 = vcmask (!%p138_p2), 261120   ;;  %vm551_vm3 = vcmask (!%p138_p2), 392192  }
   0xb   : > { %217 = vst.msk [vmem:[#allocation2 + $0x48] sm:$0x3] (!%p138_p2), %vm208_vm1, %v1042_v0  ;;  %219 = vst.msk [vmem:[#allocation2 + $0x58] sm:$0x3] (!%p138_p2), %vm208_vm1, %v1042_v0  ;;  %698 = vmatpush1.bf16.msra.mxu0 (!%p138_p2), %v1026_v5  ;;  %860 = vmatpush1.bf16.msra.mxu1 (!%p138_p2), %v1026_v5  ;;  %vm560_vm4 = vcmask (!%p138_p2), 523264   ;;  %vm569_vm5 = vcmask (!%p138_p2), 654336  }
   0xc   : > { %220 = vst.msk [vmem:[#allocation2 + $0x60] sm:$0xff] (!%p138_p2), %vm206_vm0, %v1042_v0  ;;  %222 = vst.msk [vmem:[#allocation2 + $0x70] sm:$0xff] (!%p138_p2), %vm206_vm0, %v1042_v0  ;;  %699 = vmatprep.subr.bf16.mxu0 (!%p138_p2), %v1043_v4  ;;  %852 = vmatprep.subr.bf16.mxu1 (!%p138_p2), %v1043_v4  ;;  %vm578_vm6 = vcmask (!%p138_p2), 785408   ;;  %vm587_vm7 = vcmask (!%p138_p2), 916480  }
   0xd   : > { %221 = vst.msk [vmem:[#allocation2 + $0x68] sm:$0x3] %vm208_vm1, %v1042_v0  ;;  %223 = vst.msk [vmem:[#allocation2 + $0x78] sm:$0x3] %vm208_vm1, %v1042_v0  ;;  %s1337_s13 = smov (!%p1079_p3, %s823_s13), 1 }
   0xe   : > { %224 = vst.msk [vmem:[#allocation2 + $0x80] sm:$0xff] %vm206_vm0, %v1042_v0  ;;  %226 = vst.msk [vmem:[#allocation2 + $0x90] sm:$0xff] %vm206_vm0, %v1042_v0  ;;  %s848_s15 = sshll.u32 %s1337_s13, 4  ;;  %v253_v11 = vld [vmem:[#allocation2 + $0x2] sm:$0xff]  ;;  %s849_s19 = sshll.u32 %s1337_s13, 6 }
   0xf   : > { %225 = vst.msk [vmem:[#allocation2 + $0x88] sm:$0x3] %vm208_vm1, %v1042_v0  ;;  %227 = vst.msk [vmem:[#allocation2 + $0x98] sm:$0x3] %vm208_vm1, %v1042_v0  ;;  %s165_s18 = scalar_lea.vmem %s1331_s0, %s848_s15  ;;  %700 = vmatpush1.bf16.msra.mxu0 %v1027_v6  ;;  %861 = vmatpush1.bf16.msra.mxu1 %v1027_v6  ;;  %v245_v12 = vld [vmem:[#allocation2 + $0x1] sm:$0xff]  ;;  %s1047_s15 = smov 64  }
  0x10   : > { %v172_v1 = vld [vmem:[%s165_s18] sm:$0xff]  ;;  %v173_v2 = vld [vmem:[%s165_s18 + $0x8] sm:$0xff]  ;;  %701 = vmatprep.subr.bf16.mxu0 %v1043_v4  ;;  %853 = vmatprep.subr.bf16.mxu1 %v1043_v4  ;;  %s1050_s18 = smov 112   ;;  %s1310_s24 = scalar_lea.vmem %s1334_s3, %s849_s19 }
  0x11   : > { %174 = vxpose.xlu0.b32.start [1/2] (short) (narrow) %v172_v1, 64 }
  0x13   : > { %702 = vmatpush1.bf16.msra.mxu0 %v1028_v7  ;;  %862 = vmatpush1.bf16.msra.mxu1 %v1028_v7 }
  0x14   : > { %703 = vmatprep.subr.bf16.mxu0 %v1043_v4  ;;  %854 = vmatprep.subr.bf16.mxu1 %v1043_v4 }
  0x15   : > { %175 = vxpose.xlu0.b32.end [2/2] (short) (narrow) %v173_v2, 64 }
  0x17   : > { %704 = vmatpush1.bf16.msra.mxu0 %v1029_v9  ;;  %863 = vmatpush1.bf16.msra.mxu1 %v1029_v9  ;;  %v293_v9 = vld [vmem:[#allocation2 + $0x90] sm:$0xff] }
  0x18   : > { %705 = vmatprep.subr.bf16.mxu0 %v1043_v4  ;;  %855 = vmatprep.subr.bf16.mxu1 %v1043_v4 }
  0x1b   : > { %706 = vmatpush1.bf16.msra.mxu0 %v1030_v13  ;;  %864 = vmatpush1.bf16.msra.mxu1 %v1030_v13 }
  0x1c   : > { %707 = vmatprep.subr.bf16.mxu0 %v1043_v4  ;;  %856 = vmatprep.subr.bf16.mxu1 %v1043_v4 }
  0x1f   : > { %708 = vmatpush1.bf16.msra.mxu0 %v1031_v19  ;;  %865 = vmatpush1.bf16.msra.mxu1 %v1031_v19  ;;  %v237_v19 = vld [vmem:[#allocation2] sm:$0xff] }
  0x20   : > { %709 = vmatprep.subr.bf16.mxu0 %v1043_v4  ;;  %857 = vmatprep.subr.bf16.mxu1 %v1043_v4 }
  0x23   : > { %710 = vmatpush1.bf16.msra.mxu0 %v1032_v25  ;;  %866 = vmatpush1.bf16.msra.mxu1 %v1032_v25 }
  0x24   : > { %711 = vmatprep.subr.bf16.mxu0 %v1043_v4  ;;  %858 = vmatprep.subr.bf16.mxu1 %v1043_v4 }
  0x27   : > { %712 = vmatpush1.bf16.msra.mxu0 %v1033_v31  ;;  %867 = vmatpush1.bf16.msra.mxu1 %v1033_v31 }
  0x91   : > { %v190_v8 = vpop.trf.xlu0 }
  0x92   : > { %229 = vst.msk [vmem:[#allocation2 + $0x11] sm:$0xff] %vm206_vm0, %v190_v8 }
  0x95   : > { %v191_v10 = vpop.trf.xlu0 }
  0x96   : > { %230 = vst.msk [vmem:[#allocation2 + $0x21] sm:$0xff] %vm206_vm0, %v191_v10 }
  0x99   : > { %v192_v14 = vpop.trf.xlu0  ;;  %v254_v15 = vld [vmem:[#allocation2 + $0x12] sm:$0xff] }
  0x9a   : > { %v246_v16 = vld [vmem:[#allocation2 + $0x11] sm:$0xff]  ;;  %231 = vst.msk [vmem:[#allocation2 + $0x31] sm:$0xff] %vm206_vm0, %v192_v14  ;;  %v890_v17 = vpack.i.bf16 %v254_v15, %v253_v11 }
  0x9b   : > { %v885_v18 = vpack.i.bf16 %v246_v16, %v245_v12  ;;  %v1151_v21 = vld [vmem:[#allocation2 + $0x10] sm:$0xff] }
  0x9c   : > { %891 = vrot.lane.b32.xlu0 %v890_v17, %s1044_s6  ;;  %v301_v11 = vld [vmem:[#allocation2 + $0x91] sm:$0xff] }
  0x9d   : > { %886 = vrot.lane.b32.xlu1 %v885_v18, %s1045_s7  ;;  %v193_v20 = vpop.trf.xlu0  ;;  %v1153_v22 = vld [vmem:[#allocation2 + $0x20] sm:$0xff] }
  0x9e   : > { %232 = vst.msk [vmem:[#allocation2 + $0x41] sm:$0xff] %vm206_vm0, %v193_v20  ;;  %v895_v23 = vpack.i.bf16 %v1153_v22, %v1151_v21  ;;  %v270_v24 = vld [vmem:[#allocation2 + $0x21] sm:$0xff] }
  0x9f   : > { %v302_v26 = vld [vmem:[#allocation2 + $0x22] sm:$0xff]  ;;  %v900_v29 = vpack.i.bf16 %v270_v24, %v246_v16 }
  0xa0   : > { %v905_v36 = vpack.i.bf16 %v302_v26, %v254_v15 }
  0xa1   : > { %896 = vrot.lane.b32.xlu1 %v895_v23, %s1046_s10  ;;  %v303_v27 = vld [vmem:[#allocation2 + $0x32] sm:$0xff]  ;;  %v194_v28 = vpop.trf.xlu0 }
  0xa2   : > { %v597_v30 = vpack.c.bf16 %v303_v27, %v302_v26  ;;  %233 = vst.msk [vmem:[#allocation2 + $0x51] sm:$0xff] %vm206_vm0, %v194_v28  ;;  %v271_v32 = vld [vmem:[#allocation2 + $0x31] sm:$0xff]  ;;  %v925_v54 = vpack.i.bf16 %v303_v27, %v302_v26 }
  0xa3   : > { %v1175_v38 = vld [vmem:[#allocation2 + $0x30] sm:$0xff]  ;;  %v915_v49 = vpack.i.bf16 %v271_v32, %v270_v24 }
  0xa4   : > { %842 = vmatprep.mubr.msk.bf16.mxu0 %vm206_vm0, %v597_v30  ;;  %v910_v43 = vpack.i.bf16 %v1175_v38, %v1153_v22 }
  0xa5   : > { %901 = vrot.lane.b32.xlu1 %v900_v29, %s1047_s15  ;;  %v272_v33 = vld [vmem:[#allocation2 + $0x41] sm:$0xff]  ;;  %v195_v35 = vpop.trf.xlu0 }
  0xa6   : > { %v1172_v34 = vld [vmem:[#allocation2 + $0x42] sm:$0xff]  ;;  %v935_v37 = vpack.i.bf16 %v272_v33, %v271_v32  ;;  %234 = vst.msk [vmem:[#allocation2 + $0x61] sm:$0xff] %vm206_vm0, %v195_v35 }
  0xa7   : > { %v940_v39 = vpack.i.bf16 %v1172_v34, %v303_v27  ;;  %v1189_v45 = vld [vmem:[#allocation2 + $0x40] sm:$0xff] }
  0xa8   : > { %936 = vrot.lane.b32.xlu0 %v935_v37, %s1047_s15  ;;  %v930_v55 = vpack.i.bf16 %v1189_v45, %v1175_v38 }
  0xa9   : > { %906 = vrot.lane.b32.xlu1 %v905_v36, %s1048_s16  ;;  %v1180_v40 = vld [vmem:[#allocation2 + $0x50] sm:$0xff]  ;;  %v196_v41 = vpop.trf.xlu0 }
  0xaa   : > { %v1182_v42 = vld [vmem:[#allocation2 + $0x52] sm:$0xff]  ;;  %235 = vst.msk [vmem:[#allocation2 + $0x71] sm:$0xff] %vm206_vm0, %v196_v41  ;;  %v955_v46 = vpack.i.bf16 %v1180_v40, %v1189_v45 }
  0xab   : > { %v599_v44 = vpack.c.bf16 %v1182_v42, %v1172_v34  ;;  %v297_v47 = vld [vmem:[#allocation2 + $0x51] sm:$0xff]  ;;  %v950_v56 = vpack.i.bf16 %v1182_v42, %v1172_v34 }
  0xac   : > { %941 = vrot.lane.b32.xlu0 %v940_v39, %s1048_s16  ;;  %v1015_v50 = vpack.i.bf16 %v297_v47, %v272_v33 }
  0xad   : > { %911 = vrot.lane.b32.xlu1 %v910_v43, %s1049_s17  ;;  %v197_v48 = vpop.trf.xlu0  ;;  %v306_v51 = vld [vmem:[#allocation2 + $0x62] sm:$0xff] }
  0xae   : > { %236 = vst.msk [vmem:[#allocation2 + $0x81] sm:$0xff] %vm206_vm0, %v197_v48  ;;  %v1208_v57 = vld [vmem:[#allocation2 + $0x60] sm:$0xff]  ;;  %v970_v61 = vpack.i.bf16 %v306_v51, %v1182_v42 }
  0xaf   : > { %v960_v58 = vpack.i.bf16 %v1208_v57, %v1180_v40  ;;  %v274_v59 = vld [vmem:[#allocation2 + $0x61] sm:$0xff] }
  0xb0   : > { %956 = vrot.lane.b32.xlu0 %v955_v46, %s1049_s17  ;;  %v965_v60 = vpack.i.bf16 %v274_v59, %v297_v47 }
  0xb1   : > { %916 = vrot.lane.b32.xlu1 %v915_v49, %s1050_s18  ;;  %v307_v52 = vld [vmem:[#allocation2 + $0x72] sm:$0xff] }
  0xb2   : > { %v601_v53 = vpack.c.bf16 %v307_v52, %v306_v51  ;;  %v1216_v62 = vld [vmem:[#allocation2 + $0x70] sm:$0xff]  ;;  %v990_v2 = vpack.i.bf16 %v307_v52, %v306_v51 }
  0xb3   : > { %v975_v63 = vpack.i.bf16 %v1216_v62, %v1208_v57  ;;  %v299_v0 = vld [vmem:[#allocation2 + $0x71] sm:$0xff] }
  0xb4   : > { %1016 = vrot.lane.b32.xlu0 %v1015_v50, %s1050_s18  ;;  %844 = vmatprep.mubr.msk.bf16.mxu1 %vm206_vm0, %v601_v53  ;;  %v980_v1 = vpack.i.bf16 %v299_v0, %v274_v59 }
  0xb5   : > { %921 = vrot.lane.b32.xlu1 %v915_v49, %s1045_s7  ;;  %v268_v3 = vld [vmem:[#allocation2 + $0x80] sm:$0xff] }
  0xb6   : > { %v995_v4 = vpack.i.bf16 %v268_v3, %v1216_v62  ;;  %v276_v5 = vld [vmem:[#allocation2 + $0x81] sm:$0xff]  ;;  %v1010_v10 = vpack.i.bf16 %v293_v9, %v268_v3 }
  0xb7   : > { %v1000_v6 = vpack.i.bf16 %v276_v5, %v299_v0  ;;  %v1227_v7 = vld [vmem:[#allocation2 + $0x82] sm:$0xff]  ;;  %v1020_v12 = vpack.i.bf16 %v301_v11, %v276_v5 }
  0xb8   : > { %v1005_v8 = vpack.i.bf16 %v1227_v7, %v307_v52 }
  0xb9   : > { %926 = vrot.lane.b32.xlu1 %v925_v54, %s1044_s6 }
  0xbd   : > { %931 = vrot.lane.b32.xlu1 %v930_v55, %s1046_s10 }
  0xc1   : > { %946 = vrot.lane.b32.xlu1 %v1015_v50, %s1045_s7 }
  0xc5   : > { %951 = vrot.lane.b32.xlu1 %v950_v56, %s1044_s6 }
  0xc9   : > { %961 = vrot.lane.b32.xlu1 %v960_v58, %s1046_s10 }
  0xcd   : > { %966 = vrot.lane.b32.xlu1 %v965_v60, %s1047_s15 }
  0xd1   : > { %971 = vrot.lane.b32.xlu1 %v970_v61, %s1048_s16 }
  0xd5   : > { %976 = vrot.lane.b32.xlu1 %v975_v63, %s1049_s17 }
  0xd9   : > { %981 = vrot.lane.b32.xlu1 %v980_v1, %s1050_s18 }
  0xdd   : > { %986 = vrot.lane.b32.xlu1 %v980_v1, %s1045_s7 }
  0xe1   : > { %991 = vrot.lane.b32.xlu1 %v990_v2, %s1044_s6 }
  0xe5   : > { %996 = vrot.lane.b32.xlu1 %v995_v4, %s1046_s10 }
  0xe9   : > { %1001 = vrot.lane.b32.xlu1 %v1000_v6, %s1047_s15 }
  0xed   : > { %1006 = vrot.lane.b32.xlu1 %v1005_v8, %s1048_s16 }
  0xf1   : > { %1011 = vrot.lane.b32.xlu1 %v1010_v10, %s1049_s17 }
  0xf5   : > { %1021 = vrot.lane.b32.xlu1 %v1020_v12, %s1050_s18 }
 0x10e   : > { %v892_v18 = vpop.permute.xlu0 %891 }
 0x10f   : > { %v887_v13 = vpop.permute.xlu1 %886  ;;  %v894_v23 = vunpack.i.h.bf16 %v892_v18  ;;  %v893_v24 = vunpack.i.l.bf16 %v892_v18 }
 0x110   : > { %v889_v16 = vunpack.i.h.bf16 %v887_v13  ;;  %v888_v17 = vunpack.i.l.bf16 %v887_v13 }
 0x112   : > { %v534_v25 = vsel %vm206_vm0, %v237_v19, %v888_v17  ;;  %v535_v26 = vsel %vm206_vm0, %v1151_v21, %v889_v16 }
 0x113   : > { %v897_v14 = vpop.permute.xlu1 %896  ;;  %v544_v35 = vsel %vm542_vm2, %v535_v26, %v894_v23  ;;  %v543_v36 = vsel %vm542_vm2, %v534_v25, %v893_v24 }
 0x114   : > { %v899_v27 = vunpack.i.h.bf16 %v897_v14  ;;  %v898_v28 = vunpack.i.l.bf16 %v897_v14 }
 0x116   : > { %v552_v43 = vsel %vm551_vm3, %v543_v36, %v898_v28  ;;  %v553_v21 = vsel %vm551_vm3, %v544_v35, %v899_v27 }
 0x117   : > { %v902_v15 = vpop.permute.xlu1 %901 }
 0x118   : > { %v904_v29 = vunpack.i.h.bf16 %v902_v15  ;;  %v903_v30 = vunpack.i.l.bf16 %v902_v15 }
 0x11a   : > { %v937_v37 = vpop.permute.xlu0 %936  ;;  %v561_v46 = vsel %vm560_vm4, %v552_v43, %v903_v30  ;;  %v562_v47 = vsel %vm560_vm4, %v553_v21, %v904_v29 }
 0x11b   : > { %v907_v20 = vpop.permute.xlu1 %906  ;;  %v939_v10 = vunpack.i.h.bf16 %v937_v37  ;;  %v938_v11 = vunpack.i.l.bf16 %v937_v37 }
 0x11c   : > { %v909_v32 = vunpack.i.h.bf16 %v907_v20  ;;  %v908_v33 = vunpack.i.l.bf16 %v907_v20 }
 0x11e   : > { %v570_v49 = vsel %vm569_vm5, %v561_v46, %v908_v33  ;;  %v571_v50 = vsel %vm569_vm5, %v562_v47, %v909_v32  ;;  %v942_v58 = vpop.permute.xlu0 %941 }
 0x11f   : > { %v912_v31 = vpop.permute.xlu1 %911  ;;  %v944_v12 = vunpack.i.h.bf16 %v942_v58  ;;  %v943_v13 = vunpack.i.l.bf16 %v942_v58 }
 0x120   : > { %v914_v39 = vunpack.i.h.bf16 %v912_v31  ;;  %v913_v41 = vunpack.i.l.bf16 %v912_v31 }
 0x122   : > { %v579_v53 = vsel %vm578_vm6, %v570_v49, %v913_v41  ;;  %v580_v54 = vsel %vm578_vm6, %v571_v50, %v914_v39  ;;  %v957_v63 = vpop.permute.xlu0 %956 }
 0x123   : > { %v917_v48 = vpop.permute.xlu1 %916  ;;  %v959_v16 = vunpack.i.h.bf16 %v957_v63 }
 0x124   : > { %v919_v51 = vunpack.i.h.bf16 %v917_v48  ;;  %v918_v52 = vunpack.i.l.bf16 %v917_v48 }
 0x126   : > { %v588_v55 = vsel %vm587_vm7, %v579_v53, %v918_v52  ;;  %v589_v56 = vsel %vm587_vm7, %v580_v54, %v919_v51 }
 0x127   : > { %v922_v59 = vpop.permute.xlu1 %921  ;;  %v596_v60 = vpack.c.bf16 %v589_v56, %v588_v55 }
 0x128   : > { %v924_v0 = vunpack.i.h.bf16 %v922_v59  ;;  %v923_v1 = vunpack.i.l.bf16 %v922_v59 }
 0x129   : > { %728 = vmatmul.mubr.bf16.vlgmr.msra.gmra.mrb[0].mxu0 %v596_v60 }
 0x12a   : > { %843 = vmatprep.mubr.msk.bf16.mxu0 %vm206_vm0, %v599_v44  ;;  %v536_v5 = vsel %vm206_vm0, %v1153_v22, %v923_v1  ;;  %v537_v6 = vsel %vm206_vm0, %v1175_v38, %v924_v0  ;;  %v1017_v44 = vpop.permute.xlu0 %1016  ;;  %v958_v22 = vunpack.i.l.bf16 %v957_v63 }
 0x12b   : > { %v927_v61 = vpop.permute.xlu1 %926  ;;  %v1019_v19 = vunpack.i.h.bf16 %v1017_v44  ;;  %v1018_v20 = vunpack.i.l.bf16 %v1017_v44 }
 0x12c   : > { %v929_v2 = vunpack.i.h.bf16 %v927_v61  ;;  %v928_v3 = vunpack.i.l.bf16 %v927_v61 }
 0x12e   : > { %v545_v34 = vsel %vm542_vm2, %v536_v5, %v928_v3  ;;  %v546_v42 = vsel %vm542_vm2, %v537_v6, %v929_v2  ;;  %v309_v3 = vld [vmem:[#allocation2 + $0x92] sm:$0xff] }
 0x12f   : > { %v932_v4 = vpop.permute.xlu1 %931 }
 0x130   : > { %v934_v8 = vunpack.i.h.bf16 %v932_v4  ;;  %v933_v9 = vunpack.i.l.bf16 %v932_v4 }
 0x132   : > { %v555_v14 = vsel %vm551_vm3, %v546_v42, %v934_v8  ;;  %v554_v15 = vsel %vm551_vm3, %v545_v34, %v933_v9  ;;  %v603_v9 = vpack.c.bf16 %v309_v3, %v1227_v7 }
 0x133   : > { %v563_v17 = vsel %vm560_vm4, %v554_v15, %v938_v11  ;;  %v564_v38 = vsel %vm560_vm4, %v555_v14, %v939_v10  ;;  %v947_v18 = vpop.permute.xlu1 %946 }
 0x134   : > { %v572_v23 = vsel %vm569_vm5, %v563_v17, %v943_v13  ;;  %v573_v24 = vsel %vm569_vm5, %v564_v38, %v944_v12  ;;  %v949_v35 = vunpack.i.h.bf16 %v947_v18  ;;  %v948_v36 = vunpack.i.l.bf16 %v947_v18 }
 0x135   : > { %v581_v25 = vsel %vm578_vm6, %v572_v23, %v958_v22  ;;  %v582_v26 = vsel %vm578_vm6, %v573_v24, %v959_v16 }
 0x136   : > { %v590_v27 = vsel %vm587_vm7, %v581_v25, %v1018_v20  ;;  %v591_v28 = vsel %vm587_vm7, %v582_v26, %v1019_v19  ;;  %v538_v48 = vsel %vm206_vm0, %v1189_v45, %v948_v36  ;;  %v539_v49 = vsel %vm206_vm0, %v1180_v40, %v949_v35 }
 0x137   : > { %v952_v29 = vpop.permute.xlu1 %951  ;;  %v598_v30 = vpack.c.bf16 %v591_v28, %v590_v27 }
 0x138   : > { %v954_v37 = vunpack.i.h.bf16 %v952_v29  ;;  %v953_v39 = vunpack.i.l.bf16 %v952_v29 }
 0x139   : > { %736 = vmatmul.mubr.bf16.gmra.mrb[4].mxu0 %v598_v30 }
 0x13a   : > { %v547_v52 = vsel %vm542_vm2, %v538_v48, %v953_v39  ;;  %v548_v53 = vsel %vm542_vm2, %v539_v49, %v954_v37 }
 0x13b   : > { %v962_v31 = vpop.permute.xlu1 %961 }
 0x13c   : > { %v964_v41 = vunpack.i.h.bf16 %v962_v31  ;;  %v963_v43 = vunpack.i.l.bf16 %v962_v31 }
 0x13e   : > { %v557_v56 = vsel %vm551_vm3, %v548_v53, %v964_v41  ;;  %v556_v58 = vsel %vm551_vm3, %v547_v52, %v963_v43  ;;  %v832_v43 = vld [vmem:[%s1333_s2] ss:$0 sm:$0xff] }
 0x13f   : > { %v967_v32 = vpop.permute.xlu1 %966 }
 0x140   : > { %v969_v21 = vunpack.i.h.bf16 %v967_v32  ;;  %v968_v46 = vunpack.i.l.bf16 %v967_v32 }
 0x142   : > { %v565_v59 = vsel %vm560_vm4, %v556_v58, %v968_v46  ;;  %v566_v60 = vsel %vm560_vm4, %v557_v56, %v969_v21 }
 0x143   : > { %v972_v33 = vpop.permute.xlu1 %971 }
 0x144   : > { %v974_v50 = vunpack.i.h.bf16 %v972_v33  ;;  %v973_v51 = vunpack.i.l.bf16 %v972_v33 }
 0x146   : > { %v574_v61 = vsel %vm569_vm5, %v565_v59, %v973_v51  ;;  %v575_v40 = vsel %vm569_vm5, %v566_v60, %v974_v50 }
 0x147   : > { %v977_v47 = vpop.permute.xlu1 %976 }
 0x148   : > { %v979_v54 = vunpack.i.h.bf16 %v977_v47  ;;  %v978_v55 = vunpack.i.l.bf16 %v977_v47 }
 0x14a   : > { %v584_v1 = vsel %vm578_vm6, %v575_v40, %v979_v54  ;;  %v583_v2 = vsel %vm578_vm6, %v574_v61, %v978_v55 }
 0x14b   : > { %v982_v45 = vpop.permute.xlu1 %981 }
 0x14c   : > { %v984_v63 = vunpack.i.h.bf16 %v982_v45  ;;  %v983_v0 = vunpack.i.l.bf16 %v982_v45 }
 0x14e   : > { %v592_v4 = vsel %vm587_vm7, %v583_v2, %v983_v0  ;;  %v593_v5 = vsel %vm587_vm7, %v584_v1, %v984_v63 }
 0x14f   : > { %v987_v6 = vpop.permute.xlu1 %986  ;;  %v600_v8 = vpack.c.bf16 %v593_v5, %v592_v4 }
 0x150   : > { %v989_v44 = vunpack.i.h.bf16 %v987_v6  ;;  %v988_v12 = vunpack.i.l.bf16 %v987_v6 }
 0x151   : > { %744 = vmatmul.mubr.bf16.vlgmr.msra.gmra.mrb[0].mxu1 %v600_v8 }
 0x152   : > { %845 = vmatprep.mubr.msk.bf16.mxu1 %vm206_vm0, %v603_v9  ;;  %v540_v18 = vsel %vm206_vm0, %v1208_v57, %v988_v12  ;;  %v541_v7 = vsel %vm206_vm0, %v1216_v62, %v989_v44 }
 0x153   : > { %v992_v10 = vpop.permute.xlu1 %991 }
 0x154   : > { %v994_v13 = vunpack.i.h.bf16 %v992_v10  ;;  %v993_v14 = vunpack.i.l.bf16 %v992_v10 }
 0x156   : > { %v549_v23 = vsel %vm542_vm2, %v540_v18, %v993_v14  ;;  %v550_v24 = vsel %vm542_vm2, %v541_v7, %v994_v13 }
 0x157   : > { %v997_v11 = vpop.permute.xlu1 %996 }
 0x158   : > { %v999_v15 = vunpack.i.h.bf16 %v997_v11  ;;  %v998_v16 = vunpack.i.l.bf16 %v997_v11 }
 0x15a   : > { %v559_v27 = vsel %vm551_vm3, %v550_v24, %v999_v15  ;;  %v558_v28 = vsel %vm551_vm3, %v549_v23, %v998_v16 }
 0x15b   : > { %v1002_v34 = vpop.permute.xlu1 %1001 }
 0x15c   : > { %v1004_v22 = vunpack.i.h.bf16 %v1002_v34  ;;  %v1003_v17 = vunpack.i.l.bf16 %v1002_v34 }
 0x15e   : > { %v567_v29 = vsel %vm560_vm4, %v558_v28, %v1003_v17  ;;  %v568_v57 = vsel %vm560_vm4, %v559_v27, %v1004_v22 }
 0x15f   : > { %v1007_v42 = vpop.permute.xlu1 %1006 }
 0x160   : > { %v1009_v19 = vunpack.i.h.bf16 %v1007_v42  ;;  %v1008_v20 = vunpack.i.l.bf16 %v1007_v42 }
 0x162   : > { %v576_v62 = vsel %vm569_vm5, %v567_v29, %v1008_v20  ;;  %v577_v31 = vsel %vm569_vm5, %v568_v57, %v1009_v19 }
 0x163   : > { %v1012_v38 = vpop.permute.xlu1 %1011 }
 0x164   : > { %v1014_v25 = vunpack.i.h.bf16 %v1012_v38  ;;  %v1013_v26 = vunpack.i.l.bf16 %v1012_v38 }
 0x166   : > { %v585_v35 = vsel %vm578_vm6, %v576_v62, %v1013_v26  ;;  %v586_v36 = vsel %vm578_vm6, %v577_v31, %v1014_v25 }
 0x167   : > { %v1022_v30 = vpop.permute.xlu1 %1021 }
 0x168   : > { %v1024_v32 = vunpack.i.h.bf16 %v1022_v30  ;;  %v1023_v33 = vunpack.i.l.bf16 %v1022_v30 }
 0x16a   : > { %v594_v37 = vsel %vm587_vm7, %v585_v35, %v1023_v33  ;;  %v595_v39 = vsel %vm587_vm7, %v586_v36, %v1024_v32 }
 0x16b   : > { %v602_v41 = vpack.c.bf16 %v595_v39, %v594_v37 }
 0x16d   : > { %752 = vmatmul.mubr.bf16.gmra.mrb[4].mxu1 %v602_v41 }
 0x1fc   : > { %v729_v21 = vpop.f32.mrb[0].mxu0 }
 0x1fd   : > { %v730_v46 = vadd.f32 %v832_v43, %v729_v21  ;;  %v731_v47 = vpop.f32.mrb[1].mxu0 }
 0x1fe   : > { %v732_v48 = vpop.f32.mrb[2].mxu0 }
 0x1ff   : > { %760 = vst.msk [vmem:[%s1310_s24] sm:$0xff] %vm560_vm4, %v730_v46  ;;  %v733_v49 = vadd.f32 %v832_v43, %v732_v48  ;;  %v734_v50 = vpop.f32.mrb[3].mxu0 }
 0x201   : > { %761 = vst.msk [vmem:[%s1310_s24 + $0x8] sm:$0xff] %vm560_vm4, %v733_v49 }
 0x20c   : > { %v737_v51 = vpop.f32.mrb[4].mxu0 }
 0x20d   : > { %v738_v52 = vadd.f32 %v832_v43, %v737_v51  ;;  %v739_v53 = vpop.f32.mrb[5].mxu0 }
 0x20e   : > { %v740_v54 = vpop.f32.mrb[6].mxu0 }
 0x20f   : > { %762 = vst.msk [vmem:[%s1310_s24 + $0x10] sm:$0xff] %vm560_vm4, %v738_v52  ;;  %v741_v55 = vadd.f32 %v832_v43, %v740_v54  ;;  %v742_v56 = vpop.f32.mrb[7].mxu0 }
 0x211   : > { %763 = vst.msk [vmem:[%s1310_s24 + $0x18] sm:$0xff] %vm560_vm4, %v741_v55 }
 0x224   : > { %v745_v58 = vpop.f32.mrb[0].mxu1 }
 0x225   : > { %v746_v59 = vadd.f32 %v832_v43, %v745_v58  ;;  %v747_v60 = vpop.f32.mrb[1].mxu1 }
 0x226   : > { %v748_v45 = vpop.f32.mrb[2].mxu1 }
 0x227   : > { %764 = vst.msk [vmem:[%s1310_s24 + $0x20] sm:$0xff] %vm560_vm4, %v746_v59  ;;  %v749_v61 = vadd.f32 %v832_v43, %v748_v45  ;;  %v750_v40 = vpop.f32.mrb[3].mxu1 }
 0x229   : > { %765 = vst.msk [vmem:[%s1310_s24 + $0x28] sm:$0xff] %vm560_vm4, %v749_v61 }
 0x240   : > { %v753_v63 = vpop.f32.mrb[4].mxu1 }
 0x241   : > { %v754_v0 = vadd.f32 %v832_v43, %v753_v63  ;;  %v755_v1 = vpop.f32.mrb[5].mxu1 }
 0x242   : > { %v756_v2 = vpop.f32.mrb[6].mxu1 }
 0x243   : > { %766 = vst.msk [vmem:[%s1310_s24 + $0x30] sm:$0xff] %vm560_vm4, %v754_v0  ;;  %v757_v3 = vadd.f32 %v832_v43, %v756_v2  ;;  %v758_v4 = vpop.f32.mrb[7].mxu1 }
 0x245   : > { %767 = vst.msk [vmem:[%s1310_s24 + $0x38] sm:$0xff] %vm560_vm4, %v757_v3 }
 0x246 PF: > { %s13_s12 = sadd.s32 1, %s1040_s12  }
 0x247   : > { %p10_p4 = scmp.ge.s32.totalorder %s13_s12, 4  }
 0x249   :  { %12 = sbr.rel (!%p10_p4) target bundleno = 1 (0x1), region = 64 }

// kernel: _lambda_.8
= control target key start
LH: loop header
LB: loop body
LE: loop exit
PB: predicated region body
PF: predicated region fallthrough
CT: control target
= control target key end

     0   :  { %10 = vsyncpa [#allocation3], 0  ;;  %s1543_s0 = inlined_call_operand.vmem [shape: f32[4,64,8], index: 0, kind: input, shape index: {}]   ;;  %s1544_s1 = inlined_call_operand.vmem [shape: f32[8,24], index: 1, kind: input, shape index: {}]   ;;  %s1545_s2 = inlined_call_operand.vmem [shape: f32[1,24], index: 2, kind: input, shape index: {}]   ;;  %s1546_s3 = inlined_call_operand.vmem [shape: f32[4,8,64], index: 3, kind: output, shape index: {0}]   ;;  %s1547_s4 = inlined_call_operand.hbm [shape: f32[4,1,64], index: 4, kind: output, shape index: {1}]  }
   0x1   :  { %12 = vsyncpa [#allocation3 + $0x1], 0  ;;  %s1291_s15 = smov 0   ;;  %s1293_s16 = smov 0  }
   0x2   :  { %s1295_s17 = smov 0   ;;  %s1297_s18 = smov 0  }
   0x3 LB: > { %s1312_s19 = sadd.s32 4294967295, %s1261_s18   ;;  %s910_s20 = sadd.s32 4294967294, %s1261_s18   ;;  %s1261_s18 = sphi %s1297_s18, %s1555_s18   ;;  %s1257_s17 = sphi %s1295_s17, %s1554_s17   ;;  %s1253_s16 = sphi %s1293_s16, %s1553_s16   ;;  %s1249_s15 = sphi %s1291_s15, %s1552_s15  }
   0x4   : > { %s1316_s21 = sadd.s32 1, %s1261_s18   ;;  %s119_s22 = sadd.s32 1, %s1257_s17 }
   0x5   : > { %s116_s23 = ssub.s32 %s1261_s18, %s1316_s21  ;;  %p129_p0 = scmp.ne.s32.totalorder %s1257_s17, %s1253_s16 }
   0x6   : > { %p117_p1 = scmp.eq.s32.totalorder %s116_s23, 0  ;;  %p130_p2 = scmp.eq.s32.totalorder %s1312_s19, 3 }
   0x7   : > { %p135_p3 = scmp.ne.s32.totalorder %s1253_s16, %s1249_s15  ;;  %p136_p4 = scmp.eq.s32.totalorder %s910_s20, 3 }
   0x8   : > { %s1327_s24 = scalar_select %p117_p1, %s1257_s17, %s119_s22  }
   0x9   : > { %p1329_p5 = por %p130_p2, %p129_p0  ;;  %p1333_p6 = por %p136_p4, %p135_p3 }
   0xa   : > { %p913_p7 = scmp.ge.s32.totalorder %s1261_s18, 1  ;;  %p168_p8 = scmp.lt.s32.totalorder %s1261_s18, 5 }
   0xc   : > { %p169_p9 = pnand %p913_p7, %p168_p8 }
   0xd   : > { %v214_v0 = vld [vmem:[%s1544_s1] sm:$0xff] (!%p169_p9)  ;;  %p197_p10 = scmp.lt.s32.totalorder (!%p169_p9), %s1312_s19, 3  ;;  %vm222_vm0 = vcmask (!%p169_p9), 64512   ;;  %s1263_s10 = smov (!%p169_p9), 120   ;;  %vm513_vm2 = vcmask (!%p169_p9), 523264   ;;  %vm623_vm3 = vcmask (!%p169_p9), 516096  }
   0xe   : > { %172 = sbr.rel (%p169_p9) target bundleno = 1270 (0x4f6), region = 32  ;;  %995 = vmatprep.subr.mxu0 (!%p169_p9), %v214_v0  ;;  %v917_v9 = vld [vmem:[%s1545_s2] ss:$0 sm:$0xff] (!%p169_p9)  ;;  %vm1367_vm1 = vmpackc.low (!%p169_p9), %vm222_vm0, %vm222_vm0  ;;  %s1264_s11 = smov (!%p169_p9), 112  }
   0xf   : > { %996 = vmatpush3.msra.mxu0 (!%p169_p9), %v214_v0  ;;  %s195_s12 = sand.u32 (!%p169_p9), 1, %s1253_s16   ;;  %s950_s14 = sshll.u32 (!%p169_p9), %s1312_s19, 4 }
  0x10   : > { %s196_s13 = scalar_lea.vmem (!%p169_p9), [#allocation2], %s195_s12  ;;  %s1496_s27 = scalar_lea.hbm (!%p169_p9), %s1547_s4, %s950_s14 }
  0x11   : > { %s831_s20 = sshll.u32 (!%p169_p9), %s196_s13, 4  ;;  %s816_s28 = scalar_lea.sflag (!%p169_p9), [#allocation3], %s195_s12  ;;  %s1498_s20 = int_to_ptr.vmem [resolvable:$true] %s831_s20 }
  0x15   : > { %s1344_s29 = scalar_select %p197_p10, %s1312_s19, 3 }
  0x16   : > { %s1265_s19 = smov [#allocation2]  }
  0x17   : > { %s953_s30 = sshll.u32 %s1344_s29, 6  ;;  %s1203_s5 = sshll.u32 %s1265_s19, 4  ;;  %s1204_s5 = int_to_ptr.vmem [resolvable:$false] %s1203_s5 }
  0x18   : > { %s201_s7 = scalar_lea.vmem %s1543_s0, %s953_s30  ;;  %s1199_s30 = scalar_lea.vmem %s1498_s20, 16 }
  0x19   : > { %v206_v1 = vld [vmem:[%s201_s7] sm:$0xff]  ;;  %v207_v2 = vld [vmem:[%s201_s7 + $0x8] sm:$0xff]  ;;  %v208_v3 = vld [vmem:[%s201_s7 + $0x10] sm:$0xff]  ;;  %p1200_p11 = scmp.ne.s32.totalorder %s1498_s20, %s1199_s30  ;;  %s1205_s6 = scalar_lea.vmem %s1204_s5, 32 }
  0x1a   : > { %997 = vmatprep.mubr.msk.f32.mxu0 %vm222_vm0, %v206_v1  ;;  %v209_v4 = vld [vmem:[%s201_s7 + $0x18] sm:$0xff]  ;;  %v210_v5 = vld [vmem:[%s201_s7 + $0x20] sm:$0xff]  ;;  %v211_v6 = vld [vmem:[%s201_s7 + $0x28] sm:$0xff]  ;;  %p1206_p0 = scmp.lt.s32.totalorder %s1498_s20, %s1204_s5  ;;  %p1207_p1 = scmp.lt.s32.totalorder %s1205_s6, %s1199_s30 }
  0x1b   : > { %998 = vmatmul.mubr.msk.f32.vlgmr.msra.gmra.mrb[0].mxu0 %vm222_vm0, %v207_v2  ;;  %v212_v7 = vld [vmem:[%s201_s7 + $0x30] sm:$0xff]  ;;  %v213_v8 = vld [vmem:[%s201_s7 + $0x38] sm:$0xff]  ;;  %p1201_p12 = pnand %p1200_p11, %p1329_p5 }
  0x1c   : > { %1000 = vmatprep.mubr.msk.f32.mxu0 %vm222_vm0, %v208_v3  ;;  %p1208_p2 = por %p1207_p1, %p1206_p0 }
  0x1d   : > { %p1202_p13 = pneg %p1201_p12 }
  0x1f   : > { %1001 = vmatmul.mubr.msk.f32.gmra.mrb[2].mxu0 %vm222_vm0, %v209_v4  ;;  %p1209_p3 = pnand %p1208_p2, %p1202_p13 }
  0x20   : > { %1003 = vmatprep.mubr.msk.f32.mxu0 %vm222_vm0, %v210_v5 }
  0x23   : > { %1004 = vmatmul.mubr.msk.f32.gmra.mrb[4].mxu0 %vm222_vm0, %v211_v6 }
  0x24   : > { %1006 = vmatprep.mubr.msk.f32.mxu0 %vm222_vm0, %v212_v7 }
  0x27   : > { %1007 = vmatmul.mubr.msk.f32.gmra.mrb[6].mxu0 %vm222_vm0, %v213_v8 }
  0xee   : > { %v999_v10 = vpop.f32.mrb[0].mxu0 }
  0xef   : > { %v1361_v11 = vadd.f32 %v999_v10, %v917_v9  ;;  %v313_v12 = vpop.f32.mrb[1].mxu0 }
  0xf0   : > { %v1363_v13 = vadd.f32 %v917_v9, %v313_v12 }
  0xf2   : > { %v1002_v15 = vpop.f32.mrb[2].mxu0  ;;  %360 = vrot.lane.b32.xlu0 %v1363_v13, %s1263_s10  ;;  %v1065_v16 = vpack.c.bf16 %v1361_v11, %v1363_v13  ;;  %v1147_v17 = vpack.i.bf16 %v1361_v11, %v1363_v13 }
  0xf3   : > { %v1377_v18 = vadd.f32 %v1002_v15, %v917_v9  ;;  %v323_v19 = vpop.f32.mrb[3].mxu0 }
  0xf4   : > { %v1379_v20 = vadd.f32 %v917_v9, %v323_v19  ;;  %1067 = vmatprep.subr.msk.bf16.mxu1 %vm1367_vm1, %v1065_v16 }
  0xf5   : > { %1070 = vmatpush3.bf16.xpose.msk.msra.mxu1 %vm1367_vm1, %v1065_v16 }
  0xf6   : > { %v1071_v21 = vpack.c.bf16 %v1377_v18, %v1379_v20  ;;  %364 = vrot.lane.b32.xlu1 %v1379_v20, %s1263_s10  ;;  %362 = vrot.lane.b32.xlu0 %v1361_v11, %s1263_s10  ;;  %v1005_v22 = vpop.f32.mrb[4].mxu0  ;;  %v1152_v23 = vpack.i.bf16 %v1377_v18, %v1379_v20 }
  0xf7   : > { %v333_v24 = vpop.f32.mrb[5].mxu0  ;;  %v1395_v25 = vadd.f32 %v1005_v22, %v917_v9 }
  0xf8   : > { %1073 = vmatprep.subr.msk.bf16.mxu1 %vm1367_vm1, %v1071_v21  ;;  %v1397_v26 = vadd.f32 %v917_v9, %v333_v24 }
  0xfa   : > { %v1077_v27 = vpack.c.bf16 %v1395_v25, %v1397_v26  ;;  %366 = vrot.lane.b32.xlu1 %v1377_v18, %s1263_s10  ;;  %v1008_v28 = vpop.f32.mrb[6].mxu0  ;;  %368 = vrot.lane.b32.xlu0 %v1397_v26, %s1263_s10  ;;  %v1157_v29 = vpack.i.bf16 %v1395_v25, %v1397_v26 }
  0xfb   : > { %v343_v30 = vpop.f32.mrb[7].mxu0  ;;  %v1407_v31 = vadd.f32 %v1008_v28, %v917_v9 }
  0xfc   : > { %v1409_v32 = vadd.f32 %v917_v9, %v343_v30 }
  0xfd   : > { %1076 = vmatpush3.bf16.xpose.msk.msra.mxu1 %vm1367_vm1, %v1071_v21 }
  0xfe   : > { %v1083_v33 = vpack.c.bf16 %v1407_v31, %v1409_v32  ;;  %370 = vrot.lane.b32.xlu1 %v1395_v25, %s1263_s10  ;;  %372 = vrot.lane.b32.xlu0 %v1409_v32, %s1263_s10  ;;  %v1162_v34 = vpack.i.bf16 %v1407_v31, %v1409_v32 }
  0xff   : > { %1079 = vmatprep.subr.msk.bf16.mxu1 %vm1367_vm1, %v1077_v27 }
 0x102   : > { %374 = vrot.lane.b32.xlu1 %v1407_v31, %s1263_s10 }
 0x105   : > { %1082 = vmatpush3.bf16.xpose.msk.msra.mxu1 %vm1367_vm1, %v1077_v27 }
 0x106   : > { %1085 = vmatprep.subr.msk.bf16.mxu1 %vm1367_vm1, %v1083_v33 }
 0x10d   : > { %1088 = vmatpush3.bf16.xpose.msk.msra.mxu1 %vm1367_vm1, %v1083_v33 }
 0x164   : > { %v361_v35 = vpop.permute.xlu0 %360 }
 0x165   : > { %1025 = vmatprep.mubr.msk.f32.mxu1 %vm222_vm0, %v361_v35 }
 0x168   : > { %v365_v36 = vpop.permute.xlu1 %364  ;;  %v363_v37 = vpop.permute.xlu0 %362 }
 0x169   : > { %1026 = vmatmul.mubr.msk.f32.vlgmr.msra.gmra.mrb[0].mxu1 %vm222_vm0, %v363_v37 }
 0x16a   : > { %1028 = vmatprep.mubr.msk.f32.mxu1 %vm222_vm0, %v365_v36 }
 0x16c   : > { %v367_v38 = vpop.permute.xlu1 %366  ;;  %v369_v39 = vpop.permute.xlu0 %368 }
 0x16d   : > { %1029 = vmatmul.mubr.msk.f32.gmra.mrb[2].mxu1 %vm222_vm0, %v367_v38 }
 0x16e   : > { %1031 = vmatprep.mubr.msk.f32.mxu1 %vm222_vm0, %v369_v39 }
 0x170   : > { %v371_v40 = vpop.permute.xlu1 %370  ;;  %v373_v41 = vpop.permute.xlu0 %372 }
 0x171   : > { %1032 = vmatmul.mubr.msk.f32.gmra.mrb[4].mxu1 %vm222_vm0, %v371_v40 }
 0x172   : > { %1034 = vmatprep.mubr.msk.f32.mxu1 %vm222_vm0, %v373_v41 }
 0x174   : > { %v375_v42 = vpop.permute.xlu1 %374 }
 0x175   : > { %1035 = vmatmul.mubr.msk.f32.gmra.mrb[6].mxu1 %vm222_vm0, %v375_v42 }
 0x23c   : > { %v1027_v43 = vpop.f32.mrb[0].mxu1 }
 0x23d   : > { %v474_v44 = vpop.f32.mrb[1].mxu1  ;;  %v517_v45 = vsel %vm513_vm2, %v1027_v43, -inf }
 0x23e   : > { %518 = vmax.xlane.f32.xlu1 %v517_v45  ;;  %v514_v46 = vsel %vm513_vm2, %v474_v44, -inf }
 0x23f   : > { %515 = vmax.xlane.f32.xlu0 %v514_v46 }
 0x240   : > { %v1030_v47 = vpop.f32.mrb[2].mxu1 }
 0x241   : > { %v484_v48 = vpop.f32.mrb[3].mxu1  ;;  %v523_v52 = vsel %vm513_vm2, %v1030_v47, -inf }
 0x242   : > { %v520_v49 = vsel %vm513_vm2, %v484_v48, -inf }
 0x243   : > { %521 = vmax.xlane.f32.xlu0 %v520_v49 }
 0x244   : > { %v1033_v50 = vpop.f32.mrb[4].mxu1 }
 0x245   : > { %v494_v51 = vpop.f32.mrb[5].mxu1  ;;  %v529_v56 = vsel %vm513_vm2, %v1033_v50, -inf }
 0x246   : > { %v526_v53 = vsel %vm513_vm2, %v494_v51, -inf }
 0x247   : > { %524 = vmax.xlane.f32.xlu0 %v523_v52  ;;  %527 = vmax.xlane.f32.xlu1 %v526_v53 }
 0x248   : > { %v1036_v54 = vpop.f32.mrb[6].mxu1 }
 0x249   : > { %v504_v55 = vpop.f32.mrb[7].mxu1  ;;  %v535_v58 = vsel %vm513_vm2, %v1036_v54, -inf }
 0x24a   : > { %v532_v57 = vsel %vm513_vm2, %v504_v55, -inf }
 0x24b   : > { %530 = vmax.xlane.f32.xlu0 %v529_v56  ;;  %533 = vmax.xlane.f32.xlu1 %v532_v57 }
 0x24f   : > { %536 = vmax.xlane.f32.xlu0 %v535_v58 }
 0x25c   : > { %1148 = vrot.lane.b32.xlu1 %v1147_v17, %s1264_s11 }
 0x2cb   : > { %v519_v59 = vpop.xlane.xlu1 %518 }
 0x2cc   : > { %v539_v60 = vsub.f32 %v1027_v43, %v519_v59  ;;  %v516_v61 = vpop.xlane.xlu0 %515 }
 0x2cd   : > { %v538_v62 = vsub.f32 %v474_v44, %v516_v61 }
 0x2ce   : > { %v548_v63 = vmul.f32 1.442695, %v539_v60 }
 0x2cf   : > { %v546_v0 = vmul.f32 1.442695, %v538_v62 }
 0x2d0   : > { %1167 = vpow2.f32 %v548_v63  ;;  %v522_v1 = vpop.xlane.xlu0 %521 }
 0x2d1   : > { %1169 = vpow2.f32 %v546_v0  ;;  %v540_v2 = vsub.f32 %v484_v48, %v522_v1 }
 0x2d3   : > { %v550_v3 = vmul.f32 1.442695, %v540_v2 }
 0x2d4   : > { %v525_v4 = vpop.xlane.xlu0 %524  ;;  %v528_v5 = vpop.xlane.xlu1 %527 }
 0x2d5   : > { %1171 = vpow2.f32 %v550_v3  ;;  %v541_v6 = vsub.f32 %v1030_v47, %v525_v4  ;;  %v542_v7 = vsub.f32 %v494_v51, %v528_v5 }
 0x2d7   : > { %v552_v8 = vmul.f32 1.442695, %v541_v6  ;;  %v554_v9 = vmul.f32 1.442695, %v542_v7 }
 0x2d8   : > { %v531_v10 = vpop.xlane.xlu0 %530  ;;  %v534_v11 = vpop.xlane.xlu1 %533 }
 0x2d9   : > { %1173 = vpow2.f32 %v552_v8  ;;  %v543_v12 = vsub.f32 %v1033_v50, %v531_v10  ;;  %v544_v16 = vsub.f32 %v504_v55, %v534_v11 }
 0x2da   : > { %v1168_v13 = vpop.eup %1167  ;;  %1175 = vpow2.f32 %v554_v9 }
 0x2db   : > { %v1170_v14 = vpop.eup %1169  ;;  %v556_v15 = vmul.f32 1.442695, %v543_v12  ;;  %v565_v17 = vsel %vm513_vm2, %v1168_v13, 0.0  ;;  %v558_v33 = vmul.f32 1.442695, %v544_v16 }
 0x2dc   : > { %566 = vadd.xlane.f32.xlu0 %v565_v17  ;;  %v537_v19 = vpop.xlane.xlu0 %536  ;;  %v1149_v21 = vpop.permute.xlu1 %1148  ;;  %v562_v22 = vsel %vm513_vm2, %v1170_v14, 0.0 }
 0x2dd   : > { %1177 = vpow2.f32 %v556_v15  ;;  %v545_v24 = vsub.f32 %v1036_v54, %v537_v19  ;;  %v1151_v27 = vunpack.i.h.bf16 %v1149_v21  ;;  %v1150_v28 = vunpack.i.l.bf16 %v1149_v21  ;;  %563 = vadd.xlane.f32.xlu1 %v562_v22 }
 0x2df   : > { %v1172_v30 = vpop.eup %1171  ;;  %v560_v35 = vmul.f32 1.442695, %v545_v24  ;;  %v1089_v36 = vpack.c.bf16 %v1151_v27, %v1150_v28 }
 0x2e0   : > { %v568_v37 = vsel %vm513_vm2, %v1172_v30, 0.0 }
 0x2e1   : > { %1179 = vpow2.f32 %v560_v35  ;;  %569 = vadd.xlane.f32.xlu1 %v568_v37  ;;  %1090 = vmatprep.subr.bf16.mxu0 %v1089_v36 }
 0x2e2   : > { %1092 = vmatpush3.bf16.msra.mxu0 %v1089_v36  ;;  %1181 = vpow2.f32 %v558_v33 }
 0x2e3   : > { %v1174_v38 = vpop.eup %1173 }
 0x2e4   : > { %v1176_v39 = vpop.eup %1175  ;;  %v571_v40 = vsel %vm513_vm2, %v1174_v38, 0.0 }
 0x2e5   : > { %572 = vadd.xlane.f32.xlu0 %v571_v40  ;;  %v574_v41 = vsel %vm513_vm2, %v1176_v39, 0.0 }
 0x2e6   : > { %575 = vadd.xlane.f32.xlu1 %v574_v41 }
 0x2e7   : > { %v1178_v42 = vpop.eup %1177 }
 0x2e8   : > { %v577_v43 = vsel %vm513_vm2, %v1178_v42, 0.0 }
 0x2e9   : > { %578 = vadd.xlane.f32.xlu0 %v577_v43 }
 0x2eb   : > { %v1457_v44 = vpop.eup %1179 }
 0x2ec   : > { %v583_v45 = vsel %vm513_vm2, %v1457_v44, 0.0  ;;  %v1182_v46 = vpop.eup %1181 }
 0x2ed   : > { %584 = vadd.xlane.f32.xlu0 %v583_v45  ;;  %v580_v47 = vsel %vm513_vm2, %v1182_v46, 0.0 }
 0x2f1   : > { %581 = vadd.xlane.f32.xlu0 %v580_v47 }
 0x2f7   : > { %1158 = vrot.lane.b32.xlu1 %v1157_v29, %s1264_s11 }
 0x2fb   : > { %1163 = vrot.lane.b32.xlu1 %v1162_v34, %s1264_s11 }
 0x307   : > { %1153 = vrot.lane.b32.xlu0 %v1152_v23, %s1264_s11 }
 0x369   : > { %v567_v48 = vpop.xlane.xlu0 %566 }
 0x36a   : > { %1183 = vrcp.f32 %v567_v48  ;;  %v564_v49 = vpop.xlane.xlu1 %563 }
 0x36b   : > { %1185 = vrcp.f32 %v564_v49 }
 0x36e   : > { %v570_v50 = vpop.xlane.xlu1 %569 }
 0x36f   : > { %1187 = vrcp.f32 %v570_v50 }
 0x372   : > { %v573_v51 = vpop.xlane.xlu0 %572 }
 0x373   : > { %1189 = vrcp.f32 %v573_v51  ;;  %v576_v25 = vpop.xlane.xlu1 %575 }
 0x374   : > { %v1184_v26 = vpop.eup %1183  ;;  %1191 = vrcp.f32 %v576_v25 }
 0x375   : > { %v1186_v29 = vpop.eup %1185  ;;  %v589_v32 = vmul.f32 %v1184_v26, %v1168_v13 }
 0x376   : > { %v579_v52 = vpop.xlane.xlu0 %578  ;;  %v587_v31 = vmul.f32 %v1186_v29, %v1170_v14 }
 0x377   : > { %1193 = vrcp.f32 %v579_v52  ;;  %v603_v53 = vsel %vm513_vm2, %v589_v32, 0.0  ;;  %v1159_v55 = vpop.permute.xlu1 %1158 }
 0x378   : > { %1053 = vmatprep.mubr.msk.f32.mxu0 %vm513_vm2, %v587_v31  ;;  %v602_v34 = vsel %vm513_vm2, %v587_v31, 0.0  ;;  %v1161_v0 = vunpack.i.h.bf16 %v1159_v55  ;;  %v1160_v3 = vunpack.i.l.bf16 %v1159_v55 }
 0x379   : > { %v1188_v18 = vpop.eup %1187  ;;  %v604_v60 = vadd.f32 %v603_v53, %v602_v34 }
 0x37a   : > { %v585_v20 = vpop.xlane.xlu0 %584  ;;  %v591_v23 = vmul.f32 %v1188_v18, %v1172_v30  ;;  %v1097_v12 = vpack.c.bf16 %v1161_v0, %v1160_v3 }
 0x37b   : > { %1195 = vrcp.f32 %v585_v20  ;;  %v1164_v7 = vpop.permute.xlu1 %1163 }
 0x37c   : > { %v605_v57 = vsel %vm513_vm2, %v591_v23, 0.0  ;;  %v1166_v13 = vunpack.i.h.bf16 %v1164_v7  ;;  %v1165_v14 = vunpack.i.l.bf16 %v1164_v7 }
 0x37d   : > { %v1190_v54 = vpop.eup %1189  ;;  %v606_v63 = vadd.f32 %v605_v57, %v604_v60 }
 0x37e   : > { %v582_v56 = vpop.xlane.xlu0 %581  ;;  %v593_v58 = vmul.f32 %v1190_v54, %v1174_v38  ;;  %v1192_v59 = vpop.eup %1191  ;;  %v1101_v22 = vpack.c.bf16 %v1166_v13, %v1165_v14 }
 0x37f   : > { %1197 = vrcp.f32 %v582_v56  ;;  %v595_v2 = vmul.f32 %v1192_v59, %v1176_v39 }
 0x380   : > { %v607_v61 = vsel %vm513_vm2, %v593_v58, 0.0 }
 0x381   : > { %v1194_v62 = vpop.eup %1193  ;;  %v608_v6 = vadd.f32 %v607_v61, %v606_v63  ;;  %v609_v10 = vsel %vm513_vm2, %v595_v2, 0.0 }
 0x382   : > { %v1154_v1 = vpop.permute.xlu0 %1153  ;;  %v597_v8 = vmul.f32 %v1194_v62, %v1178_v42 }
 0x383   : > { %v1156_v4 = vunpack.i.h.bf16 %v1154_v1  ;;  %v1155_v5 = vunpack.i.l.bf16 %v1154_v1  ;;  %v610_v15 = vadd.f32 %v609_v10, %v608_v6 }
 0x384   : > { %v611_v16 = vsel %vm513_vm2, %v597_v8, 0.0 }
 0x385   : > { %v1093_v9 = vpack.c.bf16 %v1156_v4, %v1155_v5  ;;  %v1196_v11 = vpop.eup %1195  ;;  %v612_v24 = vadd.f32 %v611_v16, %v610_v15 }
 0x386   : > { %v601_v21 = vmul.f32 %v1196_v11, %v1457_v44 }
 0x387   : > { %1094 = vmatprep.subr.bf16.mxu0 %v1093_v9 }
 0x388   : > { %1096 = vmatpush3.bf16.msra.mxu0 %v1093_v9  ;;  %v615_v30 = vsel %vm513_vm2, %v601_v21, 0.0 }
 0x389   : > { %v1198_v17 = vpop.eup %1197  ;;  %1098 = vmatprep.subr.bf16.mxu0 %v1097_v12 }
 0x38a   : > { %v599_v19 = vmul.f32 %v1198_v17, %v1182_v46 }
 0x38c   : > { %1100 = vmatpush3.bf16.msra.mxu0 %v1097_v12  ;;  %v613_v27 = vsel %vm513_vm2, %v599_v19, 0.0 }
 0x38d   : > { %1102 = vmatprep.subr.bf16.mxu0 %v1101_v22  ;;  %v614_v28 = vadd.f32 %v613_v27, %v612_v24 }
 0x38f   : > { %v616_v33 = vadd.f32 %v615_v30, %v614_v28 }
 0x390   : > { %1104 = vmatpush3.bf16.msra.mxu0 %v1101_v22 }
 0x391   : > { %v617_v35 = vrot.slane %v616_v33, 4 }
 0x393   : > { %1054 = vmatmul.mubr.msk.f32.vlgmr.msra.gmra.mrb[8].mxu0 %vm513_vm2, %v589_v32  ;;  %v618_v36 = vadd.f32 %v617_v35, %v616_v33 }
 0x394   : > { %1056 = vmatprep.mubr.msk.f32.mxu0 %vm513_vm2, %v591_v23 }
 0x395   : > { %v619_v37 = vrot.slane %v618_v36, 2 }
 0x397   : > { %1057 = vmatmul.mubr.msk.f32.gmra.mrb[10].mxu0 %vm513_vm2, %v593_v58  ;;  %v620_v38 = vadd.f32 %v619_v37, %v618_v36 }
 0x398   : > { %1059 = vmatprep.mubr.msk.f32.mxu0 %vm513_vm2, %v595_v2 }
 0x399   : > { %v621_v39 = vrot.slane %v620_v38, 1 }
 0x39b   : > { %1060 = vmatmul.mubr.msk.f32.gmra.mrb[12].mxu0 %vm513_vm2, %v597_v8  ;;  %v622_v40 = vadd.f32 %v621_v39, %v620_v38 }
 0x39c   : > { %1062 = vmatprep.mubr.msk.f32.mxu0 %vm513_vm2, %v599_v19 }
 0x39d   : > { %624 = vst.msk [vmem:[%s196_s13] sm:$0x1] %vm623_vm3, %v622_v40 }
 0x39f   : > { %1063 = vmatmul.mubr.msk.f32.gmra.mrb[14].mxu0 %vm513_vm2, %v601_v21 }
 0x466   : > { %v1055_v41 = vpop.f32.mrb[8].mxu0 }
 0x467   : > { %v739_v42 = vpop.f32.mrb[9].mxu0 }
 0x468   : > { %778 = vxpose.xlu1.b32.start [1/8] (short) (narrow) %v739_v42, 8 }
 0x46a   : > { %v1058_v43 = vpop.f32.mrb[10].mxu0 }
 0x46b   : > { %v749_v44 = vpop.f32.mrb[11].mxu0 }
 0x46c   : > { %1212 = shalt.err (!%p1209_p3)
}
 0x46d   : > { %s1213_s7 = scalar_lea.hbm %s1496_s27, 16  ;;  %s1217_s10 = scalar_lea.hbm %s1547_s4, 64 }
 0x46e   : > { %p1214_p4 = scmp.ne.s32.totalorder %s1496_s27, %s1213_s7  ;;  %p1218_p9 = scmp.lt.u32.totalorder %s1496_s27, %s1547_s4 }
 0x46f   : > { %p1219_p10 = scmp.lt.u32.totalorder %s1217_s10, %s1213_s7  ;;  %p1221_p12 = scmp.lt.u32.totalorder %s1213_s7, %s1496_s27 }
 0x470   : > { %p1215_p7 = pnand %p1214_p4, %p1329_p5 }
 0x471   : > { %p1220_p11 = por %p1219_p10, %p1218_p9 }
 0x472   : > { %p1216_p8 = pneg %p1215_p7 }
 0x473   : > { %p1222_p13 = por %p1221_p12, %p1220_p11 }
 0x475   : > { %p1223_p0 = pnand %p1222_p13, %p1216_p8 }
 0x477   : > { %1226 = shalt.err (!%p1223_p0)
}
 0x478   : > { %1105 = dma.vmem_to_hbm [thread:$0]  (%p1329_p5), %s1498_s20, 16, %s1496_s27, %s816_s28   ;;  %779 = vxpose.xlu1.b32.cont [2/8] (short) (narrow) %v1055_v41, 8  ;;  %v1061_v45 = vpop.f32.mrb[12].mxu0 }
 0x479   : > { %v759_v46 = vpop.f32.mrb[13].mxu0  ;;  %s916_s13 = sshll.u32 %s1344_s29, 3 }
 0x47a   : > { %v1064_v47 = vpop.f32.mrb[14].mxu0  ;;  %s205_s25 = scalar_lea.vmem %s1546_s3, %s916_s13 }
 0x47b   : > { %v769_v48 = vpop.f32.mrb[15].mxu0 }
 0x47c   : > { %780 = vxpose.xlu1.b32.cont [3/8] (short) (narrow) %v749_v44, 8 }
 0x480   : > { %781 = vxpose.xlu1.b32.cont [4/8] (short) (narrow) %v1058_v43, 8 }
 0x484   : > { %782 = vxpose.xlu1.b32.cont [5/8] (short) (narrow) %v759_v46, 8 }
 0x488   : > { %783 = vxpose.xlu1.b32.cont [6/8] (short) (narrow) %v1061_v45, 8 }
 0x48c   : > { %784 = vxpose.xlu1.b32.cont [7/8] (short) (narrow) %v769_v48, 8 }
 0x490   : > { %785 = vxpose.xlu1.b32.end [8/8] (short) (narrow) %v1064_v47, 8 }
 0x4f4   : > { %v794_v49 = vpop.trf.xlu1 }
 0x4f5   : > { %810 = vst.msk [vmem:[%s205_s25] sm:$0xff] %vm513_vm2, %v794_v49 }
 0x4f6 PF: > { %p1111_p5 = scmp.ge.s32.totalorder %s1261_s18, 2  ;;  %s850_s20 = sand.u32 1, %s1249_s15  }
 0x4f7   : > { %s851_s23 = scalar_lea.sflag [#allocation3], %s850_s20 }
 0x4f8   : > { %p1108_p1 = pnand %p1111_p5, %p1333_p6 }
 0x4fa   : > { %1244 = dma.done.wait (!%p1108_p1), %s851_s23, 16  }
 0x4fb   : > { %1246 = vsyncadd (!%p1108_p1), %s851_s23, 4294967280  ;;  %p15_p2 = scmp.ge.s32.totalorder %s1316_s21, 6   ;;  %s1552_s15 = smov %s1253_s16 }
 0x4fc   : > { %s1553_s16 = smov %s1257_s17  ;;  %s1554_s17 = smov %s1327_s24 }
 0x4fd   : > { %s1555_s18 = smov %s1316_s21  ;;  %17 = sbr.rel (!%p15_p2) target bundleno = 3 (0x3), region = 79 }
 0x504   :  { %855 = vsyncpa [#allocation3], 1 }
 0x505   :  { %857 = vsyncpa [#allocation3 + $0x1], 1 }

// kernel: _lambda_.9
= control target key start
LH: loop header
LB: loop body
LE: loop exit
PB: predicated region body
PF: predicated region fallthrough
CT: control target
= control target key end

     0   :  { %s2081_s24 = smov 0   ;;  %s3233_s0 = inlined_call_operand.vmem [shape: f32[2,16,16,16], index: 0, kind: input, shape index: {}]   ;;  %s3234_s1 = inlined_call_operand.vmem [shape: f32[9,16], index: 1, kind: input, shape index: {}]   ;;  %s3235_s2 = inlined_call_operand.vmem [shape: f32[1,16], index: 2, kind: input, shape index: {}]   ;;  %s3236_s3 = inlined_call_operand.vmem [shape: f32[1,16], index: 3, kind: input, shape index: {}]   ;;  %s3237_s4 = inlined_call_operand.vmem [shape: bf16[16,16], index: 4, kind: input, shape index: {}]   ;;  %s3238_s5 = inlined_call_operand.vmem [shape: f32[1,16], index: 5, kind: input, shape index: {}]   ;;  %s3239_s6 = inlined_call_operand.vmem [shape: f32[1,16], index: 6, kind: input, shape index: {}]   ;;  %s3240_s7 = inlined_call_operand.vmem [shape: f32[2,16,16,16], index: 7, kind: output, shape index: {}]  }
   0x1 LB: > { %s1915_s25 = sadd.s32 4294967295, %s2038_s24   ;;  %p1919_p0 = scmp.ge.s32.totalorder %s2038_s24, 1  ;;  %s2038_s24 = sphi %s2081_s24, %s17_s24  }
   0x2   : > { %p237_p1 = scmp.lt.s32.totalorder %s2038_s24, 3 }
   0x4   : > { %p238_p2 = pnand %p1919_p0, %p237_p1 }
   0x5   : > { %v2020_v0 = vld [vmem:[%s3237_s4] sm:$0xff] (!%p238_p2)   ;;  %p269_p3 = scmp.lt.s32.totalorder (!%p238_p2), %s1915_s25, 1  ;;  %vm280_vm0 = vcmask (!%p238_p2), 130048   ;;  %vm283_vm1 = vcmask (!%p238_p2), 123904   ;;  %v2040_v1 = vmov (!%p238_p2), 0.0  }
   0x6   : > { %241 = sbr.rel (%p238_p2) target bundleno = 448 (0x1c0), region = 48  ;;  %1975 = vmatprep.subr.bf16.mxu0 (!%p238_p2), %v2020_v0  ;;  %2009 = vmatprep.subr.bf16.mxu1 (!%p238_p2), %v2020_v0  ;;  %281 = vst.msk [vmem:[#allocation2] sm:$0xff] (!%p238_p2), %vm280_vm0, %v2040_v1  ;;  %282 = vst.msk [vmem:[#allocation2 + $0x8] sm:$0xff] (!%p238_p2), %vm280_vm0, %v2040_v1  ;;  %v2159_v2 = vld [vmem:[%s3234_s1] ss:$0 sm:$0xff] (!%p238_p2) }
   0x7   : > { %284 = vst.msk [vmem:[#allocation2 + $0x10] sm:$0x3] (!%p238_p2), %vm283_vm1, %v2040_v1  ;;  %287 = vst.msk [vmem:[#allocation2 + $0x28] sm:$0x3] (!%p238_p2), %vm283_vm1, %v2040_v1  ;;  %1976 = vmatpush3.bf16.msra.mxu0 (!%p238_p2), %v2020_v0  ;;  %2010 = vmatpush3.bf16.msra.mxu1 (!%p238_p2), %v2020_v0  ;;  %v2164_v3 = vld [vmem:[%s3234_s1 + $0x1] ss:$0 sm:$0xff] (!%p238_p2) }
   0x8   : > { %285 = vst.msk [vmem:[#allocation2 + $0x18] sm:$0xff] (!%p238_p2), %vm280_vm0, %v2040_v1  ;;  %286 = vst.msk [vmem:[#allocation2 + $0x20] sm:$0xff] (!%p238_p2), %vm280_vm0, %v2040_v1  ;;  %v2172_v7 = vld [vmem:[%s3234_s1 + $0x2] ss:$0 sm:$0xff] (!%p238_p2)  ;;  %v2195_v23 = vld [vmem:[%s3234_s1 + $0x3] ss:$0 sm:$0xff] (!%p238_p2) }
   0x9   : > { %288 = vst.msk [vmem:[#allocation2 + $0x30] sm:$0xff] (!%p238_p2), %vm280_vm0, %v2040_v1  ;;  %289 = vst.msk [vmem:[#allocation2 + $0x38] sm:$0xff] (!%p238_p2), %vm280_vm0, %v2040_v1  ;;  %v2200_v24 = vld [vmem:[%s3234_s1 + $0x4] ss:$0 sm:$0xff] (!%p238_p2)  ;;  %v2208_v28 = vld [vmem:[%s3234_s1 + $0x5] ss:$0 sm:$0xff] (!%p238_p2) }
   0xa   : > { %290 = vst.msk [vmem:[#allocation2 + $0x40] sm:$0x3] (!%p238_p2), %vm283_vm1, %v2040_v1  ;;  %293 = vst.msk [vmem:[#allocation2 + $0x58] sm:$0x3] (!%p238_p2), %vm283_vm1, %v2040_v1  ;;  %v2216_v33 = vld [vmem:[%s3234_s1 + $0x6] ss:$0 sm:$0xff] (!%p238_p2) }
   0xb   : > { %291 = vst.msk [vmem:[#allocation2 + $0x48] sm:$0xff] (!%p238_p2), %vm280_vm0, %v2040_v1  ;;  %292 = vst.msk [vmem:[#allocation2 + $0x50] sm:$0xff] (!%p238_p2), %vm280_vm0, %v2040_v1  ;;  %v2227_v38 = vld [vmem:[%s3234_s1 + $0x7] ss:$0 sm:$0xff] (!%p238_p2)  ;;  %v2232_v39 = vld [vmem:[%s3234_s1 + $0x8] ss:$0 sm:$0xff] (!%p238_p2) }
   0xc   : > { %294 = vst.msk [vmem:[#allocation2 + $0x60] sm:$0xff] (!%p238_p2), %vm280_vm0, %v2040_v1  ;;  %295 = vst.msk [vmem:[#allocation2 + $0x68] sm:$0xff] (!%p238_p2), %vm280_vm0, %v2040_v1 }
   0xd   : > { %s3242_s25 = smov (!%p269_p3, %s1915_s25), 1  ;;  %296 = vst.msk [vmem:[#allocation2 + $0x70] sm:$0x3] %vm283_vm1, %v2040_v1  ;;  %299 = vst.msk [vmem:[#allocation2 + $0x88] sm:$0x3] %vm283_vm1, %v2040_v1  ;;  %v401_v14 = vld [vmem:[#allocation2] sm:$0xff] }
   0xe   : > { %297 = vst.msk [vmem:[#allocation2 + $0x78] sm:$0xff] %vm280_vm0, %v2040_v1  ;;  %298 = vst.msk [vmem:[#allocation2 + $0x80] sm:$0xff] %vm280_vm0, %v2040_v1  ;;  %s1956_s28 = sshll.u32 %s3242_s25, 8  ;;  %v402_v15 = vld [vmem:[#allocation2 + $0x8] sm:$0xff]  ;;  %v438_v17 = vmul.f32 %v2159_v2, %v401_v14 }
   0xf   : > { %300 = vst.msk [vmem:[#allocation2 + $0x90] sm:$0xff] %vm280_vm0, %v2040_v1  ;;  %301 = vst.msk [vmem:[#allocation2 + $0x98] sm:$0xff] %vm280_vm0, %v2040_v1  ;;  %s2154_s8 = scalar_lea.vmem %s3233_s0, %s1956_s28  ;;  %v502_v16 = vld [vmem:[#allocation2 + $0x1] sm:$0xff]  ;;  %v439_v18 = vmul.f32 %v2159_v2, %v402_v15  ;;  %v503_v19 = vld [vmem:[#allocation2 + $0x9] sm:$0xff]  ;;  %s3107_s19 = scalar_lea.vmem %s3240_s7, %s1956_s28 }
  0x10   : > { %302 = vst.msk [vmem:[#allocation2 + $0xa0] sm:$0x3] %vm283_vm1, %v2040_v1  ;;  %305 = vst.msk [vmem:[#allocation2 + $0xb8] sm:$0x3] %vm283_vm1, %v2040_v1  ;;  %v336_v4 = vld [vmem:[%s2154_s8] sm:$0xff]  ;;  %v337_v5 = vld [vmem:[%s2154_s8 + $0x8] sm:$0xff]  ;;  %v539_v20 = vmul.f32 %v2164_v3, %v502_v16  ;;  %v540_v25 = vmul.f32 %v2164_v3, %v503_v19 }
  0x11   : > { %303 = vst.msk [vmem:[#allocation2 + $0xa8] sm:$0xff] %vm280_vm0, %v2040_v1  ;;  %304 = vst.msk [vmem:[#allocation2 + $0xb0] sm:$0xff] %vm280_vm0, %v2040_v1  ;;  %v338_v6 = vld [vmem:[%s2154_s8 + $0x10] sm:$0xff]  ;;  %v339_v8 = vld [vmem:[%s2154_s8 + $0x18] sm:$0xff] }
  0x12   : > { %306 = vst.msk [vmem:[#allocation2 + $0xc0] sm:$0xff] %vm280_vm0, %v2040_v1  ;;  %307 = vst.msk [vmem:[#allocation2 + $0xc8] sm:$0xff] %vm280_vm0, %v2040_v1  ;;  %v340_v9 = vld [vmem:[%s2154_s8 + $0x20] sm:$0xff]  ;;  %v341_v10 = vld [vmem:[%s2154_s8 + $0x28] sm:$0xff]  ;;  %v571_v32 = vadd.f32 %v539_v20, %v438_v17  ;;  %v572_v37 = vadd.f32 %v540_v25, %v439_v18 }
  0x13   : > { %308 = vst.msk [vmem:[#allocation2 + $0xd0] sm:$0x3] %vm283_vm1, %v2040_v1  ;;  %311 = vst.msk [vmem:[#allocation2 + $0xe8] sm:$0x3] %vm283_vm1, %v2040_v1  ;;  %v350_v11 = vld [vmem:[%s2154_s8 + $0x70] sm:$0xff]  ;;  %v351_v12 = vld [vmem:[%s2154_s8 + $0x78] sm:$0xff] }
  0x14   : > { %309 = vst.msk [vmem:[#allocation2 + $0xd8] sm:$0xff] %vm280_vm0, %v2040_v1  ;;  %310 = vst.msk [vmem:[#allocation2 + $0xe0] sm:$0xff] %vm280_vm0, %v2040_v1  ;;  %v352_v13 = vld [vmem:[%s2154_s8 + $0x80] sm:$0xff]  ;;  %v604_v22 = vld [vmem:[#allocation2 + $0xa] sm:$0xff] }
  0x15   : > { %312 = vst.msk [vmem:[#allocation2 + $0xf0] sm:$0xff] %vm280_vm0, %v2040_v1  ;;  %313 = vst.msk [vmem:[#allocation2 + $0xf8] sm:$0xff] %vm280_vm0, %v2040_v1  ;;  %v603_v21 = vld [vmem:[#allocation2 + $0x2] sm:$0xff]  ;;  %v641_v27 = vmul.f32 %v2172_v7, %v604_v22  ;;  %v354_v30 = vld [vmem:[%s2154_s8 + $0x90] sm:$0xff] }
  0x16   : > { %314 = vst.msk [vmem:[#allocation2 + $0x100] sm:$0x3] %vm283_vm1, %v2040_v1  ;;  %317 = vst.msk [vmem:[#allocation2 + $0x118] sm:$0x3] %vm283_vm1, %v2040_v1  ;;  %v640_v26 = vmul.f32 %v2172_v7, %v603_v21  ;;  %v353_v29 = vld [vmem:[%s2154_s8 + $0x88] sm:$0xff]  ;;  %v355_v31 = vld [vmem:[%s2154_s8 + $0x98] sm:$0xff] }
  0x17   : > { %315 = vst.msk [vmem:[#allocation2 + $0x108] sm:$0xff] %vm280_vm0, %v2040_v1  ;;  %316 = vst.msk [vmem:[#allocation2 + $0x110] sm:$0xff] %vm280_vm0, %v2040_v1  ;;  %v356_v34 = vld [vmem:[%s2154_s8 + $0xa0] sm:$0xff]  ;;  %v357_v35 = vld [vmem:[%s2154_s8 + $0xa8] sm:$0xff]  ;;  %v673_v47 = vadd.f32 %v641_v27, %v572_v37 }
  0x18   : > { %318 = vst.msk [vmem:[#allocation2 + $0x120] sm:$0xff] %vm280_vm0, %v2040_v1  ;;  %319 = vst.msk [vmem:[#allocation2 + $0x128] sm:$0xff] %vm280_vm0, %v2040_v1  ;;  %v342_v36 = vld [vmem:[%s2154_s8 + $0x30] sm:$0xff]  ;;  %v343_v40 = vld [vmem:[%s2154_s8 + $0x38] sm:$0xff]  ;;  %v672_v43 = vadd.f32 %v640_v26, %v571_v32 }
  0x19   : > { %320 = vst.msk [vmem:[#allocation2 + $0x130] sm:$0x3] %vm283_vm1, %v2040_v1  ;;  %323 = vst.msk [vmem:[#allocation2 + $0x148] sm:$0x3] %vm283_vm1, %v2040_v1  ;;  %v344_v41 = vld [vmem:[%s2154_s8 + $0x40] sm:$0xff]  ;;  %v345_v42 = vld [vmem:[%s2154_s8 + $0x48] sm:$0xff] }
  0x1a   : > { %321 = vst.msk [vmem:[#allocation2 + $0x138] sm:$0xff] %vm280_vm0, %v2040_v1  ;;  %322 = vst.msk [vmem:[#allocation2 + $0x140] sm:$0xff] %vm280_vm0, %v2040_v1 }
  0x1b   : > { %324 = vst.msk [vmem:[#allocation2 + $0x150] sm:$0xff] %vm280_vm0, %v2040_v1  ;;  %325 = vst.msk [vmem:[#allocation2 + $0x158] sm:$0xff] %vm280_vm0, %v2040_v1 }
  0x1c   : > { %326 = vst.msk [vmem:[#allocation2 + $0x160] sm:$0x3] %vm283_vm1, %v2040_v1  ;;  %329 = vst.msk [vmem:[#allocation2 + $0x178] sm:$0x3] %vm283_vm1, %v2040_v1 }
  0x1d   : > { %327 = vst.msk [vmem:[#allocation2 + $0x168] sm:$0xff] %vm280_vm0, %v2040_v1  ;;  %328 = vst.msk [vmem:[#allocation2 + $0x170] sm:$0xff] %vm280_vm0, %v2040_v1 }
  0x1e   : > { %330 = vst.msk [vmem:[#allocation2 + $0x180] sm:$0xff] %vm280_vm0, %v2040_v1  ;;  %331 = vst.msk [vmem:[#allocation2 + $0x188] sm:$0xff] %vm280_vm0, %v2040_v1 }
  0x1f   : > { %332 = vst.msk [vmem:[#allocation2 + $0x190] sm:$0x3] %vm283_vm1, %v2040_v1  ;;  %335 = vst.msk [vmem:[#allocation2 + $0x1a8] sm:$0x3] %vm283_vm1, %v2040_v1 }
  0x20   : > { %333 = vst.msk [vmem:[#allocation2 + $0x198] sm:$0xff] %vm280_vm0, %v2040_v1  ;;  %334 = vst.msk [vmem:[#allocation2 + $0x1a0] sm:$0xff] %vm280_vm0, %v2040_v1 }
  0x21   : > { %369 = vst.msk [vmem:[#allocation2 + $0x19] sm:$0xff] %vm280_vm0, %v336_v4  ;;  %370 = vst.msk [vmem:[#allocation2 + $0x21] sm:$0xff] %vm280_vm0, %v337_v5 }
  0x22   : > { %371 = vst.msk [vmem:[#allocation2 + $0x31] sm:$0xff] %vm280_vm0, %v338_v6  ;;  %372 = vst.msk [vmem:[#allocation2 + $0x39] sm:$0xff] %vm280_vm0, %v339_v8 }
  0x23   : > { %373 = vst.msk [vmem:[#allocation2 + $0x49] sm:$0xff] %vm280_vm0, %v340_v9  ;;  %374 = vst.msk [vmem:[#allocation2 + $0x51] sm:$0xff] %vm280_vm0, %v341_v10 }
  0x24   : > { %383 = vst.msk [vmem:[#allocation2 + $0xc1] sm:$0xff] %vm280_vm0, %v350_v11  ;;  %384 = vst.msk [vmem:[#allocation2 + $0xc9] sm:$0xff] %vm280_vm0, %v351_v12 }
  0x25   : > { %385 = vst.msk [vmem:[#allocation2 + $0xd9] sm:$0xff] %vm280_vm0, %v352_v13  ;;  %386 = vst.msk [vmem:[#allocation2 + $0xe1] sm:$0xff] %vm280_vm0, %v353_v29 }
  0x26   : > { %387 = vst.msk [vmem:[#allocation2 + $0xf1] sm:$0xff] %vm280_vm0, %v354_v30  ;;  %388 = vst.msk [vmem:[#allocation2 + $0xf9] sm:$0xff] %vm280_vm0, %v355_v31 }
  0x27   : > { %389 = vst.msk [vmem:[#allocation2 + $0x109] sm:$0xff] %vm280_vm0, %v356_v34  ;;  %390 = vst.msk [vmem:[#allocation2 + $0x111] sm:$0xff] %vm280_vm0, %v357_v35 }
  0x28   : > { %375 = vst.msk [vmem:[#allocation2 + $0x61] sm:$0xff] %vm280_vm0, %v342_v36  ;;  %v704_v44 = vld [vmem:[#allocation2 + $0x18] sm:$0xff]  ;;  %v705_v45 = vld [vmem:[#allocation2 + $0x20] sm:$0xff]  ;;  %376 = vst.msk [vmem:[#allocation2 + $0x69] sm:$0xff] %vm280_vm0, %v343_v40 }
  0x29   : > { %v805_v46 = vld [vmem:[#allocation2 + $0x19] sm:$0xff]  ;;  %377 = vst.msk [vmem:[#allocation2 + $0x79] sm:$0xff] %vm280_vm0, %v344_v41  ;;  %378 = vst.msk [vmem:[#allocation2 + $0x81] sm:$0xff] %vm280_vm0, %v345_v42  ;;  %v741_v48 = vmul.f32 %v2195_v23, %v704_v44  ;;  %v742_v49 = vmul.f32 %v2195_v23, %v705_v45  ;;  %v806_v50 = vld [vmem:[#allocation2 + $0x21] sm:$0xff]  ;;  %v440_v60 = vmul.f32 %v2159_v2, %v704_v44 }
  0x2a   : > { %v842_v51 = vmul.f32 %v2200_v24, %v805_v46  ;;  %v906_v52 = vld [vmem:[#allocation2 + $0x1a] sm:$0xff]  ;;  %v907_v53 = vld [vmem:[#allocation2 + $0x22] sm:$0xff]  ;;  %v843_v54 = vmul.f32 %v2200_v24, %v806_v50  ;;  %v2249_v57 = vld [vmem:[#allocation2 + $0x30] sm:$0xff]  ;;  %v441_v13 = vmul.f32 %v2159_v2, %v705_v45  ;;  %v541_v14 = vmul.f32 %v2164_v3, %v805_v46 }
  0x2b   : > { %v943_v55 = vmul.f32 %v2208_v28, %v906_v52  ;;  %v944_v56 = vmul.f32 %v2208_v28, %v907_v53  ;;  %v2251_v58 = vld [vmem:[#allocation2 + $0x38] sm:$0xff]  ;;  %v773_v61 = vadd.f32 %v741_v48, %v672_v43  ;;  %v774_v62 = vadd.f32 %v742_v49, %v673_v47  ;;  %v2289_v30 = vld [vmem:[#allocation2 + $0x48] sm:$0xff]  ;;  %v2291_v31 = vld [vmem:[#allocation2 + $0x50] sm:$0xff] }
  0x2c   : > { %v2253_v59 = vld [vmem:[#allocation2 + $0x31] sm:$0xff]  ;;  %v1045_v63 = vmul.f32 %v2216_v33, %v2249_v57  ;;  %v1046_v0 = vmul.f32 %v2216_v33, %v2251_v58  ;;  %v2260_v1 = vld [vmem:[#allocation2 + $0x39] sm:$0xff]  ;;  %v542_v15 = vmul.f32 %v2164_v3, %v806_v50  ;;  %v642_v16 = vmul.f32 %v2172_v7, %v906_v52  ;;  %v2295_v37 = vld [vmem:[#allocation2 + $0x49] sm:$0xff] }
  0x2d   : > { %v2262_v4 = vld [vmem:[#allocation2 + $0x32] sm:$0xff]  ;;  %v2264_v5 = vld [vmem:[#allocation2 + $0x3a] sm:$0xff]  ;;  %v1146_v6 = vmul.f32 %v2227_v38, %v2253_v59  ;;  %v1147_v8 = vmul.f32 %v2227_v38, %v2260_v1  ;;  %v874_v11 = vadd.f32 %v842_v51, %v773_v61  ;;  %v875_v12 = vadd.f32 %v843_v54, %v774_v62  ;;  %v2305_v46 = vld [vmem:[#allocation2 + $0x4a] sm:$0xff] }
  0x2e   : > { %v1247_v9 = vmul.f32 %v2232_v39, %v2262_v4  ;;  %v1248_v10 = vmul.f32 %v2232_v39, %v2264_v5  ;;  %v643_v17 = vmul.f32 %v2172_v7, %v907_v53  ;;  %v743_v18 = vmul.f32 %v2195_v23, %v2249_v57  ;;  %v2297_v40 = vld [vmem:[#allocation2 + $0x51] sm:$0xff]  ;;  %v417_v41 = vld [vmem:[#allocation2 + $0xc0] sm:$0xff]  ;;  %v418_v48 = vld [vmem:[#allocation2 + $0xc8] sm:$0xff] }
  0x2f   : > { %v975_v19 = vadd.f32 %v943_v55, %v874_v11  ;;  %v976_v20 = vadd.f32 %v944_v56, %v875_v12  ;;  %v573_v21 = vadd.f32 %v541_v14, %v440_v60  ;;  %v744_v22 = vmul.f32 %v2195_v23, %v2251_v58  ;;  %v2307_v47 = vld [vmem:[#allocation2 + $0x52] sm:$0xff]  ;;  %v518_v53 = vld [vmem:[#allocation2 + $0xc1] sm:$0xff]  ;;  %v519_v54 = vld [vmem:[#allocation2 + $0xc9] sm:$0xff] }
  0x30   : > { %v574_v25 = vadd.f32 %v542_v15, %v441_v13  ;;  %v844_v26 = vmul.f32 %v2200_v24, %v2253_v59  ;;  %v845_v27 = vmul.f32 %v2200_v24, %v2260_v1  ;;  %v945_v29 = vmul.f32 %v2208_v28, %v2262_v4  ;;  %v619_v55 = vld [vmem:[#allocation2 + $0xc2] sm:$0xff]  ;;  %v2314_v56 = vld [vmem:[%s3235_s2] ss:$0 sm:$0xff] }
  0x31   : > { %v1077_v32 = vadd.f32 %v1045_v63, %v975_v19  ;;  %v1078_v34 = vadd.f32 %v1046_v0, %v976_v20  ;;  %v674_v35 = vadd.f32 %v642_v16, %v573_v21  ;;  %v946_v36 = vmul.f32 %v2208_v28, %v2264_v5  ;;  %v620_v0 = vld [vmem:[#allocation2 + $0xca] sm:$0xff]  ;;  %v2327_v13 = vld [vmem:[%s3236_s3] ss:$0 sm:$0xff]  ;;  %v2335_v20 = vld [vmem:[#allocation2 + $0xd8] sm:$0xff] }
  0x32   : > { %v675_v42 = vadd.f32 %v643_v17, %v574_v25  ;;  %v1047_v43 = vmul.f32 %v2216_v33, %v2289_v30  ;;  %v1048_v44 = vmul.f32 %v2216_v33, %v2291_v31  ;;  %v1148_v45 = vmul.f32 %v2227_v38, %v2295_v37 }
  0x33   : > { %v1178_v49 = vadd.f32 %v1146_v6, %v1077_v32  ;;  %v1179_v50 = vadd.f32 %v1147_v8, %v1078_v34  ;;  %v775_v51 = vadd.f32 %v743_v18, %v674_v35  ;;  %v1149_v52 = vmul.f32 %v2227_v38, %v2297_v40 }
  0x34   : > { %v776_v60 = vadd.f32 %v744_v22, %v675_v42  ;;  %v1249_v61 = vmul.f32 %v2232_v39, %v2305_v46  ;;  %v2320_v62 = vmul.f32 %v2232_v39, %v2307_v47  ;;  %v454_v63 = vmul.f32 %v2159_v2, %v417_v41  ;;  %v2345_v41 = vld [vmem:[#allocation2 + $0xd9] sm:$0xff] }
  0x35   : > { %v1279_v6 = vadd.f32 %v1247_v9, %v1178_v49  ;;  %v1280_v8 = vadd.f32 %v1248_v10, %v1179_v50  ;;  %v876_v11 = vadd.f32 %v844_v26, %v775_v51  ;;  %v455_v12 = vmul.f32 %v2159_v2, %v418_v48  ;;  %v2337_v26 = vld [vmem:[#allocation2 + $0xe0] sm:$0xff] }
  0x36   : > { %v877_v14 = vadd.f32 %v845_v27, %v776_v60  ;;  %v555_v15 = vmul.f32 %v2164_v3, %v518_v53  ;;  %v556_v16 = vmul.f32 %v2164_v3, %v519_v54  ;;  %v656_v17 = vmul.f32 %v2172_v7, %v619_v55  ;;  %v2349_v42 = vld [vmem:[#allocation2 + $0xda] sm:$0xff]  ;;  %v2353_v53 = vld [vmem:[#allocation2 + $0xe2] sm:$0xff] }
  0x37   : > { %v1318_v18 = vmul.f32 %v2314_v56, %v1279_v6  ;;  %v1319_v9 = vmul.f32 %v2314_v56, %v1280_v8  ;;  %v977_v10 = vadd.f32 %v945_v29, %v876_v11  ;;  %v657_v19 = vmul.f32 %v2172_v7, %v620_v0  ;;  %v359_v54 = vld [vmem:[%s2154_s8 + $0xb8] sm:$0xff]  ;;  %v360_v55 = vld [vmem:[%s2154_s8 + $0xc0] sm:$0xff]  ;;  %v361_v8 = vld [vmem:[%s2154_s8 + $0xc8] sm:$0xff] }
  0x38   : > { %v978_v21 = vadd.f32 %v946_v36, %v877_v14  ;;  %v587_v22 = vadd.f32 %v555_v15, %v454_v63  ;;  %v588_v25 = vadd.f32 %v556_v16, %v455_v12  ;;  %v757_v27 = vmul.f32 %v2195_v23, %v2335_v20  ;;  %v2347_v36 = vld [vmem:[#allocation2 + $0xe1] sm:$0xff]  ;;  %392 = vst.msk [vmem:[#allocation2 + $0x129] sm:$0xff] %vm280_vm0, %v359_v54  ;;  %v346_v11 = vld [vmem:[%s2154_s8 + $0x50] sm:$0xff]  ;;  %v347_v12 = vld [vmem:[%s2154_s8 + $0x58] sm:$0xff] }
  0x39   : > { %v1357_v32 = vadd.f32 %v2327_v13, %v1318_v18  ;;  %v1358_v34 = vadd.f32 %v2327_v13, %v1319_v9  ;;  %v1079_v29 = vadd.f32 %v1047_v43, %v977_v10  ;;  %v758_v35 = vmul.f32 %v2195_v23, %v2337_v26  ;;  %v358_v43 = vld [vmem:[%s2154_s8 + $0xb0] sm:$0xff]  ;;  %393 = vst.msk [vmem:[#allocation2 + $0x139] sm:$0xff] %vm280_vm0, %v360_v55  ;;  %v349_v18 = vld [vmem:[%s2154_s8 + $0x68] sm:$0xff] }
  0x3a   : > { %v1080_v48 = vadd.f32 %v1048_v44, %v978_v21  ;;  %v688_v49 = vadd.f32 %v656_v17, %v587_v22  ;;  %v689_v50 = vadd.f32 %v657_v19, %v588_v25  ;;  %v858_v51 = vmul.f32 %v2200_v24, %v2345_v41  ;;  %v2360_v44 = vld [vmem:[#allocation2 + $0xf0] sm:$0xff]  ;;  %391 = vst.msk [vmem:[#allocation2 + $0x121] sm:$0xff] %vm280_vm0, %v358_v43  ;;  %v348_v17 = vld [vmem:[%s2154_s8 + $0x60] sm:$0xff]  ;;  %v363_v22 = vld [vmem:[%s2154_s8 + $0xd8] sm:$0xff] }
  0x3b   : > { %v1389_v60 = vmax.f32 %v1357_v32, 0.0  ;;  %v1390_v63 = vmax.f32 %v1358_v34, 0.0  ;;  %v1180_v0 = vadd.f32 %v1148_v45, %v1079_v29  ;;  %v859_v6 = vmul.f32 %v2200_v24, %v2347_v36  ;;  %394 = vst.msk [vmem:[#allocation2 + $0x141] sm:$0xff] %vm280_vm0, %v361_v8  ;;  %379 = vst.msk [vmem:[#allocation2 + $0x91] sm:$0xff] %vm280_vm0, %v346_v11  ;;  %v362_v9 = vld [vmem:[%s2154_s8 + $0xd0] sm:$0xff]  ;;  %v364_v25 = vld [vmem:[%s2154_s8 + $0xe0] sm:$0xff] }
  0x3c   : > { %v1181_v14 = vadd.f32 %v1149_v52, %v1080_v48  ;;  %v789_v45 = vadd.f32 %v757_v27, %v688_v49  ;;  %v790_v15 = vadd.f32 %v758_v35, %v689_v50  ;;  %v959_v16 = vmul.f32 %v2208_v28, %v2349_v42  ;;  %380 = vst.msk [vmem:[#allocation2 + $0x99] sm:$0xff] %vm280_vm0, %v347_v12  ;;  %v365_v27 = vld [vmem:[%s2154_s8 + $0xe8] sm:$0xff]  ;;  %v2385_v35 = vld [vmem:[#allocation2 + $0xf8] sm:$0xff] }
  0x3d   : > { %v1421_v10 = vmin.f32 %v1389_v60, 6.0  ;;  %v1422_v19 = vmin.f32 %v1390_v63, 6.0  ;;  %v1281_v52 = vadd.f32 %v1249_v61, %v1180_v0  ;;  %v960_v21 = vmul.f32 %v2208_v28, %v2353_v53  ;;  %381 = vst.msk [vmem:[#allocation2 + $0xa9] sm:$0xff] %vm280_vm0, %v348_v17  ;;  %382 = vst.msk [vmem:[#allocation2 + $0xb1] sm:$0xff] %vm280_vm0, %v349_v18  ;;  %v2389_v48 = vld [vmem:[#allocation2 + $0xf1] sm:$0xff] }
  0x3e   : > { %395 = vst.msk [vmem:[#allocation2 + $0x151] sm:$0xff] %vm280_vm0, %v362_v9  ;;  %v1282_v32 = vadd.f32 %v2320_v62, %v1181_v14  ;;  %v890_v34 = vadd.f32 %v858_v51, %v789_v45  ;;  %v891_v29 = vadd.f32 %v859_v6, %v790_v15  ;;  %v1061_v61 = vmul.f32 %v2216_v33, %v2360_v44  ;;  %v2397_v51 = vld [vmem:[#allocation2 + $0xf9] sm:$0xff] }
  0x3f   : > { %396 = vst.msk [vmem:[#allocation2 + $0x159] sm:$0xff] %vm280_vm0, %v363_v22  ;;  %397 = vst.msk [vmem:[#allocation2 + $0x169] sm:$0xff] %vm280_vm0, %v364_v25  ;;  %v1453_v49 = vpack.c.bf16 %v1422_v19, %v1421_v10  ;;  %v1320_v50 = vmul.f32 %v2314_v56, %v1281_v52  ;;  %v1062_v62 = vmul.f32 %v2216_v33, %v2385_v35  ;;  %v2404_v0 = vld [vmem:[#allocation2 + $0xf2] sm:$0xff]  ;;  %v2406_v6 = vld [vmem:[#allocation2 + $0xfa] sm:$0xff] }
  0x40   : > { %398 = vst.msk [vmem:[#allocation2 + $0x171] sm:$0xff] %vm280_vm0, %v365_v27  ;;  %v1162_v43 = vmul.f32 %v2227_v38, %v2389_v48  ;;  %v1321_v54 = vmul.f32 %v2314_v56, %v1282_v32  ;;  %v991_v55 = vadd.f32 %v959_v16, %v890_v34  ;;  %v992_v60 = vadd.f32 %v960_v21, %v891_v29 }
  0x41   : > { %v1163_v63 = vmul.f32 %v2227_v38, %v2397_v51  ;;  %1977 = vmatprep.mubr.msk.bf16.mxu0 %vm280_vm0, %v1453_v49  ;;  %v1359_v8 = vadd.f32 %v2327_v13, %v1320_v50  ;;  %v1263_v11 = vmul.f32 %v2232_v39, %v2404_v0  ;;  %v1264_v12 = vmul.f32 %v2232_v39, %v2406_v6 }
  0x42   : > { %v456_v14 = vmul.f32 %v2159_v2, %v2335_v20  ;;  %v1360_v45 = vadd.f32 %v2327_v13, %v1321_v54  ;;  %v1093_v15 = vadd.f32 %v1061_v61, %v991_v55  ;;  %v1094_v16 = vadd.f32 %v1062_v62, %v992_v60  ;;  %v2439_v55 = vld [vmem:[#allocation2 + $0x108] sm:$0xff] }
  0x43   : > { %v457_v17 = vmul.f32 %v2159_v2, %v2337_v26  ;;  %v1391_v18 = vmax.f32 %v1359_v8, 0.0  ;;  %v557_v9 = vmul.f32 %v2164_v3, %v2345_v41  ;;  %v558_v10 = vmul.f32 %v2164_v3, %v2347_v36 }
  0x44   : > { %v658_v19 = vmul.f32 %v2172_v7, %v2349_v42  ;;  %v1392_v52 = vmax.f32 %v1360_v45, 0.0  ;;  %v1194_v21 = vadd.f32 %v1162_v43, %v1093_v15  ;;  %v1195_v20 = vadd.f32 %v1163_v63, %v1094_v16 }
  0x45   : > { %v659_v22 = vmul.f32 %v2172_v7, %v2353_v53  ;;  %v1423_v25 = vmin.f32 %v1391_v18, 6.0  ;;  %v589_v27 = vadd.f32 %v557_v9, %v456_v14  ;;  %v590_v32 = vadd.f32 %v558_v10, %v457_v17  ;;  %v2447_v14 = vld [vmem:[#allocation2 + $0x109] sm:$0xff]  ;;  %v2454_v17 = vld [vmem:[#allocation2 + $0x111] sm:$0xff] }
  0x46   : > { %v759_v26 = vmul.f32 %v2195_v23, %v2360_v44  ;;  %v1424_v34 = vmin.f32 %v1392_v52, 6.0  ;;  %v1295_v41 = vadd.f32 %v1263_v11, %v1194_v21  ;;  %v1296_v29 = vadd.f32 %v1264_v12, %v1195_v20  ;;  %v2443_v11 = vld [vmem:[#allocation2 + $0x110] sm:$0xff] }
  0x47   : > { %v760_v36 = vmul.f32 %v2195_v23, %v2385_v35  ;;  %v690_v61 = vadd.f32 %v658_v19, %v589_v27  ;;  %v691_v42 = vadd.f32 %v659_v22, %v590_v32  ;;  %v860_v49 = vmul.f32 %v2200_v24, %v2389_v48  ;;  %v2458_v9 = vld [vmem:[#allocation2 + $0x10a] sm:$0xff]  ;;  %v2462_v21 = vld [vmem:[#allocation2 + $0x112] sm:$0xff] }
  0x48   : > { %v861_v53 = vmul.f32 %v2200_v24, %v2397_v51  ;;  %v1454_v50 = vpack.c.bf16 %v1424_v34, %v1423_v25  ;;  %v1334_v62 = vmul.f32 %v2314_v56, %v1295_v41  ;;  %v1335_v43 = vmul.f32 %v2314_v56, %v1296_v29 }
  0x49   : > { %v961_v54 = vmul.f32 %v2208_v28, %v2404_v0  ;;  %v791_v60 = vadd.f32 %v759_v26, %v690_v61  ;;  %v792_v63 = vadd.f32 %v760_v36, %v691_v42  ;;  %v962_v8 = vmul.f32 %v2208_v28, %v2406_v6 }
  0x4a   : > { %v1063_v12 = vmul.f32 %v2216_v33, %v2439_v55  ;;  %1978 = vmatmul.mubr.msk.bf16.vlgmr.msra.gmra.mrb[0].mxu0 %vm280_vm0, %v1454_v50  ;;  %v1373_v45 = vadd.f32 %v2327_v13, %v1334_v62  ;;  %v1374_v15 = vadd.f32 %v2327_v13, %v1335_v43  ;;  %v1064_v16 = vmul.f32 %v2216_v33, %v2443_v11  ;;  %v367_v50 = vld [vmem:[%s2154_s8 + $0xf8] sm:$0xff] }
  0x4b   : > { %v1164_v18 = vmul.f32 %v2227_v38, %v2447_v14  ;;  %v892_v10 = vadd.f32 %v860_v49, %v791_v60  ;;  %v893_v19 = vadd.f32 %v861_v53, %v792_v63  ;;  %v1165_v52 = vmul.f32 %v2227_v38, %v2454_v17  ;;  %v366_v53 = vld [vmem:[%s2154_s8 + $0xf0] sm:$0xff]  ;;  %400 = vst.msk [vmem:[#allocation2 + $0x189] sm:$0xff] %vm280_vm0, %v367_v50 }
  0x4c   : > { %v1265_v20 = vmul.f32 %v2232_v39, %v2458_v9  ;;  %v1405_v22 = vmax.f32 %v1373_v45, 0.0  ;;  %v1406_v25 = vmax.f32 %v1374_v15, 0.0  ;;  %v1266_v27 = vmul.f32 %v2232_v39, %v2462_v21  ;;  %399 = vst.msk [vmem:[#allocation2 + $0x181] sm:$0xff] %vm280_vm0, %v366_v53 }
  0x4d   : > { %v442_v32 = vmul.f32 %v2159_v2, %v2249_v57  ;;  %v993_v26 = vadd.f32 %v961_v54, %v892_v10  ;;  %v994_v34 = vadd.f32 %v962_v8, %v893_v19  ;;  %v443_v41 = vmul.f32 %v2159_v2, %v2251_v58  ;;  %v2497_v10 = vld [vmem:[#allocation2 + $0x60] sm:$0xff] }
  0x4e   : > { %v543_v29 = vmul.f32 %v2164_v3, %v2253_v59  ;;  %v1437_v36 = vmin.f32 %v1405_v22, 6.0  ;;  %v1438_v61 = vmin.f32 %v1406_v25, 6.0  ;;  %v544_v42 = vmul.f32 %v2164_v3, %v2260_v1  ;;  %v2499_v22 = vld [vmem:[#allocation2 + $0x68] sm:$0xff] }
  0x4f   : > { %v644_v49 = vmul.f32 %v2172_v7, %v2262_v4  ;;  %v1095_v62 = vadd.f32 %v1063_v12, %v993_v26  ;;  %v1096_v57 = vadd.f32 %v1064_v16, %v994_v34  ;;  %v645_v54 = vmul.f32 %v2172_v7, %v2264_v5  ;;  %v2505_v26 = vld [vmem:[#allocation2 + $0x69] sm:$0xff] }
  0x50   : > { %v575_v43 = vadd.f32 %v543_v29, %v442_v32  ;;  %v1461_v58 = vpack.c.bf16 %v1438_v61, %v1437_v36  ;;  %v576_v59 = vadd.f32 %v544_v42, %v443_v41  ;;  %v745_v1 = vmul.f32 %v2195_v23, %v2289_v30  ;;  %v2503_v32 = vld [vmem:[#allocation2 + $0x61] sm:$0xff] }
  0x51   : > { %v746_v4 = vmul.f32 %v2195_v23, %v2291_v31  ;;  %v1196_v60 = vadd.f32 %v1164_v18, %v1095_v62  ;;  %v1197_v63 = vadd.f32 %v1165_v52, %v1096_v57  ;;  %v846_v12 = vmul.f32 %v2200_v24, %v2295_v37 }
  0x52   : > { %v676_v8 = vadd.f32 %v644_v49, %v575_v43  ;;  %1993 = vmatprep.mubr.msk.bf16.mxu1 %vm280_vm0, %v1461_v58  ;;  %v677_v5 = vadd.f32 %v645_v54, %v576_v59  ;;  %v847_v45 = vmul.f32 %v2200_v24, %v2297_v40  ;;  %v947_v15 = vmul.f32 %v2208_v28, %v2305_v46  ;;  %v2517_v49 = vld [vmem:[#allocation2 + $0x6a] sm:$0xff] }
  0x53   : > { %v948_v16 = vmul.f32 %v2208_v28, %v2307_v47  ;;  %v1297_v18 = vadd.f32 %v1265_v20, %v1196_v60  ;;  %v1298_v19 = vadd.f32 %v1266_v27, %v1197_v63  ;;  %v1049_v25 = vmul.f32 %v2216_v33, %v2497_v10  ;;  %v2513_v27 = vld [vmem:[#allocation2 + $0x62] sm:$0xff] }
  0x54   : > { %v777_v52 = vadd.f32 %v745_v1, %v676_v8  ;;  %v778_v34 = vadd.f32 %v746_v4, %v677_v5  ;;  %v1050_v41 = vmul.f32 %v2216_v33, %v2499_v22  ;;  %v1150_v29 = vmul.f32 %v2227_v38, %v2503_v32 }
  0x55   : > { %v1151_v20 = vmul.f32 %v2227_v38, %v2505_v26  ;;  %v1336_v36 = vmul.f32 %v2314_v56, %v1297_v18  ;;  %v1337_v61 = vmul.f32 %v2314_v56, %v1298_v19  ;;  %v1251_v53 = vmul.f32 %v2232_v39, %v2513_v27 }
  0x56   : > { %v878_v42 = vadd.f32 %v846_v12, %v777_v52  ;;  %v879_v50 = vadd.f32 %v847_v45, %v778_v34  ;;  %v1252_v62 = vmul.f32 %v2232_v39, %v2517_v49  ;;  %v444_v57 = vmul.f32 %v2159_v2, %v2289_v30 }
  0x57   : > { %v445_v43 = vmul.f32 %v2159_v2, %v2291_v31  ;;  %v1375_v54 = vadd.f32 %v2327_v13, %v1336_v36  ;;  %v1376_v58 = vadd.f32 %v2327_v13, %v1337_v61  ;;  %v545_v1 = vmul.f32 %v2164_v3, %v2295_v37 }
  0x58   : > { %v979_v59 = vadd.f32 %v947_v15, %v878_v42  ;;  %v980_v4 = vadd.f32 %v948_v16, %v879_v50  ;;  %v546_v60 = vmul.f32 %v2164_v3, %v2297_v40  ;;  %v646_v63 = vmul.f32 %v2172_v7, %v2305_v46  ;;  %v2547_v50 = vld [vmem:[#allocation2 + $0x78] sm:$0xff] }
  0x59   : > { %v647_v30 = vmul.f32 %v2172_v7, %v2307_v47  ;;  %v1407_v8 = vmax.f32 %v1375_v54, 0.0  ;;  %v1408_v31 = vmax.f32 %v1376_v58, 0.0  ;;  %v577_v5 = vadd.f32 %v545_v1, %v444_v57  ;;  %v2555_v58 = vld [vmem:[#allocation2 + $0x79] sm:$0xff] }
  0x5a   : > { %v1081_v12 = vadd.f32 %v1049_v25, %v979_v59  ;;  %v1082_v45 = vadd.f32 %v1050_v41, %v980_v4  ;;  %v578_v18 = vadd.f32 %v546_v60, %v445_v43  ;;  %v747_v15 = vmul.f32 %v2195_v23, %v2497_v10  ;;  %v2565_v60 = vld [vmem:[#allocation2 + $0x7a] sm:$0xff] }
  0x5b   : > { %v748_v37 = vmul.f32 %v2195_v23, %v2499_v22  ;;  %v1439_v16 = vmin.f32 %v1407_v8, 6.0  ;;  %v1440_v40 = vmin.f32 %v1408_v31, 6.0  ;;  %v678_v52 = vadd.f32 %v646_v63, %v577_v5  ;;  %v2570_v31 = vld [vmem:[#allocation2 + $0x82] sm:$0xff] }
  0x5c   : > { %v1182_v19 = vadd.f32 %v1150_v29, %v1081_v12  ;;  %v1183_v46 = vadd.f32 %v1151_v20, %v1082_v45  ;;  %v679_v34 = vadd.f32 %v647_v30, %v578_v18  ;;  %v848_v47 = vmul.f32 %v2200_v24, %v2503_v32  ;;  %v2551_v20 = vld [vmem:[#allocation2 + $0x80] sm:$0xff] }
  0x5d   : > { %v849_v25 = vmul.f32 %v2200_v24, %v2505_v26  ;;  %v1462_v41 = vpack.c.bf16 %v1440_v40, %v1439_v16  ;;  %v779_v61 = vadd.f32 %v747_v15, %v678_v52  ;;  %v949_v42 = vmul.f32 %v2208_v28, %v2513_v27 }
  0x5e   : > { %v1283_v36 = vadd.f32 %v1251_v53, %v1182_v19  ;;  %v1284_v57 = vadd.f32 %v1252_v62, %v1183_v46  ;;  %v780_v43 = vadd.f32 %v748_v37, %v679_v34  ;;  %v950_v29 = vmul.f32 %v2208_v28, %v2517_v49  ;;  %v2561_v62 = vld [vmem:[#allocation2 + $0x81] sm:$0xff] }
  0x5f   : > { %v1051_v54 = vmul.f32 %v2216_v33, %v2547_v50  ;;  %1994 = vmatmul.mubr.msk.bf16.vlgmr.msra.gmra.mrb[0].mxu1 %vm280_vm0, %v1462_v41  ;;  %v880_v59 = vadd.f32 %v848_v47, %v779_v61  ;;  %v1052_v1 = vmul.f32 %v2216_v33, %v2551_v20  ;;  %v1152_v4 = vmul.f32 %v2227_v38, %v2555_v58 }
  0x60   : > { %v1322_v53 = vmul.f32 %v2314_v56, %v1283_v36  ;;  %v1323_v63 = vmul.f32 %v2314_v56, %v1284_v57  ;;  %v881_v30 = vadd.f32 %v849_v25, %v780_v43  ;;  %v1153_v8 = vmul.f32 %v2227_v38, %v2561_v62 }
  0x61   : > { %v1253_v12 = vmul.f32 %v2232_v39, %v2565_v60  ;;  %v981_v45 = vadd.f32 %v949_v42, %v880_v59  ;;  %v1254_v18 = vmul.f32 %v2232_v39, %v2570_v31  ;;  %v458_v15 = vmul.f32 %v2159_v2, %v2360_v44 }
  0x62   : > { %v1361_v5 = vadd.f32 %v2327_v13, %v1322_v53  ;;  %v1362_v37 = vadd.f32 %v2327_v13, %v1323_v63  ;;  %v982_v16 = vadd.f32 %v950_v29, %v881_v30  ;;  %v459_v40 = vmul.f32 %v2159_v2, %v2385_v35  ;;  %v2600_v30 = vld [vmem:[#allocation2 + $0x120] sm:$0xff] }
  0x63   : > { %v559_v19 = vmul.f32 %v2164_v3, %v2389_v48  ;;  %v1083_v46 = vadd.f32 %v1051_v54, %v981_v45  ;;  %v560_v34 = vmul.f32 %v2164_v3, %v2397_v51  ;;  %v660_v47 = vmul.f32 %v2172_v7, %v2404_v0  ;;  %v2605_v45 = vld [vmem:[#allocation2 + $0x128] sm:$0xff] }
  0x64   : > { %v1393_v52 = vmax.f32 %v1361_v5, 0.0  ;;  %v1394_v25 = vmax.f32 %v1362_v37, 0.0  ;;  %v1084_v41 = vadd.f32 %v1052_v1, %v982_v16  ;;  %v661_v36 = vmul.f32 %v2172_v7, %v2406_v6  ;;  %v2609_v37 = vld [vmem:[#allocation2 + $0x121] sm:$0xff] }
  0x65   : > { %v591_v44 = vadd.f32 %v559_v19, %v458_v15  ;;  %v1184_v42 = vadd.f32 %v1152_v4, %v1083_v46  ;;  %v592_v35 = vadd.f32 %v560_v34, %v459_v40  ;;  %v761_v48 = vmul.f32 %v2195_v23, %v2439_v55  ;;  %v2615_v19 = vld [vmem:[#allocation2 + $0x129] sm:$0xff] }
  0x66   : > { %v1425_v61 = vmin.f32 %v1393_v52, 6.0  ;;  %v1426_v57 = vmin.f32 %v1394_v25, 6.0  ;;  %v1185_v43 = vadd.f32 %v1153_v8, %v1084_v41  ;;  %v762_v51 = vmul.f32 %v2195_v23, %v2443_v11  ;;  %v2619_v46 = vld [vmem:[#allocation2 + $0x122] sm:$0xff]  ;;  %v2624_v41 = vld [vmem:[#allocation2 + $0x12a] sm:$0xff] }
  0x67   : > { %v692_v29 = vadd.f32 %v660_v47, %v591_v44  ;;  %v1285_v54 = vadd.f32 %v1253_v12, %v1184_v42  ;;  %v693_v0 = vadd.f32 %v661_v36, %v592_v35  ;;  %v862_v53 = vmul.f32 %v2200_v24, %v2447_v14 }
  0x68   : > { %v863_v6 = vmul.f32 %v2200_v24, %v2454_v17  ;;  %v1455_v59 = vpack.c.bf16 %v1426_v57, %v1425_v61  ;;  %v1286_v1 = vadd.f32 %v1254_v18, %v1185_v43  ;;  %v963_v63 = vmul.f32 %v2208_v28, %v2458_v9 }
  0x69   : > { %v793_v4 = vadd.f32 %v761_v48, %v692_v29  ;;  %v1324_v8 = vmul.f32 %v2314_v56, %v1285_v54  ;;  %v794_v5 = vadd.f32 %v762_v51, %v693_v0  ;;  %v964_v12 = vmul.f32 %v2208_v28, %v2462_v21 }
  0x6a   : > { %v1065_v15 = vmul.f32 %v2216_v33, %v2600_v30  ;;  %1981 = vmatprep.mubr.msk.bf16.mxu0 %vm280_vm0, %v1455_v59  ;;  %v1325_v18 = vmul.f32 %v2314_v56, %v1286_v1  ;;  %v1066_v40 = vmul.f32 %v2216_v33, %v2605_v45  ;;  %v1166_v52 = vmul.f32 %v2227_v38, %v2609_v37 }
  0x6b   : > { %v894_v16 = vadd.f32 %v862_v53, %v793_v4  ;;  %v1363_v34 = vadd.f32 %v2327_v13, %v1324_v8  ;;  %v895_v47 = vadd.f32 %v863_v6, %v794_v5  ;;  %v1167_v25 = vmul.f32 %v2227_v38, %v2615_v19 }
  0x6c   : > { %v1267_v44 = vmul.f32 %v2232_v39, %v2619_v46  ;;  %v1364_v36 = vadd.f32 %v2327_v13, %v1325_v18  ;;  %v1268_v42 = vmul.f32 %v2232_v39, %v2624_v41  ;;  %v460_v35 = vmul.f32 %v2159_v2, %v2439_v55 }
  0x6d   : > { %v995_v61 = vadd.f32 %v963_v63, %v894_v16  ;;  %v1395_v48 = vmax.f32 %v1363_v34, 0.0  ;;  %v996_v57 = vadd.f32 %v964_v12, %v895_v47  ;;  %v461_v43 = vmul.f32 %v2159_v2, %v2443_v11  ;;  %v2655_v47 = vld [vmem:[#allocation2 + $0x138] sm:$0xff] }
  0x6e   : > { %v561_v29 = vmul.f32 %v2164_v3, %v2447_v14  ;;  %v1396_v51 = vmax.f32 %v1364_v36, 0.0  ;;  %v562_v0 = vmul.f32 %v2164_v3, %v2454_v17  ;;  %v662_v53 = vmul.f32 %v2172_v7, %v2458_v9 }
  0x6f   : > { %v1097_v54 = vadd.f32 %v1065_v15, %v995_v61  ;;  %v1427_v6 = vmin.f32 %v1395_v48, 6.0  ;;  %v1098_v59 = vadd.f32 %v1066_v40, %v996_v57  ;;  %v663_v55 = vmul.f32 %v2172_v7, %v2462_v21  ;;  %v2667_v48 = vld [vmem:[#allocation2 + $0x141] sm:$0xff] }
  0x70   : > { %v593_v1 = vadd.f32 %v561_v29, %v460_v35  ;;  %v1428_v4 = vmin.f32 %v1396_v51, 6.0  ;;  %v594_v11 = vadd.f32 %v562_v0, %v461_v43  ;;  %v763_v14 = vmul.f32 %v2195_v23, %v2600_v30  ;;  %v2665_v35 = vld [vmem:[#allocation2 + $0x139] sm:$0xff]  ;;  %v2676_v0 = vld [vmem:[#allocation2 + $0x142] sm:$0xff] }
  0x71   : > { %v1198_v63 = vadd.f32 %v1166_v52, %v1097_v54  ;;  %v1199_v8 = vadd.f32 %v1167_v25, %v1098_v59  ;;  %v764_v17 = vmul.f32 %v2195_v23, %v2605_v45  ;;  %v864_v9 = vmul.f32 %v2200_v24, %v2609_v37  ;;  %v2657_v25 = vld [vmem:[#allocation2 + $0x140] sm:$0xff] }
  0x72   : > { %v694_v5 = vadd.f32 %v662_v53, %v593_v1  ;;  %v1456_v12 = vpack.c.bf16 %v1428_v4, %v1427_v6  ;;  %v695_v18 = vadd.f32 %v663_v55, %v594_v11  ;;  %v865_v21 = vmul.f32 %v2200_v24, %v2615_v19  ;;  %v2674_v54 = vld [vmem:[#allocation2 + $0x13a] sm:$0xff] }
  0x73   : > { %v1299_v15 = vadd.f32 %v1267_v44, %v1198_v63  ;;  %v1300_v16 = vadd.f32 %v1268_v42, %v1199_v8  ;;  %v965_v52 = vmul.f32 %v2208_v28, %v2619_v46  ;;  %v966_v34 = vmul.f32 %v2208_v28, %v2624_v41 }
  0x74   : > { %v795_v40 = vadd.f32 %v763_v14, %v694_v5  ;;  %1982 = vmatmul.mubr.msk.bf16.gmra.mrb[4].mxu0 %vm280_vm0, %v1456_v12  ;;  %v796_v36 = vadd.f32 %v764_v17, %v695_v18  ;;  %v1067_v61 = vmul.f32 %v2216_v33, %v2655_v47  ;;  %v1068_v42 = vmul.f32 %v2216_v33, %v2657_v25 }
  0x75   : > { %v1338_v44 = vmul.f32 %v2314_v56, %v1299_v15  ;;  %v1339_v57 = vmul.f32 %v2314_v56, %v1300_v16  ;;  %v1168_v29 = vmul.f32 %v2227_v38, %v2665_v35  ;;  %v1169_v51 = vmul.f32 %v2227_v38, %v2667_v48 }
  0x76   : > { %v896_v43 = vadd.f32 %v864_v9, %v795_v40  ;;  %v897_v6 = vadd.f32 %v865_v21, %v796_v36  ;;  %v1269_v59 = vmul.f32 %v2232_v39, %v2674_v54  ;;  %v1270_v1 = vmul.f32 %v2232_v39, %v2676_v0 }
  0x77   : > { %v1377_v53 = vadd.f32 %v2327_v13, %v1338_v44  ;;  %v1378_v55 = vadd.f32 %v2327_v13, %v1339_v57  ;;  %v446_v63 = vmul.f32 %v2159_v2, %v2497_v10  ;;  %v447_v11 = vmul.f32 %v2159_v2, %v2499_v22 }
  0x78   : > { %v997_v4 = vadd.f32 %v965_v52, %v896_v43  ;;  %v998_v8 = vadd.f32 %v966_v34, %v897_v6  ;;  %v547_v5 = vmul.f32 %v2164_v3, %v2503_v32  ;;  %v548_v17 = vmul.f32 %v2164_v3, %v2505_v26 }
  0x79   : > { %v1409_v14 = vmax.f32 %v1377_v53, 0.0  ;;  %v1410_v9 = vmax.f32 %v1378_v55, 0.0  ;;  %v648_v15 = vmul.f32 %v2172_v7, %v2513_v27  ;;  %v649_v18 = vmul.f32 %v2172_v7, %v2517_v49  ;;  %v2712_v53 = vld [vmem:[#allocation2 + $0x91] sm:$0xff] }
  0x7a   : > { %v1099_v12 = vadd.f32 %v1067_v61, %v997_v4  ;;  %v1100_v21 = vadd.f32 %v1068_v42, %v998_v8  ;;  %v579_v16 = vadd.f32 %v547_v5, %v446_v63  ;;  %v580_v2 = vadd.f32 %v548_v17, %v447_v11  ;;  %v2729_v8 = vld [vmem:[#allocation2 + $0x9a] sm:$0xff] }
  0x7b   : > { %v1441_v10 = vmin.f32 %v1409_v14, 6.0  ;;  %v1442_v22 = vmin.f32 %v1410_v9, 6.0  ;;  %v749_v32 = vmul.f32 %v2195_v23, %v2547_v50  ;;  %v750_v3 = vmul.f32 %v2195_v23, %v2551_v20  ;;  %v2727_v14 = vld [vmem:[#allocation2 + $0x92] sm:$0xff]  ;;  %v2739_v9 = vld [vmem:[%s3234_s1] ss:$0 sm:$0xff] }
  0x7c   : > { %v1200_v40 = vadd.f32 %v1168_v29, %v1099_v12  ;;  %v1201_v26 = vadd.f32 %v1169_v51, %v1100_v21  ;;  %v680_v52 = vadd.f32 %v648_v15, %v579_v16  ;;  %v681_v34 = vadd.f32 %v649_v18, %v580_v2  ;;  %v2708_v29 = vld [vmem:[#allocation2 + $0x90] sm:$0xff]  ;;  %v2710_v51 = vld [vmem:[#allocation2 + $0x98] sm:$0xff] }
  0x7d   : > { %v850_v27 = vmul.f32 %v2200_v24, %v2555_v58  ;;  %v1463_v44 = vpack.c.bf16 %v1442_v22, %v1441_v10  ;;  %v851_v49 = vmul.f32 %v2200_v24, %v2561_v62  ;;  %v951_v36 = vmul.f32 %v2208_v28, %v2565_v60 }
  0x7e   : > { %v1301_v7 = vadd.f32 %v1269_v59, %v1200_v40  ;;  %v1302_v61 = vadd.f32 %v1270_v1, %v1201_v26  ;;  %v781_v42 = vadd.f32 %v749_v32, %v680_v52  ;;  %v782_v57 = vadd.f32 %v750_v3, %v681_v34  ;;  %v2720_v1 = vld [vmem:[#allocation2 + $0x99] sm:$0xff] }
  0x7f   : > { %v952_v43 = vmul.f32 %v2208_v28, %v2570_v31  ;;  %1997 = vmatprep.mubr.msk.bf16.mxu1 %vm280_vm0, %v1463_v44  ;;  %v1053_v24 = vmul.f32 %v2216_v33, %v2708_v29  ;;  %v1054_v59 = vmul.f32 %v2216_v33, %v2710_v51  ;;  %v1154_v28 = vmul.f32 %v2227_v38, %v2712_v53 }
  0x80   : > { %v1340_v6 = vmul.f32 %v2314_v56, %v1301_v7  ;;  %v1341_v55 = vmul.f32 %v2314_v56, %v1302_v61  ;;  %v882_v4 = vadd.f32 %v850_v27, %v781_v42  ;;  %v883_v63 = vadd.f32 %v851_v49, %v782_v57  ;;  %v2769_v7 = vld [vmem:[%s3234_s1 + $0x3] ss:$0 sm:$0xff] }
  0x81   : > { %v1155_v11 = vmul.f32 %v2227_v38, %v2720_v1  ;;  %v1255_v33 = vmul.f32 %v2232_v39, %v2727_v14  ;;  %v1256_v17 = vmul.f32 %v2232_v39, %v2729_v8  ;;  %v448_v38 = vmul.f32 %v2739_v9, %v2547_v50  ;;  %v2749_v39 = vld [vmem:[%s3234_s1 + $0x1] ss:$0 sm:$0xff]  ;;  %v2758_v50 = vld [vmem:[%s3234_s1 + $0x2] ss:$0 sm:$0xff] }
  0x82   : > { %v1379_v5 = vadd.f32 %v2327_v13, %v1340_v6  ;;  %v1380_v12 = vadd.f32 %v2327_v13, %v1341_v55  ;;  %v983_v15 = vadd.f32 %v951_v36, %v882_v4  ;;  %v984_v18 = vadd.f32 %v952_v43, %v883_v63  ;;  %v2785_v6 = vld [vmem:[%s3234_s1 + $0x5] ss:$0 sm:$0xff]  ;;  %v2793_v63 = vld [vmem:[#allocation2 + $0xb0] sm:$0xff] }
  0x83   : > { %v449_v10 = vmul.f32 %v2739_v9, %v2551_v20  ;;  %v549_v16 = vmul.f32 %v2749_v39, %v2555_v58  ;;  %v550_v2 = vmul.f32 %v2749_v39, %v2561_v62  ;;  %v650_v20 = vmul.f32 %v2758_v50, %v2565_v60 }
  0x84   : > { %v1411_v21 = vmax.f32 %v1379_v5, 0.0  ;;  %v1412_v22 = vmax.f32 %v1380_v12, 0.0  ;;  %v1085_v40 = vadd.f32 %v1053_v24, %v983_v15  ;;  %v1086_v32 = vadd.f32 %v1054_v59, %v984_v18  ;;  %v2789_v59 = vld [vmem:[#allocation2 + $0xa8] sm:$0xff]  ;;  %v2809_v15 = vld [vmem:[#allocation2 + $0xb1] sm:$0xff]  ;;  %v2814_v18 = vld [vmem:[%s3234_s1 + $0x7] ss:$0 sm:$0xff] }
  0x85   : > { %v651_v3 = vmul.f32 %v2758_v50, %v2570_v31  ;;  %v581_v52 = vadd.f32 %v549_v16, %v448_v38  ;;  %v582_v58 = vadd.f32 %v550_v2, %v449_v10  ;;  %v751_v62 = vmul.f32 %v2195_v23, %v2708_v29  ;;  %v2776_v31 = vld [vmem:[%s3234_s1 + $0x4] ss:$0 sm:$0xff] }
  0x86   : > { %v1443_v26 = vmin.f32 %v1411_v21, 6.0  ;;  %v1444_v34 = vmin.f32 %v1412_v22, 6.0  ;;  %v1186_v27 = vadd.f32 %v1154_v28, %v1085_v40  ;;  %v1187_v44 = vadd.f32 %v1155_v11, %v1086_v32  ;;  %v2798_v11 = vld [vmem:[%s3234_s1 + $0x6] ss:$0 sm:$0xff]  ;;  %v2818_v21 = vld [vmem:[#allocation2 + $0xaa] sm:$0xff]  ;;  %v2822_v22 = vld [vmem:[#allocation2 + $0xb2] sm:$0xff] }
  0x87   : > { %v752_v60 = vmul.f32 %v2769_v7, %v2710_v51  ;;  %v682_v49 = vadd.f32 %v650_v20, %v581_v52  ;;  %v683_v36 = vadd.f32 %v651_v3, %v582_v58  ;;  %v852_v23 = vmul.f32 %v2776_v31, %v2712_v53  ;;  %v2827_v40 = vld [vmem:[%s3234_s1 + $0x8] ss:$0 sm:$0xff] }
  0x88   : > { %v853_v61 = vmul.f32 %v2776_v31, %v2720_v1  ;;  %v1464_v42 = vpack.c.bf16 %v1444_v34, %v1443_v26  ;;  %v1287_v57 = vadd.f32 %v1255_v33, %v1186_v27  ;;  %v1288_v43 = vadd.f32 %v1256_v17, %v1187_v44  ;;  %v2802_v33 = vld [vmem:[#allocation2 + $0xa9] sm:$0xff] }
  0x89   : > { %v953_v24 = vmul.f32 %v2785_v6, %v2727_v14  ;;  %v783_v28 = vadd.f32 %v751_v62, %v682_v49  ;;  %v784_v55 = vadd.f32 %v752_v60, %v683_v36  ;;  %v954_v4 = vmul.f32 %v2785_v6, %v2729_v8 }
  0x8a   : > { %v1055_v5 = vmul.f32 %v2798_v11, %v2789_v59  ;;  %1998 = vmatmul.mubr.msk.bf16.gmra.mrb[4].mxu1 %vm280_vm0, %v1464_v42  ;;  %v1326_v17 = vmul.f32 %v2314_v56, %v1287_v57  ;;  %v1327_v38 = vmul.f32 %v2314_v56, %v1288_v43  ;;  %v1056_v12 = vmul.f32 %v2798_v11, %v2793_v63 }
  0x8b   : > { %v1156_v10 = vmul.f32 %v2814_v18, %v2802_v33  ;;  %v884_v16 = vadd.f32 %v852_v23, %v783_v28  ;;  %v885_v2 = vadd.f32 %v853_v61, %v784_v55  ;;  %v1157_v20 = vmul.f32 %v2814_v18, %v2809_v15 }
  0x8c   : > { %v1257_v32 = vmul.f32 %v2827_v40, %v2818_v21  ;;  %v1365_v3 = vadd.f32 %v2327_v13, %v1326_v17  ;;  %v1366_v26 = vadd.f32 %v2327_v13, %v1327_v38  ;;  %v1258_v52 = vmul.f32 %v2827_v40, %v2822_v22 }
  0x8d   : > { %v462_v58 = vmul.f32 %v2739_v9, %v2600_v30  ;;  %v985_v62 = vadd.f32 %v953_v24, %v884_v16  ;;  %v986_v34 = vadd.f32 %v954_v4, %v885_v2  ;;  %v463_v27 = vmul.f32 %v2739_v9, %v2605_v45 }
  0x8e   : > { %v563_v44 = vmul.f32 %v2749_v39, %v2609_v37  ;;  %v1397_v60 = vmax.f32 %v1365_v3, 0.0  ;;  %v1398_v49 = vmax.f32 %v1366_v26, 0.0  ;;  %v564_v36 = vmul.f32 %v2749_v39, %v2615_v19 }
  0x8f   : > { %v664_v23 = vmul.f32 %v2758_v50, %v2619_v46  ;;  %v1087_v61 = vadd.f32 %v1055_v5, %v985_v62  ;;  %v1088_v42 = vadd.f32 %v1056_v12, %v986_v34  ;;  %v665_v30 = vmul.f32 %v2758_v50, %v2624_v41 }
  0x90   : > { %v595_v57 = vadd.f32 %v563_v44, %v462_v58  ;;  %v1429_v43 = vmin.f32 %v1397_v60, 6.0  ;;  %v1430_v24 = vmin.f32 %v1398_v49, 6.0  ;;  %v596_v45 = vadd.f32 %v564_v36, %v463_v27  ;;  %v2872_v44 = vld [vmem:[#allocation2 + $0x159] sm:$0xff] }
  0x91   : > { %v765_v37 = vmul.f32 %v2769_v7, %v2655_v47  ;;  %v1188_v28 = vadd.f32 %v1156_v10, %v1087_v61  ;;  %v1189_v55 = vadd.f32 %v1157_v20, %v1088_v42  ;;  %v766_v19 = vmul.f32 %v2769_v7, %v2657_v25  ;;  %v2857_v10 = vld [vmem:[#allocation2 + $0x150] sm:$0xff]  ;;  %v2859_v20 = vld [vmem:[#allocation2 + $0x158] sm:$0xff] }
  0x92   : > { %v696_v4 = vadd.f32 %v664_v23, %v595_v57  ;;  %v1457_v17 = vpack.c.bf16 %v1430_v24, %v1429_v43  ;;  %v697_v46 = vadd.f32 %v665_v30, %v596_v45  ;;  %v866_v5 = vmul.f32 %v2776_v31, %v2665_v35  ;;  %v2876_v49 = vld [vmem:[#allocation2 + $0x152] sm:$0xff]  ;;  %v2878_v36 = vld [vmem:[#allocation2 + $0x15a] sm:$0xff] }
  0x93   : > { %v867_v41 = vmul.f32 %v2776_v31, %v2667_v48  ;;  %v1289_v38 = vadd.f32 %v1257_v32, %v1188_v28  ;;  %v1290_v12 = vadd.f32 %v1258_v52, %v1189_v55  ;;  %v967_v2 = vmul.f32 %v2785_v6, %v2674_v54  ;;  %v2868_v52 = vld [vmem:[#allocation2 + $0x151] sm:$0xff] }
  0x94   : > { %v797_v16 = vadd.f32 %v765_v37, %v696_v4  ;;  %1985 = vmatprep.mubr.msk.bf16.mxu0 %vm280_vm0, %v1457_v17  ;;  %v798_v3 = vadd.f32 %v766_v19, %v697_v46  ;;  %v968_v26 = vmul.f32 %v2785_v6, %v2676_v0  ;;  %v1069_v58 = vmul.f32 %v2798_v11, %v2857_v10 }
  0x95   : > { %v1070_v32 = vmul.f32 %v2798_v11, %v2859_v20  ;;  %v1328_v62 = vmul.f32 %v2314_v56, %v1289_v38  ;;  %v1329_v34 = vmul.f32 %v2314_v56, %v1290_v12  ;;  %v1170_v60 = vmul.f32 %v2814_v18, %v2868_v52 }
  0x96   : > { %v898_v27 = vadd.f32 %v866_v5, %v797_v16  ;;  %v899_v23 = vadd.f32 %v867_v41, %v798_v3  ;;  %v1171_v61 = vmul.f32 %v2814_v18, %v2872_v44  ;;  %v1271_v42 = vmul.f32 %v2827_v40, %v2876_v49 }
  0x97   : > { %v1272_v56 = vmul.f32 %v2827_v40, %v2878_v36  ;;  %v1367_v57 = vadd.f32 %v2327_v13, %v1328_v62  ;;  %v1368_v30 = vadd.f32 %v2327_v13, %v1329_v34  ;;  %v464_v24 = vmul.f32 %v2739_v9, %v2655_v47 }
  0x98   : > { %v999_v43 = vadd.f32 %v967_v2, %v898_v27  ;;  %v1000_v45 = vadd.f32 %v968_v26, %v899_v23  ;;  %v465_v37 = vmul.f32 %v2739_v9, %v2657_v25  ;;  %v565_v28 = vmul.f32 %v2749_v39, %v2665_v35  ;;  %v2912_v23 = vld [vmem:[#allocation2 + $0x170] sm:$0xff] }
  0x99   : > { %v566_v55 = vmul.f32 %v2749_v39, %v2667_v48  ;;  %v1399_v4 = vmax.f32 %v1367_v57, 0.0  ;;  %v1400_v19 = vmax.f32 %v1368_v30, 0.0  ;;  %v666_v13 = vmul.f32 %v2758_v50, %v2674_v54 }
  0x9a   : > { %v1101_v17 = vadd.f32 %v1069_v58, %v999_v43  ;;  %v1102_v46 = vadd.f32 %v1070_v32, %v1000_v45  ;;  %v597_v5 = vadd.f32 %v565_v28, %v464_v24  ;;  %v667_v47 = vmul.f32 %v2758_v50, %v2676_v0  ;;  %v2927_v43 = vld [vmem:[#allocation2 + $0x169] sm:$0xff]  ;;  %v2930_v28 = vld [vmem:[#allocation2 + $0x171] sm:$0xff] }
  0x9b   : > { %v598_v41 = vadd.f32 %v566_v55, %v465_v37  ;;  %v1431_v38 = vmin.f32 %v1399_v4, 6.0  ;;  %v1432_v25 = vmin.f32 %v1400_v19, 6.0  ;;  %v767_v35 = vmul.f32 %v2769_v7, %v2857_v10  ;;  %v2934_v4 = vld [vmem:[#allocation2 + $0x16a] sm:$0xff]  ;;  %v2936_v19 = vld [vmem:[#allocation2 + $0x172] sm:$0xff] }
  0x9c   : > { %v1202_v12 = vadd.f32 %v1170_v60, %v1101_v17  ;;  %v1203_v16 = vadd.f32 %v1171_v61, %v1102_v46  ;;  %v698_v48 = vadd.f32 %v666_v13, %v597_v5  ;;  %v768_v3 = vmul.f32 %v2769_v7, %v2859_v20  ;;  %v2910_v60 = vld [vmem:[#allocation2 + $0x168] sm:$0xff]  ;;  %v2918_v61 = vld [vmem:[%s3235_s2] ss:$0 sm:$0xff] }
  0x9d   : > { %v699_v2 = vadd.f32 %v667_v47, %v598_v41  ;;  %v1458_v26 = vpack.c.bf16 %v1432_v25, %v1431_v38  ;;  %v868_v58 = vmul.f32 %v2776_v31, %v2868_v52  ;;  %v869_v0 = vmul.f32 %v2776_v31, %v2872_v44  ;;  %v2941_v17 = vld [vmem:[%s3236_s3] ss:$0 sm:$0xff] }
  0x9e   : > { %v1303_v54 = vadd.f32 %v1271_v42, %v1202_v12  ;;  %v1304_v32 = vadd.f32 %v1272_v56, %v1203_v16  ;;  %v799_v62 = vadd.f32 %v767_v35, %v698_v48  ;;  %v969_v27 = vmul.f32 %v2785_v6, %v2876_v49 }
  0x9f   : > { %v800_v34 = vadd.f32 %v768_v3, %v699_v2  ;;  %1986 = vmatmul.mubr.msk.bf16.gmra.mrb[8].mxu0 %vm280_vm0, %v1458_v26  ;;  %v970_v56 = vmul.f32 %v2785_v6, %v2878_v36  ;;  %v1071_v57 = vmul.f32 %v2798_v11, %v2910_v60  ;;  %v1072_v30 = vmul.f32 %v2798_v11, %v2912_v23 }
  0xa0   : > { %v1342_v42 = vmul.f32 %v2918_v61, %v1303_v54  ;;  %v1343_v24 = vmul.f32 %v2918_v61, %v1304_v32  ;;  %v900_v45 = vadd.f32 %v868_v58, %v799_v62  ;;  %v1172_v55 = vmul.f32 %v2814_v18, %v2927_v43 }
  0xa1   : > { %v901_v37 = vadd.f32 %v869_v0, %v800_v34  ;;  %v1173_v46 = vmul.f32 %v2814_v18, %v2930_v28  ;;  %v1273_v5 = vmul.f32 %v2827_v40, %v2934_v4  ;;  %v1274_v41 = vmul.f32 %v2827_v40, %v2936_v19 }
  0xa2   : > { %v1381_v13 = vadd.f32 %v2941_v17, %v1342_v42  ;;  %v1382_v47 = vadd.f32 %v2941_v17, %v1343_v24  ;;  %v1001_v38 = vadd.f32 %v969_v27, %v900_v45  ;;  %v450_v12 = vmul.f32 %v2739_v9, %v2708_v29 }
  0xa3   : > { %v1002_v25 = vadd.f32 %v970_v56, %v901_v37  ;;  %v451_v16 = vmul.f32 %v2739_v9, %v2710_v51  ;;  %v551_v48 = vmul.f32 %v2749_v39, %v2712_v53  ;;  %v552_v2 = vmul.f32 %v2749_v39, %v2720_v1 }
  0xa4   : > { %v1413_v35 = vmax.f32 %v1381_v13, 0.0  ;;  %v1414_v3 = vmax.f32 %v1382_v47, 0.0  ;;  %v1103_v26 = vadd.f32 %v1071_v57, %v1001_v38  ;;  %v652_v58 = vmul.f32 %v2758_v50, %v2727_v14  ;;  %v1021_v47 = vld [vmem:[#allocation2 + $0xc8] sm:$0xff] }
  0xa5   : > { %v1104_v54 = vadd.f32 %v1072_v30, %v1002_v25  ;;  %v583_v32 = vadd.f32 %v551_v48, %v450_v12  ;;  %v584_v62 = vadd.f32 %v552_v2, %v451_v16  ;;  %v653_v29 = vmul.f32 %v2758_v50, %v2729_v8  ;;  %v1121_v12 = vld [vmem:[#allocation2 + $0xc1] sm:$0xff] }
  0xa6   : > { %v1445_v0 = vmin.f32 %v1413_v35, 6.0  ;;  %v1446_v34 = vmin.f32 %v1414_v3, 6.0  ;;  %v1204_v51 = vadd.f32 %v1172_v55, %v1103_v26  ;;  %v753_v53 = vmul.f32 %v2769_v7, %v2789_v59  ;;  %v1122_v35 = vld [vmem:[#allocation2 + $0xc9] sm:$0xff] }
  0xa7   : > { %v1205_v27 = vadd.f32 %v1173_v46, %v1104_v54  ;;  %v684_v42 = vadd.f32 %v652_v58, %v583_v32  ;;  %v685_v1 = vadd.f32 %v653_v29, %v584_v62  ;;  %v754_v56 = vmul.f32 %v2769_v7, %v2793_v63  ;;  %v1020_v46 = vld [vmem:[#allocation2 + $0xc0] sm:$0xff]  ;;  %v1223_v54 = vld [vmem:[#allocation2 + $0xca] sm:$0xff] }
  0xa8   : > { %v854_v14 = vmul.f32 %v2776_v31, %v2802_v33  ;;  %v1465_v57 = vpack.c.bf16 %v1446_v34, %v1445_v0  ;;  %v1305_v30 = vadd.f32 %v1273_v5, %v1204_v51  ;;  %v855_v8 = vmul.f32 %v2776_v31, %v2809_v15  ;;  %v1222_v26 = vld [vmem:[#allocation2 + $0xc2] sm:$0xff] }
  0xa9   : > { %v1306_v24 = vadd.f32 %v1274_v41, %v1205_v27  ;;  %v785_v45 = vadd.f32 %v753_v53, %v684_v42  ;;  %v786_v37 = vadd.f32 %v754_v56, %v685_v1  ;;  %v955_v55 = vmul.f32 %v2785_v6, %v2818_v21 }
  0xaa   : > { %v956_v13 = vmul.f32 %v2785_v6, %v2822_v22  ;;  %2001 = vmatprep.mubr.msk.bf16.mxu1 %vm280_vm0, %v1465_v57  ;;  %v1344_v38 = vmul.f32 %v2918_v61, %v1305_v30  ;;  %v1057_v41 = vmul.f32 %v2798_v11, %v1020_v46  ;;  %v1058_v25 = vmul.f32 %v2798_v11, %v1021_v47 }
  0xab   : > { %v1345_v5 = vmul.f32 %v2918_v61, %v1306_v24  ;;  %v886_v16 = vadd.f32 %v854_v14, %v785_v45  ;;  %v887_v48 = vadd.f32 %v855_v8, %v786_v37  ;;  %v1158_v2 = vmul.f32 %v2814_v18, %v1121_v12 }
  0xac   : > { %v1159_v3 = vmul.f32 %v2814_v18, %v1122_v35  ;;  %v1383_v58 = vadd.f32 %v2941_v17, %v1344_v38  ;;  %v1259_v32 = vmul.f32 %v2827_v40, %v1222_v26  ;;  %v1260_v62 = vmul.f32 %v2827_v40, %v1223_v54  ;;  %v1022_v38 = vld [vmem:[#allocation2 + $0xd8] sm:$0xff] }
  0xad   : > { %v1384_v0 = vadd.f32 %v2941_v17, %v1345_v5  ;;  %v987_v29 = vadd.f32 %v955_v55, %v886_v16  ;;  %v988_v34 = vadd.f32 %v956_v13, %v887_v48  ;;  %v452_v51 = vmul.f32 %v2739_v9, %v2789_v59  ;;  %v1123_v16 = vld [vmem:[#allocation2 + $0xd9] sm:$0xff] }
  0xae   : > { %v453_v27 = vmul.f32 %v2739_v9, %v2793_v63  ;;  %v1415_v53 = vmax.f32 %v1383_v58, 0.0  ;;  %v553_v1 = vmul.f32 %v2749_v39, %v2802_v33  ;;  %v554_v56 = vmul.f32 %v2749_v39, %v2809_v15 }
  0xaf   : > { %v1416_v42 = vmax.f32 %v1384_v0, 0.0  ;;  %v1089_v14 = vadd.f32 %v1057_v41, %v987_v29  ;;  %v1090_v57 = vadd.f32 %v1058_v25, %v988_v34  ;;  %v654_v30 = vmul.f32 %v2758_v50, %v2818_v21  ;;  %v1023_v21 = vld [vmem:[#allocation2 + $0xe0] sm:$0xff] }
  0xb0   : > { %v655_v24 = vmul.f32 %v2758_v50, %v2822_v22  ;;  %v1447_v59 = vmin.f32 %v1415_v53, 6.0  ;;  %v585_v45 = vadd.f32 %v553_v1, %v452_v51  ;;  %v586_v63 = vadd.f32 %v554_v56, %v453_v27  ;;  %v1225_v51 = vld [vmem:[#allocation2 + $0xe2] sm:$0xff] }
  0xb1   : > { %v1448_v8 = vmin.f32 %v1416_v42, 6.0  ;;  %v1190_v37 = vadd.f32 %v1158_v2, %v1089_v14  ;;  %v1191_v55 = vadd.f32 %v1159_v3, %v1090_v57  ;;  %v755_v13 = vmul.f32 %v2769_v7, %v1020_v46  ;;  %v1124_v2 = vld [vmem:[#allocation2 + $0xe1] sm:$0xff] }
  0xb2   : > { %v756_v33 = vmul.f32 %v2769_v7, %v1021_v47  ;;  %v686_v5 = vadd.f32 %v654_v30, %v585_v45  ;;  %v687_v41 = vadd.f32 %v655_v24, %v586_v63  ;;  %v856_v25 = vmul.f32 %v2776_v31, %v1121_v12  ;;  %v1224_v3 = vld [vmem:[#allocation2 + $0xda] sm:$0xff] }
  0xb3   : > { %v1466_v15 = vpack.c.bf16 %v1448_v8, %v1447_v59  ;;  %v1291_v48 = vadd.f32 %v1259_v32, %v1190_v37  ;;  %v1292_v22 = vadd.f32 %v1260_v62, %v1191_v55  ;;  %v857_v58 = vmul.f32 %v2776_v31, %v1122_v35 }
  0xb4   : > { %v957_v0 = vmul.f32 %v2785_v6, %v1222_v26  ;;  %v787_v46 = vadd.f32 %v755_v13, %v686_v5  ;;  %v788_v47 = vadd.f32 %v756_v33, %v687_v41  ;;  %v958_v29 = vmul.f32 %v2785_v6, %v1223_v54 }
  0xb5   : > { %2002 = vmatmul.mubr.msk.bf16.gmra.mrb[8].mxu1 %vm280_vm0, %v1466_v15  ;;  %v1059_v34 = vmul.f32 %v2798_v11, %v1022_v38  ;;  %v1330_v12 = vmul.f32 %v2918_v61, %v1291_v48  ;;  %v1331_v32 = vmul.f32 %v2918_v61, %v1292_v22  ;;  %v1060_v62 = vmul.f32 %v2798_v11, %v1023_v21 }
  0xb6   : > { %v1160_v35 = vmul.f32 %v2814_v18, %v1123_v16  ;;  %v888_v26 = vadd.f32 %v856_v25, %v787_v46  ;;  %v889_v27 = vadd.f32 %v857_v58, %v788_v47  ;;  %v1161_v53 = vmul.f32 %v2814_v18, %v1124_v2  ;;  %v1036_v2 = vld [vmem:[#allocation2 + $0x180] sm:$0xff] }
  0xb7   : > { %v1261_v42 = vmul.f32 %v2827_v40, %v1224_v3  ;;  %v1369_v1 = vadd.f32 %v2941_v17, %v1330_v12  ;;  %v1370_v54 = vadd.f32 %v2941_v17, %v1331_v32  ;;  %v1262_v56 = vmul.f32 %v2827_v40, %v1225_v51  ;;  %v1037_v3 = vld [vmem:[#allocation2 + $0x188] sm:$0xff] }
  0xb8   : > { %v466_v14 = vmul.f32 %v2739_v9, %v2857_v10  ;;  %v989_v57 = vadd.f32 %v957_v0, %v888_v26  ;;  %v990_v30 = vadd.f32 %v958_v29, %v889_v27  ;;  %v467_v24 = vmul.f32 %v2739_v9, %v2859_v20  ;;  %v1137_v51 = vld [vmem:[#allocation2 + $0x181] sm:$0xff] }
  0xb9   : > { %v567_v59 = vmul.f32 %v2749_v39, %v2868_v52  ;;  %v1401_v8 = vmax.f32 %v1369_v1, 0.0  ;;  %v1402_v45 = vmax.f32 %v1370_v54, 0.0  ;;  %v568_v63 = vmul.f32 %v2749_v39, %v2872_v44  ;;  %v1238_v27 = vld [vmem:[#allocation2 + $0x182] sm:$0xff] }
  0xba   : > { %v668_v37 = vmul.f32 %v2758_v50, %v2876_v49  ;;  %v1091_v55 = vadd.f32 %v1059_v34, %v989_v57  ;;  %v1092_v13 = vadd.f32 %v1060_v62, %v990_v30  ;;  %v669_v10 = vmul.f32 %v2758_v50, %v2878_v36 }
  0xbb   : > { %v599_v33 = vadd.f32 %v567_v59, %v466_v14  ;;  %v1433_v38 = vmin.f32 %v1401_v8, 6.0  ;;  %v1434_v15 = vmin.f32 %v1402_v45, 6.0  ;;  %v600_v20 = vadd.f32 %v568_v63, %v467_v24 }
  0xbc   : > { %v769_v52 = vmul.f32 %v2769_v7, %v2910_v60  ;;  %v1192_v5 = vadd.f32 %v1160_v35, %v1091_v55  ;;  %v1193_v41 = vadd.f32 %v1161_v53, %v1092_v13  ;;  %v770_v44 = vmul.f32 %v2769_v7, %v2912_v23  ;;  %v1138_v35 = vld [vmem:[#allocation2 + $0x189] sm:$0xff] }
  0xbd   : > { %v700_v25 = vadd.f32 %v668_v37, %v599_v33  ;;  %v1459_v21 = vpack.c.bf16 %v1434_v15, %v1433_v38  ;;  %v701_v49 = vadd.f32 %v669_v10, %v600_v20  ;;  %v870_v16 = vmul.f32 %v2776_v31, %v2927_v43  ;;  %v1239_v53 = vld [vmem:[#allocation2 + $0x18a] sm:$0xff] }
  0xbe   : > { %v871_v36 = vmul.f32 %v2776_v31, %v2930_v28  ;;  %v1293_v48 = vadd.f32 %v1261_v42, %v1192_v5  ;;  %v1294_v22 = vadd.f32 %v1262_v56, %v1193_v41  ;;  %v971_v0 = vmul.f32 %v2785_v6, %v2934_v4  ;;  %v1038_v41 = vld [vmem:[#allocation2 + $0x198] sm:$0xff] }
  0xbf   : > { %v801_v58 = vadd.f32 %v769_v52, %v700_v25  ;;  %1989 = vmatprep.mubr.msk.bf16.mxu0 %vm280_vm0, %v1459_v21  ;;  %v802_v46 = vadd.f32 %v770_v44, %v701_v49  ;;  %v972_v47 = vmul.f32 %v2785_v6, %v2936_v19  ;;  %v1073_v29 = vmul.f32 %v2798_v11, %v1036_v2  ;;  %v1039_v49 = vld [vmem:[#allocation2 + $0x1a0] sm:$0xff] }
  0xc0   : > { %v1074_v34 = vmul.f32 %v2798_v11, %v1037_v3  ;;  %v1332_v12 = vmul.f32 %v2918_v61, %v1293_v48  ;;  %v1333_v32 = vmul.f32 %v2918_v61, %v1294_v22  ;;  %v1174_v26 = vmul.f32 %v2814_v18, %v1137_v51  ;;  %v1139_v48 = vld [vmem:[#allocation2 + $0x199] sm:$0xff] }
  0xc1   : > { %v902_v62 = vadd.f32 %v870_v16, %v801_v58  ;;  %v903_v42 = vadd.f32 %v871_v36, %v802_v46  ;;  %v1175_v1 = vmul.f32 %v2814_v18, %v1138_v35  ;;  %v1275_v54 = vmul.f32 %v2827_v40, %v1238_v27 }
  0xc2   : > { %v1276_v56 = vmul.f32 %v2827_v40, %v1239_v53  ;;  %v1371_v14 = vadd.f32 %v2941_v17, %v1332_v12  ;;  %v1372_v57 = vadd.f32 %v2941_v17, %v1333_v32  ;;  %v468_v24 = vmul.f32 %v2739_v9, %v2910_v60 }
  0xc3   : > { %v1003_v30 = vadd.f32 %v971_v0, %v902_v62  ;;  %v1004_v59 = vadd.f32 %v972_v47, %v903_v42  ;;  %v469_v8 = vmul.f32 %v2739_v9, %v2912_v23  ;;  %v569_v45 = vmul.f32 %v2749_v39, %v2927_v43  ;;  %v1140_v0 = vld [vmem:[#allocation2 + $0x1a1] sm:$0xff] }
  0xc4   : > { %v570_v63 = vmul.f32 %v2749_v39, %v2930_v28  ;;  %v1403_v37 = vmax.f32 %v1371_v14, 0.0  ;;  %v1404_v55 = vmax.f32 %v1372_v57, 0.0  ;;  %v670_v33 = vmul.f32 %v2758_v50, %v2934_v4  ;;  %v1240_v47 = vld [vmem:[#allocation2 + $0x19a] sm:$0xff] }
  0xc5   : > { %v1105_v13 = vadd.f32 %v1073_v29, %v1003_v30  ;;  %v1106_v10 = vadd.f32 %v1074_v34, %v1004_v59  ;;  %v601_v38 = vadd.f32 %v569_v45, %v468_v24  ;;  %v671_v60 = vmul.f32 %v2758_v50, %v2936_v19 }
  0xc6   : > { %v602_v15 = vadd.f32 %v570_v63, %v469_v8  ;;  %v1435_v20 = vmin.f32 %v1403_v37, 6.0  ;;  %v1436_v9 = vmin.f32 %v1404_v55, 6.0  ;;  %v771_v43 = vmul.f32 %v2769_v7, %v1036_v2 }
  0xc7   : > { %v1206_v23 = vadd.f32 %v1174_v26, %v1105_v13  ;;  %v1207_v52 = vadd.f32 %v1175_v1, %v1106_v10  ;;  %v702_v5 = vadd.f32 %v670_v33, %v601_v38  ;;  %v772_v28 = vmul.f32 %v2769_v7, %v1037_v3  ;;  %v3088_v33 = vld [vmem:[%s3238_s5] ss:$0 sm:$0xff] }
  0xc8   : > { %v703_v39 = vadd.f32 %v671_v60, %v602_v15  ;;  %v1460_v25 = vpack.c.bf16 %v1436_v9, %v1435_v20  ;;  %v872_v4 = vmul.f32 %v2776_v31, %v1137_v51  ;;  %v873_v21 = vmul.f32 %v2776_v31, %v1138_v35  ;;  %v1241_v51 = vld [vmem:[#allocation2 + $0x1a2] sm:$0xff] }
  0xc9   : > { %v1307_v44 = vadd.f32 %v1275_v54, %v1206_v23  ;;  %v1308_v16 = vadd.f32 %v1276_v56, %v1207_v52  ;;  %v803_v50 = vadd.f32 %v771_v43, %v702_v5  ;;  %v973_v36 = vmul.f32 %v2785_v6, %v1238_v27 }
  0xca   : > { %v804_v19 = vadd.f32 %v772_v28, %v703_v39  ;;  %1990 = vmatmul.mubr.msk.bf16.gmra.mrb[12].mxu0 %vm280_vm0, %v1460_v25  ;;  %v974_v7 = vmul.f32 %v2785_v6, %v1239_v53  ;;  %v1075_v58 = vmul.f32 %v2798_v11, %v1038_v41  ;;  %v1076_v46 = vmul.f32 %v2798_v11, %v1039_v49 }
  0xcb   : > { %v1346_v22 = vmul.f32 %v2918_v61, %v1307_v44  ;;  %v1347_v2 = vmul.f32 %v2918_v61, %v1308_v16  ;;  %v904_v3 = vadd.f32 %v872_v4, %v803_v50  ;;  %v1176_v34 = vmul.f32 %v2814_v18, %v1139_v48 }
  0xcc   : > { %v905_v31 = vadd.f32 %v873_v21, %v804_v19  ;;  %v1177_v6 = vmul.f32 %v2814_v18, %v1140_v0  ;;  %v1277_v26 = vmul.f32 %v2827_v40, %v1240_v47  ;;  %v1278_v11 = vmul.f32 %v2827_v40, %v1241_v51 }
  0xcd   : > { %v1385_v29 = vadd.f32 %v2941_v17, %v1346_v22  ;;  %v1386_v12 = vadd.f32 %v2941_v17, %v1347_v2  ;;  %v1005_v32 = vadd.f32 %v973_v36, %v904_v3 }
  0xce   : > { %v1006_v62 = vadd.f32 %v974_v7, %v905_v31 }
  0xcf   : > { %v1417_v35 = vmax.f32 %v1385_v29, 0.0  ;;  %v1418_v27 = vmax.f32 %v1386_v12, 0.0  ;;  %v1107_v53 = vadd.f32 %v1075_v58, %v1005_v32 }
  0xd0   : > { %v1108_v42 = vadd.f32 %v1076_v46, %v1006_v62 }
  0xd1   : > { %v1449_v1 = vmin.f32 %v1417_v35, 6.0  ;;  %v1450_v54 = vmin.f32 %v1418_v27, 6.0  ;;  %v1208_v56 = vadd.f32 %v1176_v34, %v1107_v53 }
  0xd2   : > { %v1209_v14 = vadd.f32 %v1177_v6, %v1108_v42 }
  0xd3   : > { %v1467_v57 = vpack.c.bf16 %v1450_v54, %v1449_v1  ;;  %v1309_v30 = vadd.f32 %v1277_v26, %v1208_v56 }
  0xd4   : > { %v1310_v24 = vadd.f32 %v1278_v11, %v1209_v14 }
  0xd5   : > { %2005 = vmatprep.mubr.msk.bf16.mxu1 %vm280_vm0, %v1467_v57  ;;  %v1348_v59 = vmul.f32 %v2918_v61, %v1309_v30 }
  0xd6   : > { %v1349_v18 = vmul.f32 %v2918_v61, %v1310_v24  ;;  %v3093_v61 = vld [vmem:[%s3239_s6] ss:$0 sm:$0xff] }
  0xd7   : > { %v1387_v8 = vadd.f32 %v2941_v17, %v1348_v59 }
  0xd8   : > { %v1388_v45 = vadd.f32 %v2941_v17, %v1349_v18 }
  0xd9   : > { %v1419_v63 = vmax.f32 %v1387_v8, 0.0 }
  0xda   : > { %v1420_v37 = vmax.f32 %v1388_v45, 0.0 }
  0xdb   : > { %v1451_v40 = vmin.f32 %v1419_v63, 6.0 }
  0xdc   : > { %v1452_v55 = vmin.f32 %v1420_v37, 6.0 }
  0xde   : > { %v1468_v13 = vpack.c.bf16 %v1452_v55, %v1451_v40 }
  0xe0   : > { %2006 = vmatmul.mubr.msk.bf16.gmra.mrb[12].mxu1 %vm280_vm0, %v1468_v13 }
 0x11d   : > { %v1979_v10 = vpop.f32.mrb[0].mxu0 }
 0x11e   : > { %v1695_v17 = vmul.f32 %v1979_v10, %v3088_v33  ;;  %v1559_v38 = vpop.f32.mrb[1].mxu0 }
 0x11f   : > { %v1693_v15 = vmul.f32 %v3088_v33, %v1559_v38  ;;  %v1980_v60 = vpop.f32.mrb[2].mxu0 }
 0x120   : > { %v1734_v20 = vadd.f32 %v3093_v61, %v1695_v17  ;;  %v1696_v9 = vmul.f32 %v1980_v60, %v3088_v33  ;;  %v1562_v23 = vpop.f32.mrb[3].mxu0 }
 0x121   : > { %v1732_v43 = vadd.f32 %v3093_v61, %v1693_v15  ;;  %v1694_v52 = vmul.f32 %v3088_v33, %v1562_v23 }
 0x122   : > { %v1766_v5 = vmax.f32 %v1734_v20, 0.0  ;;  %v1735_v39 = vadd.f32 %v3093_v61, %v1696_v9 }
 0x123   : > { %v1764_v28 = vmax.f32 %v1732_v43, 0.0  ;;  %v1733_v41 = vadd.f32 %v3093_v61, %v1694_v52 }
 0x124   : > { %v1798_v25 = vmin.f32 %v1766_v5, 6.0  ;;  %v1767_v44 = vmax.f32 %v1735_v39, 0.0 }
 0x125   : > { %v1796_v4 = vmin.f32 %v1764_v28, 6.0  ;;  %v1765_v21 = vmax.f32 %v1733_v41, 0.0 }
 0x126   : > { %1830 = vst.msk [vmem:[%s3107_s19 + $0x10] sm:$0xff] %vm280_vm0, %v1798_v25  ;;  %v1799_v49 = vmin.f32 %v1767_v44, 6.0 }
 0x127   : > { %1828 = vst.msk [vmem:[%s3107_s19] sm:$0xff] %vm280_vm0, %v1796_v4  ;;  %v1797_v16 = vmin.f32 %v1765_v21, 6.0 }
 0x128   : > { %1831 = vst.msk [vmem:[%s3107_s19 + $0x18] sm:$0xff] %vm280_vm0, %v1799_v49 }
 0x129   : > { %1829 = vst.msk [vmem:[%s3107_s19 + $0x8] sm:$0xff] %vm280_vm0, %v1797_v16 }
 0x132   : > { %v1995_v50 = vpop.f32.mrb[0].mxu1 }
 0x133   : > { %v1711_v19 = vmul.f32 %v1995_v50, %v3088_v33  ;;  %v1623_v36 = vpop.f32.mrb[1].mxu1 }
 0x134   : > { %v1709_v48 = vmul.f32 %v3088_v33, %v1623_v36  ;;  %v1996_v22 = vpop.f32.mrb[2].mxu1 }
 0x135   : > { %v1750_v7 = vadd.f32 %v3093_v61, %v1711_v19  ;;  %v1712_v58 = vmul.f32 %v1996_v22, %v3088_v33  ;;  %v1626_v0 = vpop.f32.mrb[3].mxu1 }
 0x136   : > { %v1748_v2 = vadd.f32 %v3093_v61, %v1709_v48  ;;  %v1710_v3 = vmul.f32 %v3088_v33, %v1626_v0 }
 0x137   : > { %v1782_v31 = vmax.f32 %v1750_v7, 0.0  ;;  %v1751_v46 = vadd.f32 %v3093_v61, %v1712_v58 }
 0x138   : > { %v1780_v47 = vmax.f32 %v1748_v2, 0.0  ;;  %v1749_v29 = vadd.f32 %v3093_v61, %v1710_v3 }
 0x139   : > { %v1814_v34 = vmin.f32 %v1782_v31, 6.0  ;;  %v1783_v51 = vmax.f32 %v1751_v46, 0.0 }
 0x13a   : > { %v1812_v12 = vmin.f32 %v1780_v47, 6.0  ;;  %v1781_v32 = vmax.f32 %v1749_v29, 0.0 }
 0x13b   : > { %1846 = vst.msk [vmem:[%s3107_s19 + $0x90] sm:$0xff] %vm280_vm0, %v1814_v34  ;;  %v1815_v62 = vmin.f32 %v1783_v51, 6.0 }
 0x13c   : > { %1844 = vst.msk [vmem:[%s3107_s19 + $0x80] sm:$0xff] %vm280_vm0, %v1812_v12  ;;  %v1813_v6 = vmin.f32 %v1781_v32, 6.0 }
 0x13d   : > { %1847 = vst.msk [vmem:[%s3107_s19 + $0x98] sm:$0xff] %vm280_vm0, %v1815_v62 }
 0x13e   : > { %1845 = vst.msk [vmem:[%s3107_s19 + $0x88] sm:$0xff] %vm280_vm0, %v1813_v6 }
 0x147   : > { %v1983_v35 = vpop.f32.mrb[4].mxu0 }
 0x148   : > { %v1699_v26 = vmul.f32 %v1983_v35, %v3088_v33  ;;  %v1575_v27 = vpop.f32.mrb[5].mxu0 }
 0x149   : > { %v1697_v53 = vmul.f32 %v3088_v33, %v1575_v27  ;;  %v1984_v42 = vpop.f32.mrb[6].mxu0 }
 0x14a   : > { %v1738_v11 = vadd.f32 %v3093_v61, %v1699_v26  ;;  %v1700_v1 = vmul.f32 %v1984_v42, %v3088_v33  ;;  %v1578_v54 = vpop.f32.mrb[7].mxu0 }
 0x14b   : > { %v1736_v56 = vadd.f32 %v3093_v61, %v1697_v53  ;;  %v1698_v14 = vmul.f32 %v3088_v33, %v1578_v54 }
 0x14c   : > { %v1770_v57 = vmax.f32 %v1738_v11, 0.0  ;;  %v1739_v30 = vadd.f32 %v3093_v61, %v1700_v1 }
 0x14d   : > { %v1768_v24 = vmax.f32 %v1736_v56, 0.0  ;;  %v1737_v59 = vadd.f32 %v3093_v61, %v1698_v14 }
 0x14e   : > { %v1802_v18 = vmin.f32 %v1770_v57, 6.0  ;;  %v1771_v8 = vmax.f32 %v1739_v30, 0.0 }
 0x14f   : > { %v1800_v45 = vmin.f32 %v1768_v24, 6.0  ;;  %v1769_v63 = vmax.f32 %v1737_v59, 0.0 }
 0x150   : > { %1834 = vst.msk [vmem:[%s3107_s19 + $0x30] sm:$0xff] %vm280_vm0, %v1802_v18  ;;  %v1803_v37 = vmin.f32 %v1771_v8, 6.0 }
 0x151   : > { %1832 = vst.msk [vmem:[%s3107_s19 + $0x20] sm:$0xff] %vm280_vm0, %v1800_v45  ;;  %v1801_v40 = vmin.f32 %v1769_v63, 6.0 }
 0x152   : > { %1835 = vst.msk [vmem:[%s3107_s19 + $0x38] sm:$0xff] %vm280_vm0, %v1803_v37 }
 0x153   : > { %1833 = vst.msk [vmem:[%s3107_s19 + $0x28] sm:$0xff] %vm280_vm0, %v1801_v40 }
 0x15d   : > { %v1999_v55 = vpop.f32.mrb[4].mxu1 }
 0x15e   : > { %v1715_v13 = vmul.f32 %v1999_v55, %v3088_v33  ;;  %v1639_v10 = vpop.f32.mrb[5].mxu1 }
 0x15f   : > { %v1713_v17 = vmul.f32 %v3088_v33, %v1639_v10  ;;  %v2000_v38 = vpop.f32.mrb[6].mxu1 }
 0x160   : > { %v1754_v15 = vadd.f32 %v3093_v61, %v1715_v13  ;;  %v1716_v60 = vmul.f32 %v2000_v38, %v3088_v33  ;;  %v1642_v20 = vpop.f32.mrb[7].mxu1 }
 0x161   : > { %v1752_v9 = vadd.f32 %v3093_v61, %v1713_v17  ;;  %v1714_v23 = vmul.f32 %v3088_v33, %v1642_v20 }
 0x162   : > { %v1786_v43 = vmax.f32 %v1754_v15, 0.0  ;;  %v1755_v52 = vadd.f32 %v3093_v61, %v1716_v60 }
 0x163   : > { %v1784_v5 = vmax.f32 %v1752_v9, 0.0  ;;  %v1753_v39 = vadd.f32 %v3093_v61, %v1714_v23 }
 0x164   : > { %v1818_v28 = vmin.f32 %v1786_v43, 6.0  ;;  %v1787_v41 = vmax.f32 %v1755_v52, 0.0 }
 0x165   : > { %v1816_v25 = vmin.f32 %v1784_v5, 6.0  ;;  %v1785_v44 = vmax.f32 %v1753_v39, 0.0 }
 0x166   : > { %1850 = vst.msk [vmem:[%s3107_s19 + $0xb0] sm:$0xff] %vm280_vm0, %v1818_v28  ;;  %v1819_v4 = vmin.f32 %v1787_v41, 6.0 }
 0x167   : > { %1848 = vst.msk [vmem:[%s3107_s19 + $0xa0] sm:$0xff] %vm280_vm0, %v1816_v25  ;;  %v1817_v21 = vmin.f32 %v1785_v44, 6.0 }
 0x168   : > { %1851 = vst.msk [vmem:[%s3107_s19 + $0xb8] sm:$0xff] %vm280_vm0, %v1819_v4 }
 0x169   : > { %1849 = vst.msk [vmem:[%s3107_s19 + $0xa8] sm:$0xff] %vm280_vm0, %v1817_v21 }
 0x172   : > { %v1987_v49 = vpop.f32.mrb[8].mxu0 }
 0x173   : > { %v1703_v16 = vmul.f32 %v1987_v49, %v3088_v33  ;;  %v1591_v50 = vpop.f32.mrb[9].mxu0 }
 0x174   : > { %v1701_v19 = vmul.f32 %v3088_v33, %v1591_v50  ;;  %v1988_v36 = vpop.f32.mrb[10].mxu0 }
 0x175   : > { %v1742_v48 = vadd.f32 %v3093_v61, %v1703_v16  ;;  %v1704_v22 = vmul.f32 %v1988_v36, %v3088_v33  ;;  %v1594_v7 = vpop.f32.mrb[11].mxu0 }
 0x176   : > { %v1740_v58 = vadd.f32 %v3093_v61, %v1701_v19  ;;  %v1702_v0 = vmul.f32 %v3088_v33, %v1594_v7 }
 0x177   : > { %v1774_v2 = vmax.f32 %v1742_v48, 0.0  ;;  %v1743_v3 = vadd.f32 %v3093_v61, %v1704_v22 }
 0x178   : > { %v1772_v31 = vmax.f32 %v1740_v58, 0.0  ;;  %v1741_v46 = vadd.f32 %v3093_v61, %v1702_v0 }
 0x179   : > { %v1806_v47 = vmin.f32 %v1774_v2, 6.0  ;;  %v1775_v29 = vmax.f32 %v1743_v3, 0.0 }
 0x17a   : > { %v1804_v34 = vmin.f32 %v1772_v31, 6.0  ;;  %v1773_v51 = vmax.f32 %v1741_v46, 0.0 }
 0x17b   : > { %1838 = vst.msk [vmem:[%s3107_s19 + $0x50] sm:$0xff] %vm280_vm0, %v1806_v47  ;;  %v1807_v12 = vmin.f32 %v1775_v29, 6.0 }
 0x17c   : > { %1836 = vst.msk [vmem:[%s3107_s19 + $0x40] sm:$0xff] %vm280_vm0, %v1804_v34  ;;  %v1805_v32 = vmin.f32 %v1773_v51, 6.0 }
 0x17d   : > { %1839 = vst.msk [vmem:[%s3107_s19 + $0x58] sm:$0xff] %vm280_vm0, %v1807_v12 }
 0x17e   : > { %1837 = vst.msk [vmem:[%s3107_s19 + $0x48] sm:$0xff] %vm280_vm0, %v1805_v32 }
 0x188   : > { %v2003_v62 = vpop.f32.mrb[8].mxu1 }
 0x189   : > { %v1719_v6 = vmul.f32 %v2003_v62, %v3088_v33  ;;  %v1655_v35 = vpop.f32.mrb[9].mxu1 }
 0x18a   : > { %v1717_v26 = vmul.f32 %v3088_v33, %v1655_v35  ;;  %v2004_v27 = vpop.f32.mrb[10].mxu1 }
 0x18b   : > { %v1758_v53 = vadd.f32 %v3093_v61, %v1719_v6  ;;  %v1720_v42 = vmul.f32 %v2004_v27, %v3088_v33  ;;  %v1658_v11 = vpop.f32.mrb[11].mxu1 }
 0x18c   : > { %v1756_v1 = vadd.f32 %v3093_v61, %v1717_v26  ;;  %v1718_v54 = vmul.f32 %v3088_v33, %v1658_v11 }
 0x18d   : > { %v1790_v56 = vmax.f32 %v1758_v53, 0.0  ;;  %v1759_v14 = vadd.f32 %v3093_v61, %v1720_v42 }
 0x18e   : > { %v1788_v57 = vmax.f32 %v1756_v1, 0.0  ;;  %v1757_v30 = vadd.f32 %v3093_v61, %v1718_v54 }
 0x18f   : > { %v1822_v24 = vmin.f32 %v1790_v56, 6.0  ;;  %v1791_v59 = vmax.f32 %v1759_v14, 0.0 }
 0x190   : > { %v1820_v18 = vmin.f32 %v1788_v57, 6.0  ;;  %v1789_v8 = vmax.f32 %v1757_v30, 0.0 }
 0x191   : > { %1854 = vst.msk [vmem:[%s3107_s19 + $0xd0] sm:$0xff] %vm280_vm0, %v1822_v24  ;;  %v1823_v45 = vmin.f32 %v1791_v59, 6.0 }
 0x192   : > { %1852 = vst.msk [vmem:[%s3107_s19 + $0xc0] sm:$0xff] %vm280_vm0, %v1820_v18  ;;  %v1821_v63 = vmin.f32 %v1789_v8, 6.0 }
 0x193   : > { %1855 = vst.msk [vmem:[%s3107_s19 + $0xd8] sm:$0xff] %vm280_vm0, %v1823_v45 }
 0x194   : > { %1853 = vst.msk [vmem:[%s3107_s19 + $0xc8] sm:$0xff] %vm280_vm0, %v1821_v63 }
 0x19d   : > { %v1991_v37 = vpop.f32.mrb[12].mxu0 }
 0x19e   : > { %v1707_v40 = vmul.f32 %v1991_v37, %v3088_v33  ;;  %v1607_v55 = vpop.f32.mrb[13].mxu0 }
 0x19f   : > { %v1705_v13 = vmul.f32 %v3088_v33, %v1607_v55  ;;  %v1992_v10 = vpop.f32.mrb[14].mxu0 }
 0x1a0   : > { %v1746_v17 = vadd.f32 %v3093_v61, %v1707_v40  ;;  %v1708_v38 = vmul.f32 %v1992_v10, %v3088_v33  ;;  %v1610_v15 = vpop.f32.mrb[15].mxu0 }
 0x1a1   : > { %v1744_v60 = vadd.f32 %v3093_v61, %v1705_v13  ;;  %v1706_v20 = vmul.f32 %v3088_v33, %v1610_v15 }
 0x1a2   : > { %v1778_v9 = vmax.f32 %v1746_v17, 0.0  ;;  %v1747_v23 = vadd.f32 %v3093_v61, %v1708_v38 }
 0x1a3   : > { %v1776_v43 = vmax.f32 %v1744_v60, 0.0  ;;  %v1745_v52 = vadd.f32 %v3093_v61, %v1706_v20 }
 0x1a4   : > { %v1810_v5 = vmin.f32 %v1778_v9, 6.0  ;;  %v1779_v39 = vmax.f32 %v1747_v23, 0.0 }
 0x1a5   : > { %v1808_v28 = vmin.f32 %v1776_v43, 6.0  ;;  %v1777_v41 = vmax.f32 %v1745_v52, 0.0 }
 0x1a6   : > { %1842 = vst.msk [vmem:[%s3107_s19 + $0x70] sm:$0xff] %vm280_vm0, %v1810_v5  ;;  %v1811_v25 = vmin.f32 %v1779_v39, 6.0 }
 0x1a7   : > { %1840 = vst.msk [vmem:[%s3107_s19 + $0x60] sm:$0xff] %vm280_vm0, %v1808_v28  ;;  %v1809_v44 = vmin.f32 %v1777_v41, 6.0 }
 0x1a8   : > { %1843 = vst.msk [vmem:[%s3107_s19 + $0x78] sm:$0xff] %vm280_vm0, %v1811_v25 }
 0x1a9   : > { %1841 = vst.msk [vmem:[%s3107_s19 + $0x68] sm:$0xff] %vm280_vm0, %v1809_v44 }
 0x1b3   : > { %v2007_v4 = vpop.f32.mrb[12].mxu1 }
 0x1b4   : > { %v1723_v21 = vmul.f32 %v2007_v4, %v3088_v33  ;;  %v1671_v49 = vpop.f32.mrb[13].mxu1 }
 0x1b5   : > { %v1721_v16 = vmul.f32 %v3088_v33, %v1671_v49  ;;  %v2008_v50 = vpop.f32.mrb[14].mxu1 }
 0x1b6   : > { %v1762_v19 = vadd.f32 %v3093_v61, %v1723_v21  ;;  %v1724_v36 = vmul.f32 %v2008_v50, %v3088_v33  ;;  %v1674_v48 = vpop.f32.mrb[15].mxu1 }
 0x1b7   : > { %v1760_v22 = vadd.f32 %v3093_v61, %v1721_v16  ;;  %v1722_v7 = vmul.f32 %v3088_v33, %v1674_v48 }
 0x1b8   : > { %v1794_v58 = vmax.f32 %v1762_v19, 0.0  ;;  %v1763_v0 = vadd.f32 %v3093_v61, %v1724_v36 }
 0x1b9   : > { %v1792_v2 = vmax.f32 %v1760_v22, 0.0  ;;  %v1761_v3 = vadd.f32 %v3093_v61, %v1722_v7 }
 0x1ba   : > { %v1826_v31 = vmin.f32 %v1794_v58, 6.0  ;;  %v1795_v46 = vmax.f32 %v1763_v0, 0.0 }
 0x1bb   : > { %v1824_v47 = vmin.f32 %v1792_v2, 6.0  ;;  %v1793_v29 = vmax.f32 %v1761_v3, 0.0 }
 0x1bc   : > { %1858 = vst.msk [vmem:[%s3107_s19 + $0xf0] sm:$0xff] %vm280_vm0, %v1826_v31  ;;  %v1827_v34 = vmin.f32 %v1795_v46, 6.0 }
 0x1bd   : > { %1856 = vst.msk [vmem:[%s3107_s19 + $0xe0] sm:$0xff] %vm280_vm0, %v1824_v47  ;;  %v1825_v51 = vmin.f32 %v1793_v29, 6.0 }
 0x1be   : > { %1859 = vst.msk [vmem:[%s3107_s19 + $0xf8] sm:$0xff] %vm280_vm0, %v1827_v34 }
 0x1bf   : > { %1857 = vst.msk [vmem:[%s3107_s19 + $0xe8] sm:$0xff] %vm280_vm0, %v1825_v51 }
 0x1c0 PF: > { %s17_s24 = sadd.s32 1, %s2038_s24  }
 0x1c1   : > { %p14_p4 = scmp.ge.s32.totalorder %s17_s24, 4  }
 0x1c3   :  { %16 = sbr.rel (!%p14_p4) target bundleno = 1 (0x1), region = 80 }

</bundles_post_ra>
